<compile_context>
chip_gen: v7x
topology: tpu7x:2x2x1
jax: 0.10.0
libtpu: 0.0.40
codegen_flags: <defaults>
</compile_context>

<pallas_src>
import jax
import jax.numpy as jnp
from jax.experimental import pallas as pl
from jax.experimental.pallas import tpu as pltpu


_VMEM_LIMIT = 32 * 1024 * 1024   # safe on v5e/v6e (128 MiB) and v7x (64 MiB)
_CONV_TILE_M = 1024              # rows (pooled output pixels) per grid step
_MLP_TILE_N = 512                # batch rows per grid step


def _compiler_params():
    return pltpu.CompilerParams(
        dimension_semantics=("parallel",),   # shard row tiles across TCs (v7x)
        vmem_limit_bytes=_VMEM_LIMIT,
    )


# ----------------------------- Pallas kernels -----------------------------

def _conv_relu_pool_kernel(p_ref, w_ref, b_ref, o_ref):
    # p: (4, TM, K) bf16 -- the 4 maxpool taps of the im2col patch rows.
    # w: (K, C) bf16, b: (1, C) f32.
    # out: (TM, C) bf16 = max_t relu(p[t] @ w + b)   (== relu -> maxpool)
    w = w_ref[...]
    b = b_ref[...]

    def tap(t):
        acc = jnp.dot(p_ref[t], w, preferred_element_type=jnp.float32) + b
        return jnp.maximum(acc, 0.0)

    o = jnp.maximum(jnp.maximum(tap(0), tap(1)), jnp.maximum(tap(2), tap(3)))
    o_ref[...] = o.astype(o_ref.dtype)


def _mlp_logsoftmax_kernel(x_ref, w5_ref, b5_ref, w6_ref, b6_ref, o_ref):
    # x: (TN, 1600) bf16 -> Linear(1600,128) -> Linear(128,10) -> log_softmax
    h = jnp.dot(x_ref[...], w5_ref[...],
                preferred_element_type=jnp.float32) + b5_ref[...]
    logits = jnp.dot(h, w6_ref[...],
                     preferred_element_type=jnp.float32) + b6_ref[...]
    m = jnp.max(logits, axis=-1, keepdims=True)
    s = logits - m
    lse = jnp.log(jnp.sum(jnp.exp(s), axis=-1, keepdims=True))
    o_ref[...] = (s - lse).astype(o_ref.dtype)


# --------------------------- pallas_call wrappers ---------------------------

def _pad_rows(x, axis, multiple):
    pad = (-x.shape[axis]) % multiple
    if pad == 0:
        return x
    widths = [(0, 0)] * x.ndim
    widths[axis] = (0, pad)
    return jnp.pad(x, widths)


def _conv_relu_pool(p, w, b, tile_m=_CONV_TILE_M):
    """p: (4, M, K) bf16 pool-tap patches; w: (K, C) bf16; b: (1, C) f32 -> (M, C) bf16."""
    _, M, K = p.shape
    C = w.shape[1]
    if M <= tile_m:
        tm = M                                  # single full-extent block
    else:
        tm = tile_m                             # multiple of 8/16 -> legal tile
        p = _pad_rows(p, 1, tm)
    Mp = p.shape[1]
    out = pl.pallas_call(
        _conv_relu_pool_kernel,
        out_shape=jax.ShapeDtypeStruct((Mp, C), jnp.bfloat16),
        grid=(Mp // tm,),
        in_specs=[
            pl.BlockSpec((4, tm, K), lambda i: (0, i, 0)),
            pl.BlockSpec((K, C), lambda i: (0, 0)),   # grid-invariant: stays resident
            pl.BlockSpec((1, C), lambda i: (0, 0)),
        ],
        out_specs=pl.BlockSpec((tm, C), lambda i: (i, 0)),
        compiler_params=_compiler_params(),
    )(p, w, b)
    return out[:M] if Mp != M else out


def _mlp_logsoftmax(x, w5, b5, w6, b6, tile_n=_MLP_TILE_N):
    """x: (N, 1600) bf16 -> (N, 10) f32 log-probs."""
    N, K = x.shape
    H = w5.shape[1]
    O = w6.shape[1]
    if N <= tile_n:
        tn = N
    else:
        tn = tile_n
        x = _pad_rows(x, 0, tn)
    Np = x.shape[0]
    out = pl.pallas_call(
        _mlp_logsoftmax_kernel,
        out_shape=jax.ShapeDtypeStruct((Np, O), jnp.float32),
        grid=(Np // tn,),
        in_specs=[
            pl.BlockSpec((tn, K), lambda i: (i, 0)),
            pl.BlockSpec((K, H), lambda i: (0, 0)),   # weights grid-invariant
            pl.BlockSpec((1, H), lambda i: (0, 0)),
            pl.BlockSpec((H, O), lambda i: (0, 0)),
            pl.BlockSpec((1, O), lambda i: (0, 0)),
        ],
        out_specs=pl.BlockSpec((tn, O), lambda i: (i, 0)),
        compiler_params=_compiler_params(),
    )(x, w5, b5, w6, b6)
    return out[:N] if Np != N else out


# ------------------------------ JAX glue ops ------------------------------

def _im2col_pool_taps(x_nhwc, kh, kw):
    """Valid kh x kw conv patches, grouped by 2x2/stride-2 maxpool tap.

    Returns (taps, (n, ph, pw)) where taps has shape (4, n*ph*pw, c*kh*kw)
    with the K axis ordered (Cin, ky, kx) to match PyTorch's weight flatten.
    Conv output pixels dropped by the floor pooling are never materialized.
    """
    n, h, w, c = x_nhwc.shape
    oh, ow = h - kh + 1, w - kw + 1
    ph, pw = oh // 2, ow // 2
    taps = [x_nhwc[:, ky:ky + oh, kx:kx + ow, :]
            for ky in range(kh) for kx in range(kw)]          # each (n, oh, ow, c)
    p = jnp.stack(taps, axis=3)                               # (n, oh, ow, kh*kw, c)
    p = jnp.transpose(p, (0, 1, 2, 4, 3))                     # (n, oh, ow, c, kh*kw)
    p = p.reshape(n, oh, ow, c * kh * kw)
    p = p[:, :ph * 2, :pw * 2, :]                             # floor-pool crop
    t = jnp.stack([p[:, 0::2, 0::2, :], p[:, 0::2, 1::2, :],
                   p[:, 1::2, 0::2, :], p[:, 1::2, 1::2, :]], axis=0)
    return t.reshape(4, n * ph * pw, c * kh * kw), (n, ph, pw)


# ------------------------------ parameters ------------------------------

def init_params(key):
    """Parameters in PyTorch layouts (as nn.Conv2d / nn.Linear store them)."""
    ks = jax.random.split(key, 8)
    return {
        "w1": jax.random.normal(ks[0], (32, 1, 3, 3), jnp.float32) * 0.05,
        "b1": jax.random.normal(ks[1], (32,), jnp.float32) * 0.05,
        "w2": jax.random.normal(ks[2], (64, 32, 3, 3), jnp.float32) * 0.05,
        "b2": jax.random.normal(ks[3], (64,), jnp.float32) * 0.05,
        "w5": jax.random.normal(ks[4], (128, 5 * 5 * 64), jnp.float32) * 0.02,
        "b5": jax.random.normal(ks[5], (128,), jnp.float32) * 0.02,
        "w6": jax.random.normal(ks[6], (10, 128), jnp.float32) * 0.02,
        "b6": jax.random.normal(ks[7], (10,), jnp.float32) * 0.02,
    }


def prepare_params(p):
    """One-time conversion from PyTorch layout to kernel layout (hoisted out of
    the per-forward path).

    - conv / fc weights transposed to (K, C); matmul operands cast to bf16
      (f32 accumulation happens in-kernel), biases kept f32.
    - fc1 columns permuted from PyTorch's NCHW flatten order (C, H, W) to the
      NHWC flatten order (H, W, C) produced by the conv pipeline, eliminating
      the per-forward activation transpose.
    """
    w5 = jnp.transpose(p["w5"])                              # (1600, 128), rows (c,h,w)
    w5 = w5.reshape(64, 5, 5, 128)
    w5 = jnp.transpose(w5, (1, 2, 0, 3)).reshape(5 * 5 * 64, 128)   # rows (h,w,c)
    return {
        "w1": jnp.transpose(p["w1"].reshape(32, 9)).astype(jnp.bfloat16),    # (9, 32)
        "b1": p["b1"].reshape(1, 32).astype(jnp.float32),
        "w2": jnp.transpose(p["w2"].reshape(64, 288)).astype(jnp.bfloat16),  # (288, 64)
        "b2": p["b2"].reshape(1, 64).astype(jnp.float32),
        "w5": w5.astype(jnp.bfloat16),                                       # (1600, 128)
        "b5": p["b5"].reshape(1, 128).astype(jnp.float32),
        "w6": jnp.transpose(p["w6"]).astype(jnp.float32),                    # (128, 10)
        "b6": p["b6"].reshape(1, 10).astype(jnp.float32),
    }


# ------------------------------ full forward ------------------------------

def net_forward(kp, x_nchw):
    n = x_nchw.shape[0]
    # NCHW -> NHWC, bf16 operands for the MXU (f32 accumulation in-kernel).
    x = jnp.transpose(x_nchw, (0, 2, 3, 1)).astype(jnp.bfloat16)   # (n, 28, 28, 1)

    # conv1(1->32, 3x3) + ReLU + maxpool(2x2/2), fused in one tiled Pallas call.
    p1, (_, ph1, pw1) = _im2col_pool_taps(x, 3, 3)        # (4, n*13*13, 9)
    y2 = _conv_relu_pool(p1, kp["w1"], kp["b1"])          # (n*13*13, 32) bf16
    y2 = y2.reshape(n, ph1, pw1, 32)

    # conv2(32->64, 3x3) + ReLU + maxpool(2x2/2), fused in one tiled Pallas call.
    p2, (_, ph2, pw2) = _im2col_pool_taps(y2, 3, 3)       # (4, n*5*5, 288)
    y4 = _conv_relu_pool(p2, kp["w2"], kp["b2"])          # (n*5*5, 64) bf16

    # Flatten in NHWC (h, w, c) order; fc1 columns were pre-permuted to match
    # PyTorch's view(N, 5*5*64) of the NCHW tensor.
    flat = y4.reshape(n, ph2 * pw2 * 64)                  # (n, 1600) bf16

    # Linear(1600,128) -> Linear(128,10) -> log_softmax, fused + batch-tiled.
    return _mlp_logsoftmax(flat, kp["w5"], kp["b5"], kp["w6"], kp["b6"])


if __name__ == "__main__":
    key = jax.random.PRNGKey(0)
    pkey, xkey = jax.random.split(key)
    params = prepare_params(init_params(pkey))
    # MNIST-shaped input (the 5*5*64 flatten forces 28x28x1), small batch of 2.
    x = jax.random.normal(xkey, (2, 1, 28, 28), jnp.float32)

    fwd = jax.jit(net_forward)
    out = jax.block_until_ready(fwd(params, x))

    assert out.shape == (2, 10) and out.dtype == jnp.float32
    # log_softmax rows should (approximately) logsumexp to 0.
    assert jnp.allclose(jax.scipy.special.logsumexp(out, axis=1), 0.0, atol=1e-3)
    print("KERNEL_OK")
</pallas_src>

<mosaic_0001>
module attributes {stable_mosaic.version = 11 : i64} {
  func.func @_conv_relu_pool_kernel(%arg0: i32, %arg1: memref<4x338x9xbf16, #tpu.memory_space<vmem>>, %arg2: memref<9x32xbf16, #tpu.memory_space<vmem>>, %arg3: memref<1x32xf32, #tpu.memory_space<vmem>>, %arg4: memref<338x32xbf16, #tpu.memory_space<vmem>>) attributes {dimension_semantics = [#tpu.dimension_semantics<parallel>], iteration_bounds = array<i64: 1>, scalar_prefetch = 0 : i64, scratch_operands = 0 : i64, tpu.core_type = #tpu.core_type<tc>, window_params = [{transform_indices = @transform_0, window_bounds = array<i64: 4, 338, 9>}, {pipeline_mode = #tpu.pipeline_mode<synchronous>, transform_indices = @transform_1, window_bounds = array<i64: 9, 32>}, {pipeline_mode = #tpu.pipeline_mode<synchronous>, transform_indices = @transform_2, window_bounds = array<i64: 1, 32>}, {transform_indices = @transform_3, window_bounds = array<i64: 338, 32>}]} {
    %c0 = arith.constant 0 : index
    %c0_0 = arith.constant 0 : index
    %0 = vector.load %arg2[%c0, %c0_0] : memref<9x32xbf16, #tpu.memory_space<vmem>>, vector<9x32xbf16>
    %c0_1 = arith.constant 0 : index
    %c0_2 = arith.constant 0 : index
    %1 = vector.load %arg3[%c0_1, %c0_2] : memref<1x32xf32, #tpu.memory_space<vmem>>, vector<1x32xf32>
    %c0_3 = arith.constant 0 : index
    %c0_4 = arith.constant 0 : index
    %c0_5 = arith.constant 0 : index
    %2 = vector.load %arg1[%c0_3, %c0_4, %c0_5] : memref<4x338x9xbf16, #tpu.memory_space<vmem>>, vector<1x338x9xbf16>
    %3 = vector.shape_cast %2 : vector<1x338x9xbf16> to vector<338x9xbf16>
    %cst = arith.constant dense<0.000000e+00> : vector<338x32xf32>
    %4 = tpu.matmul %3, %0, %cst {dimension_numbers = #tpu.dot_dimension_numbers<[1], [0], [0], [1], [0, 0, 1, 1], [], []>} : vector<338x9xbf16>, vector<9x32xbf16>, vector<338x32xf32> -> vector<338x32xf32>
    %5 = vector.broadcast %1 : vector<1x32xf32> to vector<338x32xf32>
    %6 = arith.addf %4, %5 : vector<338x32xf32>
    %cst_6 = arith.constant 0.000000e+00 : f32
    %7 = vector.broadcast %cst_6 : f32 to vector<338x32xf32>
    %8 = arith.maximumf %6, %7 : vector<338x32xf32>
    %c1 = arith.constant 1 : index
    %c0_7 = arith.constant 0 : index
    %c0_8 = arith.constant 0 : index
    %9 = vector.load %arg1[%c1, %c0_7, %c0_8] : memref<4x338x9xbf16, #tpu.memory_space<vmem>>, vector<1x338x9xbf16>
    %10 = vector.shape_cast %9 : vector<1x338x9xbf16> to vector<338x9xbf16>
    %cst_9 = arith.constant dense<0.000000e+00> : vector<338x32xf32>
    %11 = tpu.matmul %10, %0, %cst_9 {dimension_numbers = #tpu.dot_dimension_numbers<[1], [0], [0], [1], [0, 0, 1, 1], [], []>} : vector<338x9xbf16>, vector<9x32xbf16>, vector<338x32xf32> -> vector<338x32xf32>
    %12 = vector.broadcast %1 : vector<1x32xf32> to vector<338x32xf32>
    %13 = arith.addf %11, %12 : vector<338x32xf32>
    %cst_10 = arith.constant 0.000000e+00 : f32
    %14 = vector.broadcast %cst_10 : f32 to vector<338x32xf32>
    %15 = arith.maximumf %13, %14 : vector<338x32xf32>
    %16 = arith.maximumf %8, %15 : vector<338x32xf32>
    %c2 = arith.constant 2 : index
    %c0_11 = arith.constant 0 : index
    %c0_12 = arith.constant 0 : index
    %17 = vector.load %arg1[%c2, %c0_11, %c0_12] : memref<4x338x9xbf16, #tpu.memory_space<vmem>>, vector<1x338x9xbf16>
    %18 = vector.shape_cast %17 : vector<1x338x9xbf16> to vector<338x9xbf16>
    %cst_13 = arith.constant dense<0.000000e+00> : vector<338x32xf32>
    %19 = tpu.matmul %18, %0, %cst_13 {dimension_numbers = #tpu.dot_dimension_numbers<[1], [0], [0], [1], [0, 0, 1, 1], [], []>} : vector<338x9xbf16>, vector<9x32xbf16>, vector<338x32xf32> -> vector<338x32xf32>
    %20 = vector.broadcast %1 : vector<1x32xf32> to vector<338x32xf32>
    %21 = arith.addf %19, %20 : vector<338x32xf32>
    %cst_14 = arith.constant 0.000000e+00 : f32
    %22 = vector.broadcast %cst_14 : f32 to vector<338x32xf32>
    %23 = arith.maximumf %21, %22 : vector<338x32xf32>
    %c3 = arith.constant 3 : index
    %c0_15 = arith.constant 0 : index
    %c0_16 = arith.constant 0 : index
    %24 = vector.load %arg1[%c3, %c0_15, %c0_16] : memref<4x338x9xbf16, #tpu.memory_space<vmem>>, vector<1x338x9xbf16>
    %25 = vector.shape_cast %24 : vector<1x338x9xbf16> to vector<338x9xbf16>
    %cst_17 = arith.constant dense<0.000000e+00> : vector<338x32xf32>
    %26 = tpu.matmul %25, %0, %cst_17 {dimension_numbers = #tpu.dot_dimension_numbers<[1], [0], [0], [1], [0, 0, 1, 1], [], []>} : vector<338x9xbf16>, vector<9x32xbf16>, vector<338x32xf32> -> vector<338x32xf32>
    %27 = vector.broadcast %1 : vector<1x32xf32> to vector<338x32xf32>
    %28 = arith.addf %26, %27 : vector<338x32xf32>
    %cst_18 = arith.constant 0.000000e+00 : f32
    %29 = vector.broadcast %cst_18 : f32 to vector<338x32xf32>
    %30 = arith.maximumf %28, %29 : vector<338x32xf32>
    %31 = arith.maximumf %23, %30 : vector<338x32xf32>
    %32 = arith.maximumf %16, %31 : vector<338x32xf32>
    %33 = arith.truncf %32 : vector<338x32xf32> to vector<338x32xbf16>
    %c0_19 = arith.constant 0 : index
    %c0_20 = arith.constant 0 : index
    %34 = vector.load %arg4[%c0_19, %c0_20] : memref<338x32xbf16, #tpu.memory_space<vmem>>, vector<338x32xbf16>
    tpu.vector_store %arg4[%c0_19, %c0_20], %33 {strides = array<i32>} : memref<338x32xbf16, #tpu.memory_space<vmem>>, vector<338x32xbf16>,
    return
  }
  func.func @transform_0(%arg0: i32) -> (i32, i32, i32) {
    %c0_i32 = arith.constant 0 : i32
    %c0_i32_0 = arith.constant 0 : i32
    %c0_i32_1 = arith.constant 0 : i32
    return %c0_i32, %arg0, %c0_i32_0 : i32, i32, i32
  }
  func.func @transform_1(%arg0: i32) -> (i32, i32) {
    %c0_i32 = arith.constant 0 : i32
    %c0_i32_0 = arith.constant 0 : i32
    %c0_i32_1 = arith.constant 0 : i32
    return %c0_i32, %c0_i32_0 : i32, i32
  }
  func.func @transform_2(%arg0: i32) -> (i32, i32) {
    %c0_i32 = arith.constant 0 : i32
    %c0_i32_0 = arith.constant 0 : i32
    %c0_i32_1 = arith.constant 0 : i32
    return %c0_i32, %c0_i32_0 : i32, i32
  }
  func.func @transform_3(%arg0: i32) -> (i32, i32) {
    %c0_i32 = arith.constant 0 : i32
    %c0_i32_0 = arith.constant 0 : i32
    return %arg0, %c0_i32 : i32, i32
  }
}

module attributes {stable_mosaic.version = 11 : i64} {
  func.func @_conv_relu_pool_kernel(%arg0: i32, %arg1: memref<4x50x288xbf16, #tpu.memory_space<vmem>>, %arg2: memref<288x64xbf16, #tpu.memory_space<vmem>>, %arg3: memref<1x64xf32, #tpu.memory_space<vmem>>, %arg4: memref<50x64xbf16, #tpu.memory_space<vmem>>) attributes {dimension_semantics = [#tpu.dimension_semantics<parallel>], iteration_bounds = array<i64: 1>, scalar_prefetch = 0 : i64, scratch_operands = 0 : i64, tpu.core_type = #tpu.core_type<tc>, window_params = [{transform_indices = @transform_0, window_bounds = array<i64: 4, 50, 288>}, {pipeline_mode = #tpu.pipeline_mode<synchronous>, transform_indices = @transform_1, window_bounds = array<i64: 288, 64>}, {pipeline_mode = #tpu.pipeline_mode<synchronous>, transform_indices = @transform_2, window_bounds = array<i64: 1, 64>}, {transform_indices = @transform_3, window_bounds = array<i64: 50, 64>}]} {
    %c0 = arith.constant 0 : index
    %c0_0 = arith.constant 0 : index
    %0 = vector.load %arg2[%c0, %c0_0] : memref<288x64xbf16, #tpu.memory_space<vmem>>, vector<288x64xbf16>
    %c0_1 = arith.constant 0 : index
    %c0_2 = arith.constant 0 : index
    %1 = vector.load %arg3[%c0_1, %c0_2] : memref<1x64xf32, #tpu.memory_space<vmem>>, vector<1x64xf32>
    %c0_3 = arith.constant 0 : index
    %c0_4 = arith.constant 0 : index
    %c0_5 = arith.constant 0 : index
    %2 = vector.load %arg1[%c0_3, %c0_4, %c0_5] : memref<4x50x288xbf16, #tpu.memory_space<vmem>>, vector<1x50x288xbf16>
    %3 = vector.shape_cast %2 : vector<1x50x288xbf16> to vector<50x288xbf16>
    %cst = arith.constant dense<0.000000e+00> : vector<50x64xf32>
    %4 = tpu.matmul %3, %0, %cst {dimension_numbers = #tpu.dot_dimension_numbers<[1], [0], [0], [1], [0, 0, 1, 1], [], []>} : vector<50x288xbf16>, vector<288x64xbf16>, vector<50x64xf32> -> vector<50x64xf32>
    %5 = vector.broadcast %1 : vector<1x64xf32> to vector<50x64xf32>
    %6 = arith.addf %4, %5 : vector<50x64xf32>
    %cst_6 = arith.constant 0.000000e+00 : f32
    %7 = vector.broadcast %cst_6 : f32 to vector<50x64xf32>
    %8 = arith.maximumf %6, %7 : vector<50x64xf32>
    %c1 = arith.constant 1 : index
    %c0_7 = arith.constant 0 : index
    %c0_8 = arith.constant 0 : index
    %9 = vector.load %arg1[%c1, %c0_7, %c0_8] : memref<4x50x288xbf16, #tpu.memory_space<vmem>>, vector<1x50x288xbf16>
    %10 = vector.shape_cast %9 : vector<1x50x288xbf16> to vector<50x288xbf16>
    %cst_9 = arith.constant dense<0.000000e+00> : vector<50x64xf32>
    %11 = tpu.matmul %10, %0, %cst_9 {dimension_numbers = #tpu.dot_dimension_numbers<[1], [0], [0], [1], [0, 0, 1, 1], [], []>} : vector<50x288xbf16>, vector<288x64xbf16>, vector<50x64xf32> -> vector<50x64xf32>
    %12 = vector.broadcast %1 : vector<1x64xf32> to vector<50x64xf32>
    %13 = arith.addf %11, %12 : vector<50x64xf32>
    %cst_10 = arith.constant 0.000000e+00 : f32
    %14 = vector.broadcast %cst_10 : f32 to vector<50x64xf32>
    %15 = arith.maximumf %13, %14 : vector<50x64xf32>
    %16 = arith.maximumf %8, %15 : vector<50x64xf32>
    %c2 = arith.constant 2 : index
    %c0_11 = arith.constant 0 : index
    %c0_12 = arith.constant 0 : index
    %17 = vector.load %arg1[%c2, %c0_11, %c0_12] : memref<4x50x288xbf16, #tpu.memory_space<vmem>>, vector<1x50x288xbf16>
    %18 = vector.shape_cast %17 : vector<1x50x288xbf16> to vector<50x288xbf16>
    %cst_13 = arith.constant dense<0.000000e+00> : vector<50x64xf32>
    %19 = tpu.matmul %18, %0, %cst_13 {dimension_numbers = #tpu.dot_dimension_numbers<[1], [0], [0], [1], [0, 0, 1, 1], [], []>} : vector<50x288xbf16>, vector<288x64xbf16>, vector<50x64xf32> -> vector<50x64xf32>
    %20 = vector.broadcast %1 : vector<1x64xf32> to vector<50x64xf32>
    %21 = arith.addf %19, %20 : vector<50x64xf32>
    %cst_14 = arith.constant 0.000000e+00 : f32
    %22 = vector.broadcast %cst_14 : f32 to vector<50x64xf32>
    %23 = arith.maximumf %21, %22 : vector<50x64xf32>
    %c3 = arith.constant 3 : index
    %c0_15 = arith.constant 0 : index
    %c0_16 = arith.constant 0 : index
    %24 = vector.load %arg1[%c3, %c0_15, %c0_16] : memref<4x50x288xbf16, #tpu.memory_space<vmem>>, vector<1x50x288xbf16>
    %25 = vector.shape_cast %24 : vector<1x50x288xbf16> to vector<50x288xbf16>
    %cst_17 = arith.constant dense<0.000000e+00> : vector<50x64xf32>
    %26 = tpu.matmul %25, %0, %cst_17 {dimension_numbers = #tpu.dot_dimension_numbers<[1], [0], [0], [1], [0, 0, 1, 1], [], []>} : vector<50x288xbf16>, vector<288x64xbf16>, vector<50x64xf32> -> vector<50x64xf32>
    %27 = vector.broadcast %1 : vector<1x64xf32> to vector<50x64xf32>
    %28 = arith.addf %26, %27 : vector<50x64xf32>
    %cst_18 = arith.constant 0.000000e+00 : f32
    %29 = vector.broadcast %cst_18 : f32 to vector<50x64xf32>
    %30 = arith.maximumf %28, %29 : vector<50x64xf32>
    %31 = arith.maximumf %23, %30 : vector<50x64xf32>
    %32 = arith.maximumf %16, %31 : vector<50x64xf32>
    %33 = arith.truncf %32 : vector<50x64xf32> to vector<50x64xbf16>
    %c0_19 = arith.constant 0 : index
    %c0_20 = arith.constant 0 : index
    %34 = vector.load %arg4[%c0_19, %c0_20] : memref<50x64xbf16, #tpu.memory_space<vmem>>, vector<50x64xbf16>
    tpu.vector_store %arg4[%c0_19, %c0_20], %33 {strides = array<i32>} : memref<50x64xbf16, #tpu.memory_space<vmem>>, vector<50x64xbf16>,
    return
  }
  func.func @transform_0(%arg0: i32) -> (i32, i32, i32) {
    %c0_i32 = arith.constant 0 : i32
    %c0_i32_0 = arith.constant 0 : i32
    %c0_i32_1 = arith.constant 0 : i32
    return %c0_i32, %arg0, %c0_i32_0 : i32, i32, i32
  }
  func.func @transform_1(%arg0: i32) -> (i32, i32) {
    %c0_i32 = arith.constant 0 : i32
    %c0_i32_0 = arith.constant 0 : i32
    %c0_i32_1 = arith.constant 0 : i32
    return %c0_i32, %c0_i32_0 : i32, i32
  }
  func.func @transform_2(%arg0: i32) -> (i32, i32) {
    %c0_i32 = arith.constant 0 : i32
    %c0_i32_0 = arith.constant 0 : i32
    %c0_i32_1 = arith.constant 0 : i32
    return %c0_i32, %c0_i32_0 : i32, i32
  }
  func.func @transform_3(%arg0: i32) -> (i32, i32) {
    %c0_i32 = arith.constant 0 : i32
    %c0_i32_0 = arith.constant 0 : i32
    return %arg0, %c0_i32 : i32, i32
  }
}

module attributes {stable_mosaic.version = 11 : i64} {
  func.func @_mlp_logsoftmax_kernel(%arg0: i32, %arg1: memref<2x1600xbf16, #tpu.memory_space<vmem>>, %arg2: memref<1600x128xbf16, #tpu.memory_space<vmem>>, %arg3: memref<1x128xf32, #tpu.memory_space<vmem>>, %arg4: memref<128x10xf32, #tpu.memory_space<vmem>>, %arg5: memref<1x10xf32, #tpu.memory_space<vmem>>, %arg6: memref<2x10xf32, #tpu.memory_space<vmem>>) attributes {dimension_semantics = [#tpu.dimension_semantics<parallel>], iteration_bounds = array<i64: 1>, scalar_prefetch = 0 : i64, scratch_operands = 0 : i64, tpu.core_type = #tpu.core_type<tc>, window_params = [{transform_indices = @transform_0, window_bounds = array<i64: 2, 1600>}, {pipeline_mode = #tpu.pipeline_mode<synchronous>, transform_indices = @transform_1, window_bounds = array<i64: 1600, 128>}, {pipeline_mode = #tpu.pipeline_mode<synchronous>, transform_indices = @transform_2, window_bounds = array<i64: 1, 128>}, {pipeline_mode = #tpu.pipeline_mode<synchronous>, transform_indices = @transform_3, window_bounds = array<i64: 128, 10>}, {pipeline_mode = #tpu.pipeline_mode<synchronous>, transform_indices = @transform_4, window_bounds = array<i64: 1, 10>}, {transform_indices = @transform_5, window_bounds = array<i64: 2, 10>}]} {
    %c0 = arith.constant 0 : index
    %c0_0 = arith.constant 0 : index
    %0 = vector.load %arg1[%c0, %c0_0] : memref<2x1600xbf16, #tpu.memory_space<vmem>>, vector<2x1600xbf16>
    %c0_1 = arith.constant 0 : index
    %c0_2 = arith.constant 0 : index
    %1 = vector.load %arg2[%c0_1, %c0_2] : memref<1600x128xbf16, #tpu.memory_space<vmem>>, vector<1600x128xbf16>
    %cst = arith.constant dense<0.000000e+00> : vector<2x128xf32>
    %2 = tpu.matmul %0, %1, %cst {dimension_numbers = #tpu.dot_dimension_numbers<[1], [0], [0], [1], [0, 0, 1, 1], [], []>} : vector<2x1600xbf16>, vector<1600x128xbf16>, vector<2x128xf32> -> vector<2x128xf32>
    %c0_3 = arith.constant 0 : index
    %c0_4 = arith.constant 0 : index
    %3 = vector.load %arg3[%c0_3, %c0_4] : memref<1x128xf32, #tpu.memory_space<vmem>>, vector<1x128xf32>
    %4 = vector.broadcast %3 : vector<1x128xf32> to vector<2x128xf32>
    %5 = arith.addf %2, %4 : vector<2x128xf32>
    %c0_5 = arith.constant 0 : index
    %c0_6 = arith.constant 0 : index
    %6 = vector.load %arg4[%c0_5, %c0_6] : memref<128x10xf32, #tpu.memory_space<vmem>>, vector<128x10xf32>
    %cst_7 = arith.constant dense<0.000000e+00> : vector<2x10xf32>
    %7 = tpu.matmul %5, %6, %cst_7 {dimension_numbers = #tpu.dot_dimension_numbers<[1], [0], [0], [1], [0, 0, 1, 1], [], []>} : vector<2x128xf32>, vector<128x10xf32>, vector<2x10xf32> -> vector<2x10xf32>
    %c0_8 = arith.constant 0 : index
    %c0_9 = arith.constant 0 : index
    %8 = vector.load %arg5[%c0_8, %c0_9] : memref<1x10xf32, #tpu.memory_space<vmem>>, vector<1x10xf32>
    %9 = vector.broadcast %8 : vector<1x10xf32> to vector<2x10xf32>
    %10 = arith.addf %7, %9 : vector<2x10xf32>
    %cst_10 = arith.constant dense<0xFF800000> : vector<2xf32>
    %11 = vector.multi_reduction <maximumf>, %10, %cst_10 [1] : vector<2x10xf32> to vector<2xf32>
    %12 = vector.shape_cast %11 : vector<2xf32> to vector<2x1xf32>
    %13 = vector.broadcast %12 : vector<2x1xf32> to vector<2x10xf32>
    %14 = arith.subf %10, %13 : vector<2x10xf32>
    %15 = math.exp %14 : vector<2x10xf32>
    %cst_11 = arith.constant dense<0.000000e+00> : vector<2xf32>
    %16 = vector.multi_reduction <add>, %15, %cst_11 [1] : vector<2x10xf32> to vector<2xf32>
    %17 = vector.shape_cast %16 : vector<2xf32> to vector<2x1xf32>
    %18 = math.log %17 : vector<2x1xf32>
    %19 = vector.broadcast %18 : vector<2x1xf32> to vector<2x10xf32>
    %20 = arith.subf %14, %19 : vector<2x10xf32>
    %c0_12 = arith.constant 0 : index
    %c0_13 = arith.constant 0 : index
    %21 = vector.load %arg6[%c0_12, %c0_13] : memref<2x10xf32, #tpu.memory_space<vmem>>, vector<2x10xf32>
    tpu.vector_store %arg6[%c0_12, %c0_13], %20 {strides = array<i32>} : memref<2x10xf32, #tpu.memory_space<vmem>>, vector<2x10xf32>,
    return
  }
  func.func @transform_0(%arg0: i32) -> (i32, i32) {
    %c0_i32 = arith.constant 0 : i32
    %c0_i32_0 = arith.constant 0 : i32
    return %arg0, %c0_i32 : i32, i32
  }
  func.func @transform_1(%arg0: i32) -> (i32, i32) {
    %c0_i32 = arith.constant 0 : i32
    %c0_i32_0 = arith.constant 0 : i32
    %c0_i32_1 = arith.constant 0 : i32
    return %c0_i32, %c0_i32_0 : i32, i32
  }
  func.func @transform_2(%arg0: i32) -> (i32, i32) {
    %c0_i32 = arith.constant 0 : i32
    %c0_i32_0 = arith.constant 0 : i32
    %c0_i32_1 = arith.constant 0 : i32
    return %c0_i32, %c0_i32_0 : i32, i32
  }
  func.func @transform_3(%arg0: i32) -> (i32, i32) {
    %c0_i32 = arith.constant 0 : i32
    %c0_i32_0 = arith.constant 0 : i32
    %c0_i32_1 = arith.constant 0 : i32
    return %c0_i32, %c0_i32_0 : i32, i32
  }
  func.func @transform_4(%arg0: i32) -> (i32, i32) {
    %c0_i32 = arith.constant 0 : i32
    %c0_i32_0 = arith.constant 0 : i32
    %c0_i32_1 = arith.constant 0 : i32
    return %c0_i32, %c0_i32_0 : i32, i32
  }
  func.func @transform_5(%arg0: i32) -> (i32, i32) {
    %c0_i32 = arith.constant 0 : i32
    %c0_i32_0 = arith.constant 0 : i32
    return %arg0, %c0_i32 : i32, i32
  }
}

</mosaic_0001>

<bundles_post_ra>
// kernel: net_forward.3
= control target key start
LH: loop header
LB: loop body
LE: loop exit
PB: predicated region body
PF: predicated region fallthrough
CT: control target
= control target key end

     0   :  { %vm247_vm0 = vcmask 1043456   ;;  %vm248_vm1 = vcmask 1044480   ;;  %vm180_vm2 = vcmask 72704   ;;  %v3023_v1 = vmov 65535   ;;  %s3881_s1 = inlined_call_operand.vmem [shape: bf16[9,32], index: 1, kind: input, shape index: {}]   ;;  %s3882_s0 = inlined_call_operand.vmem [shape: bf16[4,338,9], index: 0, kind: input, shape index: {}]   ;;  %s3883_s2 = inlined_call_operand.vmem [shape: f32[1,32], index: 2, kind: input, shape index: {}]   ;;  %s3884_s3 = inlined_call_operand.vmem [shape: bf16[338,32], index: 3, kind: output, shape index: {}]  }
   0x1   :  { %v2933_v0 = vld [vmem:[%s3881_s1] sm:$0x1f]   ;;  %v249_v2 = vsel %vm247_vm0, 4294967295, %v3023_v1  ;;  %v2935_v5 = vld [vmem:[%s3882_s0 + $0xac] sm:$0xff]   ;;  %v2937_v8 = vld [vmem:[%s3882_s0 + $0xb4] sm:$0xff]   ;;  %vm2214_vm3 = vcmask 257024  }
   0x2   :  { %v2934_v3 = vld [vmem:[%s3882_s0] sm:$0xff]   ;;  %v250_v4 = vsel %vm248_vm1, %v249_v2, 0  ;;  %2796 = vmatprep.mubr.msk.bf16.mxu1 %vm180_vm2, %v2935_v5  ;;  %v2936_v7 = vld [vmem:[%s3882_s0 + $0x8] sm:$0xff]   ;;  %v2938_v9 = vld [vmem:[%s3882_s0 + $0x10] sm:$0xff]   ;;  %vm2257_vm4 = vcmask 253952  }
   0x3   :  { %v252_v6 = vand.u32 %v2933_v0, %v250_v4  ;;  %2750 = vmatprep.mubr.msk.bf16.mxu0 %vm180_vm2, %v2934_v3  ;;  %v2939_v10 = vld [vmem:[%s3882_s0 + $0xbc] sm:$0xff]   ;;  %v2941_v12 = vld [vmem:[%s3882_s0 + $0xc4] sm:$0xff]   ;;  %v2943_v14 = vld [vmem:[%s3882_s0 + $0xcc] sm:$0xff]  }
   0x4   :  { %v2940_v11 = vld [vmem:[%s3882_s0 + $0x18] sm:$0xff]   ;;  %v2942_v13 = vld [vmem:[%s3882_s0 + $0x20] sm:$0xff]   ;;  %v2944_v15 = vld [vmem:[%s3882_s0 + $0x28] sm:$0xff]  }
   0x5   :  { %2748 = vmatprep.subr.bf16.mxu0 %v252_v6  ;;  %2794 = vmatprep.subr.bf16.mxu1 %v252_v6  ;;  %v2945_v16 = vld [vmem:[%s3882_s0 + $0xd4] sm:$0xff]   ;;  %v2947_v18 = vld [vmem:[%s3882_s0 + $0xdc] sm:$0xff]   ;;  %v2949_v20 = vld [vmem:[%s3882_s0 + $0xe4] sm:$0xff]  }
   0x6   :  { %2749 = vmatpush3.bf16.msra.mxu0 %v252_v6  ;;  %2795 = vmatpush3.bf16.msra.mxu1 %v252_v6  ;;  %v2946_v17 = vld [vmem:[%s3882_s0 + $0x30] sm:$0xff]   ;;  %v2948_v19 = vld [vmem:[%s3882_s0 + $0x38] sm:$0xff]   ;;  %v2950_v21 = vld [vmem:[%s3882_s0 + $0x40] sm:$0xff]  }
   0x7   :  { %2840 = vmatprep.subr.bf16.mxu0 %v252_v6  ;;  %2886 = vmatprep.subr.bf16.mxu1 %v252_v6  ;;  %v2951_v22 = vld [vmem:[%s3882_s0 + $0xec] sm:$0xff]   ;;  %v2953_v24 = vld [vmem:[%s3882_s0 + $0xf4] sm:$0xff]   ;;  %v2955_v26 = vld [vmem:[%s3882_s0 + $0xfc] sm:$0xff]  }
   0x8   :  { %v2952_v23 = vld [vmem:[%s3882_s0 + $0x48] sm:$0xff]   ;;  %v2954_v25 = vld [vmem:[%s3882_s0 + $0x50] sm:$0xff]   ;;  %v2956_v27 = vld [vmem:[%s3882_s0 + $0x58] sm:$0xff]  }
   0x9   :  { %2751 = vmatmul.mubr.msk.bf16.vlgmr.msra.gmra.mrb[0].mxu0 %vm180_vm2, %v2936_v7  ;;  %2797 = vmatmul.mubr.msk.bf16.vlgmr.msra.gmra.mrb[0].mxu1 %vm180_vm2, %v2937_v8  ;;  %v2957_v28 = vld [vmem:[%s3882_s0 + $0x104] sm:$0xff]   ;;  %v2959_v30 = vld [vmem:[%s3882_s0 + $0x10c] sm:$0xff]   ;;  %v2961_v32 = vld [vmem:[%s3882_s0 + $0x114] sm:$0xff]  }
   0xa   :  { %2841 = vmatpush3.bf16.msra.mxu0 %v252_v6  ;;  %2887 = vmatpush3.bf16.msra.mxu1 %v252_v6  ;;  %v2958_v29 = vld [vmem:[%s3882_s0 + $0x60] sm:$0xff]   ;;  %v2960_v31 = vld [vmem:[%s3882_s0 + $0x68] sm:$0xff]   ;;  %v2962_v33 = vld [vmem:[%s3882_s0 + $0x70] sm:$0xff]  }
   0xb   :  { %2754 = vmatprep.mubr.msk.bf16.mxu0 %vm180_vm2, %v2938_v9  ;;  %2800 = vmatprep.mubr.msk.bf16.mxu1 %vm180_vm2, %v2939_v10  ;;  %v2963_v34 = vld [vmem:[%s3882_s0 + $0x11c] sm:$0xff]   ;;  %v2965_v36 = vld [vmem:[%s3882_s0 + $0x124] sm:$0xff]   ;;  %v2967_v38 = vld [vmem:[%s3882_s0 + $0x12c] sm:$0xff]  }
   0xc   :  { %v2964_v35 = vld [vmem:[%s3882_s0 + $0x78] sm:$0xff]   ;;  %v2966_v37 = vld [vmem:[%s3882_s0 + $0x80] sm:$0xff]   ;;  %v2968_v39 = vld [vmem:[%s3882_s0 + $0x88] sm:$0xff]  }
   0xd   :  { %v2969_v40 = vld [vmem:[%s3882_s0 + $0x134] sm:$0xff]   ;;  %v2971_v42 = vld [vmem:[%s3882_s0 + $0x13c] sm:$0xff]   ;;  %v2973_v44 = vld [vmem:[%s3882_s0 + $0x144] sm:$0xff]  }
   0xe   :  { %v2970_v41 = vld [vmem:[%s3882_s0 + $0x90] sm:$0xff]   ;;  %v2972_v43 = vld [vmem:[%s3882_s0 + $0x98] sm:$0xff]   ;;  %v2974_v45 = vld [vmem:[%s3882_s0 + $0xa0] sm:$0xff]  }
   0xf   :  { %v2975_v46 = vld [vmem:[%s3882_s0 + $0x14c] sm:$0xff]   ;;  %v2976_v47 = vld [vmem:[%s3882_s0 + $0xa8] ss:$0 sps:$4 sm:$0x11]   ;;  %v2978_v49 = vld [vmem:[%s3882_s0 + $0x158] sm:$0xff]  }
  0x10   :  { %v2977_v48 = vld [vmem:[%s3882_s0 + $0x154] ss:$0 sps:$4 sm:$0x11]   ;;  %v2979_v50 = vld [vmem:[%s3882_s0 + $0x204] sm:$0xff]   ;;  %v2981_v52 = vld [vmem:[%s3882_s0 + $0x20c] sm:$0xff]  }
  0x11   :  { %2755 = vmatmul.mubr.msk.bf16.gmra.mrb[4].mxu0 %vm180_vm2, %v2940_v11  ;;  %2801 = vmatmul.mubr.msk.bf16.gmra.mrb[4].mxu1 %vm180_vm2, %v2941_v12  ;;  %v2980_v51 = vld [vmem:[%s3882_s0 + $0x160] sm:$0xff]   ;;  %v2982_v53 = vld [vmem:[%s3882_s0 + $0x168] sm:$0xff]   ;;  %v2983_v54 = vld [vmem:[%s3882_s0 + $0x214] sm:$0xff]  }
  0x12   :  { %2758 = vmatprep.mubr.msk.bf16.mxu0 %vm180_vm2, %v2942_v13  ;;  %2804 = vmatprep.mubr.msk.bf16.mxu1 %vm180_vm2, %v2943_v14  ;;  %v2984_v55 = vld [vmem:[%s3882_s0 + $0x170] sm:$0xff]   ;;  %v2985_v56 = vld [vmem:[%s3882_s0 + $0x21c] sm:$0xff]   ;;  %v2987_v58 = vld [vmem:[%s3882_s0 + $0x224] sm:$0xff]  }
  0x13   :  { %v2986_v57 = vld [vmem:[%s3882_s0 + $0x178] sm:$0xff]   ;;  %v2988_v59 = vld [vmem:[%s3882_s0 + $0x180] sm:$0xff]   ;;  %v2989_v60 = vld [vmem:[%s3882_s0 + $0x22c] sm:$0xff]  }
  0x14   :  { %v2990_v61 = vld [vmem:[%s3882_s0 + $0x188] sm:$0xff]   ;;  %v2991_v62 = vld [vmem:[%s3882_s0 + $0x234] sm:$0xff]   ;;  %v2993_v0 = vld [vmem:[%s3882_s0 + $0x23c] sm:$0xff]  }
  0x15   :  { %v2992_v63 = vld [vmem:[%s3882_s0 + $0x190] sm:$0xff]   ;;  %v2994_v1 = vld [vmem:[%s3882_s0 + $0x198] sm:$0xff]   ;;  %v2995_v2 = vld [vmem:[%s3882_s0 + $0x244] sm:$0xff]  }
  0x16   :  { %v2996_v3 = vld [vmem:[%s3882_s0 + $0x1a0] sm:$0xff]   ;;  %v2997_v4 = vld [vmem:[%s3882_s0 + $0x24c] sm:$0xff]   ;;  %v2999_v6 = vld [vmem:[%s3882_s0 + $0x254] sm:$0xff]  }
  0x17   :  { %v2998_v5 = vld [vmem:[%s3882_s0 + $0x1a8] sm:$0xff]   ;;  %v3000_v7 = vld [vmem:[%s3882_s0 + $0x1b0] sm:$0xff]   ;;  %v3001_v8 = vld [vmem:[%s3882_s0 + $0x25c] sm:$0xff]  }
  0x18   :  { %v3002_v9 = vld [vmem:[%s3882_s0 + $0x1b8] sm:$0xff]   ;;  %v3003_v10 = vld [vmem:[%s3882_s0 + $0x264] sm:$0xff]   ;;  %v3005_v12 = vld [vmem:[%s3882_s0 + $0x26c] sm:$0xff]  }
  0x19   :  { %2759 = vmatmul.mubr.msk.bf16.gmra.mrb[8].mxu0 %vm180_vm2, %v2944_v15  ;;  %2805 = vmatmul.mubr.msk.bf16.gmra.mrb[8].mxu1 %vm180_vm2, %v2945_v16  ;;  %v3004_v11 = vld [vmem:[%s3882_s0 + $0x1c0] sm:$0xff]   ;;  %v3006_v13 = vld [vmem:[%s3882_s0 + $0x1c8] sm:$0xff]   ;;  %v3007_v14 = vld [vmem:[%s3882_s0 + $0x274] sm:$0xff]  }
  0x1a   :  { %2762 = vmatprep.mubr.msk.bf16.mxu0 %vm180_vm2, %v2946_v17  ;;  %2808 = vmatprep.mubr.msk.bf16.mxu1 %vm180_vm2, %v2947_v18  ;;  %v3008_v15 = vld [vmem:[%s3882_s0 + $0x1d0] sm:$0xff]   ;;  %v3009_v16 = vld [vmem:[%s3882_s0 + $0x27c] sm:$0xff]   ;;  %v3011_v18 = vld [vmem:[%s3882_s0 + $0x284] sm:$0xff]  }
  0x1b   :  { %v3010_v17 = vld [vmem:[%s3882_s0 + $0x1d8] sm:$0xff]  }
  0x21   :  { %2763 = vmatmul.mubr.msk.bf16.gmra.mrb[12].mxu0 %vm180_vm2, %v2948_v19  ;;  %2809 = vmatmul.mubr.msk.bf16.gmra.mrb[12].mxu1 %vm180_vm2, %v2949_v20  ;;  %v3012_v19 = vld [vmem:[%s3882_s0 + $0x1e0] sm:$0xff]   ;;  %v3013_v20 = vld [vmem:[%s3882_s0 + $0x28c] sm:$0xff]  }
  0x22   :  { %2766 = vmatprep.mubr.msk.bf16.mxu0 %vm180_vm2, %v2950_v21  ;;  %2812 = vmatprep.mubr.msk.bf16.mxu1 %vm180_vm2, %v2951_v22  ;;  %v3014_v21 = vld [vmem:[%s3882_s0 + $0x1e8] sm:$0xff]   ;;  %v3015_v22 = vld [vmem:[%s3882_s0 + $0x294] sm:$0xff]  }
  0x29   :  { %2767 = vmatmul.mubr.msk.bf16.gmra.mrb[16].mxu0 %vm180_vm2, %v2952_v23  ;;  %2813 = vmatmul.mubr.msk.bf16.gmra.mrb[16].mxu1 %vm180_vm2, %v2953_v24  ;;  %v3016_v23 = vld [vmem:[%s3882_s0 + $0x1f0] sm:$0xff]   ;;  %v3017_v24 = vld [vmem:[%s3882_s0 + $0x29c] sm:$0xff]  }
  0x2a   :  { %2770 = vmatprep.mubr.msk.bf16.mxu0 %vm180_vm2, %v2954_v25  ;;  %2816 = vmatprep.mubr.msk.bf16.mxu1 %vm180_vm2, %v2955_v26  ;;  %v3018_v25 = vld [vmem:[%s3882_s0 + $0x1f8] sm:$0xff]   ;;  %v3019_v26 = vld [vmem:[%s3882_s0 + $0x2a4] sm:$0xff]  }
  0x31   :  { %2771 = vmatmul.mubr.msk.bf16.gmra.mrb[20].mxu0 %vm180_vm2, %v2956_v27  ;;  %2817 = vmatmul.mubr.msk.bf16.gmra.mrb[20].mxu1 %vm180_vm2, %v2957_v28  ;;  %v3020_v27 = vld [vmem:[%s3882_s0 + $0x200] ss:$0 sps:$4 sm:$0x11]   ;;  %v3021_v28 = vld [vmem:[%s3882_s0 + $0x2ac] ss:$0 sps:$4 sm:$0x11]  }
  0x32   :  { %2774 = vmatprep.mubr.msk.bf16.mxu0 %vm180_vm2, %v2958_v29  ;;  %2820 = vmatprep.mubr.msk.bf16.mxu1 %vm180_vm2, %v2959_v30  ;;  %v3402_v29 = vld [vmem:[%s3883_s2] ss:$0 sm:$0xff] }
  0x39   :  { %2775 = vmatmul.mubr.msk.bf16.gmra.mrb[24].mxu0 %vm180_vm2, %v2960_v31  ;;  %2821 = vmatmul.mubr.msk.bf16.gmra.mrb[24].mxu1 %vm180_vm2, %v2961_v32 }
  0x3a   :  { %2778 = vmatprep.mubr.msk.bf16.mxu0 %vm180_vm2, %v2962_v33  ;;  %2824 = vmatprep.mubr.msk.bf16.mxu1 %vm180_vm2, %v2963_v34 }
  0x41   :  { %2779 = vmatmul.mubr.msk.bf16.gmra.mrb[28].mxu0 %vm180_vm2, %v2964_v35  ;;  %2825 = vmatmul.mubr.msk.bf16.gmra.mrb[28].mxu1 %vm180_vm2, %v2965_v36 }
  0x42   :  { %2782 = vmatprep.mubr.msk.bf16.mxu0 %vm180_vm2, %v2966_v37  ;;  %2828 = vmatprep.mubr.msk.bf16.mxu1 %vm180_vm2, %v2967_v38 }
  0x49   :  { %2783 = vmatmul.mubr.msk.bf16.gmra.mrb[32].mxu0 %vm180_vm2, %v2968_v39  ;;  %2829 = vmatmul.mubr.msk.bf16.gmra.mrb[32].mxu1 %vm180_vm2, %v2969_v40 }
  0x4a   :  { %2786 = vmatprep.mubr.msk.bf16.mxu0 %vm180_vm2, %v2970_v41  ;;  %2832 = vmatprep.mubr.msk.bf16.mxu1 %vm180_vm2, %v2971_v42 }
  0x51   :  { %2787 = vmatmul.mubr.msk.bf16.gmra.mrb[36].mxu0 %vm180_vm2, %v2972_v43  ;;  %2833 = vmatmul.mubr.msk.bf16.gmra.mrb[36].mxu1 %vm180_vm2, %v2973_v44 }
  0x52   :  { %2790 = vmatprep.mubr.msk.bf16.mxu0 %vm180_vm2, %v2974_v45  ;;  %2836 = vmatprep.mubr.msk.bf16.mxu1 %vm180_vm2, %v2975_v46 }
  0x59   :  { %2791 = vmatmul.mubr.msk.bf16.gmra.mrb[40].mxu0 %vm180_vm2, %v2976_v47  ;;  %2837 = vmatmul.mubr.msk.bf16.gmra.mrb[40].mxu1 %vm180_vm2, %v2977_v48 }
  0x5a   :  { %2842 = vmatprep.mubr.msk.bf16.mxu0 %vm180_vm2, %v2978_v49  ;;  %2888 = vmatprep.mubr.msk.bf16.mxu1 %vm180_vm2, %v2979_v50 }
  0x61   :  { %2843 = vmatmul.mubr.msk.bf16.vlgmr.msra.gmra.mrb[44].mxu0 %vm180_vm2, %v2980_v51  ;;  %2889 = vmatmul.mubr.msk.bf16.vlgmr.msra.gmra.mrb[44].mxu1 %vm180_vm2, %v2981_v52 }
  0x62   :  { %2846 = vmatprep.mubr.msk.bf16.mxu0 %vm180_vm2, %v2982_v53  ;;  %2892 = vmatprep.mubr.msk.bf16.mxu1 %vm180_vm2, %v2983_v54 }
  0x69   :  { %2847 = vmatmul.mubr.msk.bf16.gmra.mrb[48].mxu0 %vm180_vm2, %v2984_v55  ;;  %2893 = vmatmul.mubr.msk.bf16.gmra.mrb[48].mxu1 %vm180_vm2, %v2985_v56 }
  0x6a   :  { %2850 = vmatprep.mubr.msk.bf16.mxu0 %vm180_vm2, %v2986_v57  ;;  %2896 = vmatprep.mubr.msk.bf16.mxu1 %vm180_vm2, %v2987_v58 }
  0x71   :  { %2851 = vmatmul.mubr.msk.bf16.gmra.mrb[52].mxu0 %vm180_vm2, %v2988_v59  ;;  %2897 = vmatmul.mubr.msk.bf16.gmra.mrb[52].mxu1 %vm180_vm2, %v2989_v60 }
  0x72   :  { %2854 = vmatprep.mubr.msk.bf16.mxu0 %vm180_vm2, %v2990_v61  ;;  %2900 = vmatprep.mubr.msk.bf16.mxu1 %vm180_vm2, %v2991_v62 }
  0x79   :  { %2855 = vmatmul.mubr.msk.bf16.gmra.mrb[56].mxu0 %vm180_vm2, %v2992_v63  ;;  %2901 = vmatmul.mubr.msk.bf16.gmra.mrb[56].mxu1 %vm180_vm2, %v2993_v0 }
  0x7a   :  { %2858 = vmatprep.mubr.msk.bf16.mxu0 %vm180_vm2, %v2994_v1  ;;  %2904 = vmatprep.mubr.msk.bf16.mxu1 %vm180_vm2, %v2995_v2 }
  0x81   :  { %2859 = vmatmul.mubr.msk.bf16.gmra.mrb[60].mxu0 %vm180_vm2, %v2996_v3  ;;  %2905 = vmatmul.mubr.msk.bf16.gmra.mrb[60].mxu1 %vm180_vm2, %v2997_v4 }
  0x82   :  { %2862 = vmatprep.mubr.msk.bf16.mxu0 %vm180_vm2, %v2998_v5  ;;  %2908 = vmatprep.mubr.msk.bf16.mxu1 %vm180_vm2, %v2999_v6 }
  0x89   :  { %2863 = vmatmul.mubr.msk.bf16.gmra.mrb[64].mxu0 %vm180_vm2, %v3000_v7  ;;  %2909 = vmatmul.mubr.msk.bf16.gmra.mrb[64].mxu1 %vm180_vm2, %v3001_v8 }
  0x8a   :  { %2866 = vmatprep.mubr.msk.bf16.mxu0 %vm180_vm2, %v3002_v9  ;;  %2912 = vmatprep.mubr.msk.bf16.mxu1 %vm180_vm2, %v3003_v10 }
  0x91   :  { %2867 = vmatmul.mubr.msk.bf16.gmra.mrb[68].mxu0 %vm180_vm2, %v3004_v11  ;;  %2913 = vmatmul.mubr.msk.bf16.gmra.mrb[68].mxu1 %vm180_vm2, %v3005_v12 }
  0x92   :  { %2870 = vmatprep.mubr.msk.bf16.mxu0 %vm180_vm2, %v3006_v13  ;;  %2916 = vmatprep.mubr.msk.bf16.mxu1 %vm180_vm2, %v3007_v14 }
  0x99   :  { %2871 = vmatmul.mubr.msk.bf16.gmra.mrb[72].mxu0 %vm180_vm2, %v3008_v15  ;;  %2917 = vmatmul.mubr.msk.bf16.gmra.mrb[72].mxu1 %vm180_vm2, %v3009_v16 }
  0x9a   :  { %2874 = vmatprep.mubr.msk.bf16.mxu0 %vm180_vm2, %v3010_v17  ;;  %2920 = vmatprep.mubr.msk.bf16.mxu1 %vm180_vm2, %v3011_v18 }
  0xa1   :  { %2875 = vmatmul.mubr.msk.bf16.gmra.mrb[76].mxu0 %vm180_vm2, %v3012_v19  ;;  %2921 = vmatmul.mubr.msk.bf16.gmra.mrb[76].mxu1 %vm180_vm2, %v3013_v20 }
  0xa2   :  { %2878 = vmatprep.mubr.msk.bf16.mxu0 %vm180_vm2, %v3014_v21  ;;  %2924 = vmatprep.mubr.msk.bf16.mxu1 %vm180_vm2, %v3015_v22 }
  0xa9   :  { %2879 = vmatmul.mubr.msk.bf16.gmra.mrb[80].mxu0 %vm180_vm2, %v3016_v23  ;;  %2925 = vmatmul.mubr.msk.bf16.gmra.mrb[80].mxu1 %vm180_vm2, %v3017_v24 }
  0xaa   :  { %2882 = vmatprep.mubr.msk.bf16.mxu0 %vm180_vm2, %v3018_v25  ;;  %2928 = vmatprep.mubr.msk.bf16.mxu1 %vm180_vm2, %v3019_v26 }
  0xb1   :  { %2883 = vmatmul.mubr.msk.bf16.gmra.mrb[84].mxu0 %vm180_vm2, %v3020_v27  ;;  %2929 = vmatmul.mubr.msk.bf16.gmra.mrb[84].mxu1 %vm180_vm2, %v3021_v28 }
  0xdc   :  { %v2752_v30 = vpop.f32.mrb[0].mxu0  ;;  %v2798_v31 = vpop.f32.mrb[0].mxu1 }
  0xdd   :  { %v297_v32 = vadd.f32 %v2752_v30, %v3402_v29  ;;  %v766_v33 = vadd.f32 %v2798_v31, %v3402_v29  ;;  %v288_v34 = vpop.f32.mrb[1].mxu0  ;;  %v757_v35 = vpop.f32.mrb[1].mxu1 }
  0xde   :  { %v289_v36 = vadd.f32 %v3402_v29, %v288_v34  ;;  %v758_v37 = vadd.f32 %v3402_v29, %v757_v35  ;;  %v2753_v38 = vpop.f32.mrb[2].mxu0  ;;  %v2799_v39 = vpop.f32.mrb[2].mxu1 }
  0xdf   :  { %v464_v40 = vmax.f32 %v297_v32, 0.0  ;;  %v933_v41 = vmax.f32 %v766_v33, 0.0  ;;  %v300_v42 = vadd.f32 %v2753_v38, %v3402_v29  ;;  %v769_v43 = vadd.f32 %v2799_v39, %v3402_v29  ;;  %v291_v44 = vpop.f32.mrb[3].mxu0  ;;  %v760_v45 = vpop.f32.mrb[3].mxu1 }
  0xe0   :  { %v462_v46 = vmax.f32 %v289_v36, 0.0  ;;  %v931_v47 = vmax.f32 %v758_v37, 0.0  ;;  %v292_v48 = vadd.f32 %v3402_v29, %v291_v44  ;;  %v761_v49 = vadd.f32 %v3402_v29, %v760_v45 }
  0xe1   :  { %v3412_v50 = vmax.f32 %v464_v40, %v933_v41  ;;  %v465_v51 = vmax.f32 %v300_v42, 0.0  ;;  %v934_v52 = vmax.f32 %v769_v43, 0.0 }
  0xe2   :  { %v3414_v53 = vmax.f32 %v462_v46, %v931_v47  ;;  %v463_v54 = vmax.f32 %v292_v48, 0.0  ;;  %v932_v55 = vmax.f32 %v761_v49, 0.0 }
  0xe3   :  { %v3416_v56 = vmax.f32 %v465_v51, %v934_v52 }
  0xe4   :  { %v3418_v57 = vmax.f32 %v463_v54, %v932_v55  ;;  %v2756_v58 = vpop.f32.mrb[4].mxu0  ;;  %v2802_v59 = vpop.f32.mrb[4].mxu1 }
  0xe5   :  { %v313_v60 = vadd.f32 %v2756_v58, %v3402_v29  ;;  %v782_v61 = vadd.f32 %v2802_v59, %v3402_v29  ;;  %v304_v62 = vpop.f32.mrb[5].mxu0  ;;  %v773_v63 = vpop.f32.mrb[5].mxu1 }
  0xe6   :  { %v305_v0 = vadd.f32 %v3402_v29, %v304_v62  ;;  %v774_v1 = vadd.f32 %v3402_v29, %v773_v63  ;;  %v2757_v2 = vpop.f32.mrb[6].mxu0  ;;  %v2803_v3 = vpop.f32.mrb[6].mxu1 }
  0xe7   :  { %v468_v4 = vmax.f32 %v313_v60, 0.0  ;;  %v937_v5 = vmax.f32 %v782_v61, 0.0  ;;  %v316_v6 = vadd.f32 %v2757_v2, %v3402_v29  ;;  %v785_v7 = vadd.f32 %v2803_v3, %v3402_v29  ;;  %v307_v8 = vpop.f32.mrb[7].mxu0  ;;  %v776_v9 = vpop.f32.mrb[7].mxu1 }
  0xe8   :  { %v466_v10 = vmax.f32 %v305_v0, 0.0  ;;  %v935_v11 = vmax.f32 %v774_v1, 0.0  ;;  %v308_v12 = vadd.f32 %v3402_v29, %v307_v8  ;;  %v777_v13 = vadd.f32 %v3402_v29, %v776_v9 }
  0xe9   :  { %v3428_v14 = vmax.f32 %v468_v4, %v937_v5  ;;  %v469_v15 = vmax.f32 %v316_v6, 0.0  ;;  %v938_v16 = vmax.f32 %v785_v7, 0.0 }
  0xea   :  { %v3430_v17 = vmax.f32 %v466_v10, %v935_v11  ;;  %v467_v18 = vmax.f32 %v308_v12, 0.0  ;;  %v936_v19 = vmax.f32 %v777_v13, 0.0 }
  0xeb   :  { %v3432_v20 = vmax.f32 %v469_v15, %v938_v16 }
  0xec   :  { %v3434_v21 = vmax.f32 %v467_v18, %v936_v19  ;;  %v2760_v22 = vpop.f32.mrb[8].mxu0  ;;  %v2806_v23 = vpop.f32.mrb[8].mxu1 }
  0xed   :  { %v329_v24 = vadd.f32 %v2760_v22, %v3402_v29  ;;  %v798_v25 = vadd.f32 %v2806_v23, %v3402_v29  ;;  %v320_v26 = vpop.f32.mrb[9].mxu0  ;;  %v789_v27 = vpop.f32.mrb[9].mxu1 }
  0xee   :  { %v321_v28 = vadd.f32 %v3402_v29, %v320_v26  ;;  %v790_v30 = vadd.f32 %v3402_v29, %v789_v27  ;;  %v2761_v31 = vpop.f32.mrb[10].mxu0  ;;  %v2807_v32 = vpop.f32.mrb[10].mxu1 }
  0xef   :  { %v472_v33 = vmax.f32 %v329_v24, 0.0  ;;  %v941_v34 = vmax.f32 %v798_v25, 0.0  ;;  %v332_v35 = vadd.f32 %v2761_v31, %v3402_v29  ;;  %v801_v36 = vadd.f32 %v2807_v32, %v3402_v29  ;;  %v323_v37 = vpop.f32.mrb[11].mxu0  ;;  %v792_v38 = vpop.f32.mrb[11].mxu1 }
  0xf0   :  { %v470_v39 = vmax.f32 %v321_v28, 0.0  ;;  %v939_v40 = vmax.f32 %v790_v30, 0.0  ;;  %v324_v41 = vadd.f32 %v3402_v29, %v323_v37  ;;  %v793_v42 = vadd.f32 %v3402_v29, %v792_v38 }
  0xf1   :  { %v3444_v43 = vmax.f32 %v472_v33, %v941_v34  ;;  %v473_v44 = vmax.f32 %v332_v35, 0.0  ;;  %v942_v45 = vmax.f32 %v801_v36, 0.0 }
  0xf2   :  { %v3446_v46 = vmax.f32 %v470_v39, %v939_v40  ;;  %v471_v47 = vmax.f32 %v324_v41, 0.0  ;;  %v940_v48 = vmax.f32 %v793_v42, 0.0 }
  0xf3   :  { %v3448_v49 = vmax.f32 %v473_v44, %v942_v45 }
  0xf4   :  { %v3450_v51 = vmax.f32 %v471_v47, %v940_v48  ;;  %v2764_v52 = vpop.f32.mrb[12].mxu0  ;;  %v2810_v54 = vpop.f32.mrb[12].mxu1 }
  0xf5   :  { %v345_v55 = vadd.f32 %v2764_v52, %v3402_v29  ;;  %v814_v58 = vadd.f32 %v2810_v54, %v3402_v29  ;;  %v336_v59 = vpop.f32.mrb[13].mxu0  ;;  %v805_v60 = vpop.f32.mrb[13].mxu1 }
  0xf6   :  { %v337_v61 = vadd.f32 %v3402_v29, %v336_v59  ;;  %v806_v62 = vadd.f32 %v3402_v29, %v805_v60  ;;  %v2765_v63 = vpop.f32.mrb[14].mxu0  ;;  %v2811_v0 = vpop.f32.mrb[14].mxu1 }
  0xf7   :  { %v476_v1 = vmax.f32 %v345_v55, 0.0  ;;  %v945_v2 = vmax.f32 %v814_v58, 0.0  ;;  %v348_v3 = vadd.f32 %v2765_v63, %v3402_v29  ;;  %v817_v4 = vadd.f32 %v2811_v0, %v3402_v29  ;;  %v339_v5 = vpop.f32.mrb[15].mxu0  ;;  %v808_v6 = vpop.f32.mrb[15].mxu1 }
  0xf8   :  { %v474_v7 = vmax.f32 %v337_v61, 0.0  ;;  %v943_v8 = vmax.f32 %v806_v62, 0.0  ;;  %v340_v9 = vadd.f32 %v3402_v29, %v339_v5  ;;  %v809_v10 = vadd.f32 %v3402_v29, %v808_v6 }
  0xf9   :  { %v3460_v11 = vmax.f32 %v476_v1, %v945_v2  ;;  %v477_v12 = vmax.f32 %v348_v3, 0.0  ;;  %v946_v13 = vmax.f32 %v817_v4, 0.0 }
  0xfa   :  { %v3462_v15 = vmax.f32 %v474_v7, %v943_v8  ;;  %v475_v16 = vmax.f32 %v340_v9, 0.0  ;;  %v944_v18 = vmax.f32 %v809_v10, 0.0 }
  0xfb   :  { %v3464_v19 = vmax.f32 %v477_v12, %v946_v13 }
  0xfc   :  { %v3466_v22 = vmax.f32 %v475_v16, %v944_v18  ;;  %v2768_v23 = vpop.f32.mrb[16].mxu0  ;;  %v2814_v24 = vpop.f32.mrb[16].mxu1 }
  0xfd   :  { %v361_v25 = vadd.f32 %v2768_v23, %v3402_v29  ;;  %v830_v26 = vadd.f32 %v2814_v24, %v3402_v29  ;;  %v352_v27 = vpop.f32.mrb[17].mxu0  ;;  %v821_v28 = vpop.f32.mrb[17].mxu1 }
  0xfe   :  { %v353_v30 = vadd.f32 %v3402_v29, %v352_v27  ;;  %v822_v31 = vadd.f32 %v3402_v29, %v821_v28  ;;  %v2769_v32 = vpop.f32.mrb[18].mxu0  ;;  %v2815_v33 = vpop.f32.mrb[18].mxu1 }
  0xff   :  { %v480_v34 = vmax.f32 %v361_v25, 0.0  ;;  %v949_v35 = vmax.f32 %v830_v26, 0.0  ;;  %v364_v36 = vadd.f32 %v2769_v32, %v3402_v29  ;;  %v833_v37 = vadd.f32 %v2815_v33, %v3402_v29  ;;  %v355_v38 = vpop.f32.mrb[19].mxu0  ;;  %v824_v39 = vpop.f32.mrb[19].mxu1 }
 0x100   :  { %v478_v40 = vmax.f32 %v353_v30, 0.0  ;;  %v947_v41 = vmax.f32 %v822_v31, 0.0  ;;  %v356_v42 = vadd.f32 %v3402_v29, %v355_v38  ;;  %v825_v44 = vadd.f32 %v3402_v29, %v824_v39 }
 0x101   :  { %v3476_v45 = vmax.f32 %v480_v34, %v949_v35  ;;  %v481_v47 = vmax.f32 %v364_v36, 0.0  ;;  %v950_v48 = vmax.f32 %v833_v37, 0.0 }
 0x102   :  { %v3478_v52 = vmax.f32 %v478_v40, %v947_v41  ;;  %v479_v54 = vmax.f32 %v356_v42, 0.0  ;;  %v948_v55 = vmax.f32 %v825_v44, 0.0 }
 0x103   :  { %v3480_v58 = vmax.f32 %v481_v47, %v950_v48 }
 0x104   :  { %v3482_v59 = vmax.f32 %v479_v54, %v948_v55  ;;  %v2772_v60 = vpop.f32.mrb[20].mxu0  ;;  %v2818_v61 = vpop.f32.mrb[20].mxu1 }
 0x105   :  { %v377_v62 = vadd.f32 %v2772_v60, %v3402_v29  ;;  %v846_v63 = vadd.f32 %v2818_v61, %v3402_v29  ;;  %v368_v0 = vpop.f32.mrb[21].mxu0  ;;  %v837_v1 = vpop.f32.mrb[21].mxu1 }
 0x106   :  { %v369_v2 = vadd.f32 %v3402_v29, %v368_v0  ;;  %v838_v3 = vadd.f32 %v3402_v29, %v837_v1  ;;  %v2773_v4 = vpop.f32.mrb[22].mxu0  ;;  %v2819_v5 = vpop.f32.mrb[22].mxu1 }
 0x107   :  { %v484_v6 = vmax.f32 %v377_v62, 0.0  ;;  %v953_v7 = vmax.f32 %v846_v63, 0.0  ;;  %v380_v8 = vadd.f32 %v2773_v4, %v3402_v29  ;;  %v849_v9 = vadd.f32 %v2819_v5, %v3402_v29  ;;  %v371_v10 = vpop.f32.mrb[23].mxu0  ;;  %v840_v12 = vpop.f32.mrb[23].mxu1 }
 0x108   :  { %v482_v13 = vmax.f32 %v369_v2, 0.0  ;;  %v951_v16 = vmax.f32 %v838_v3, 0.0  ;;  %v372_v18 = vadd.f32 %v3402_v29, %v371_v10  ;;  %v841_v23 = vadd.f32 %v3402_v29, %v840_v12 }
 0x109   :  { %v3492_v24 = vmax.f32 %v484_v6, %v953_v7  ;;  %v485_v25 = vmax.f32 %v380_v8, 0.0  ;;  %v954_v26 = vmax.f32 %v849_v9, 0.0 }
 0x10a   :  { %v3494_v27 = vmax.f32 %v482_v13, %v951_v16  ;;  %v483_v28 = vmax.f32 %v372_v18, 0.0  ;;  %v952_v30 = vmax.f32 %v841_v23, 0.0 }
 0x10b   :  { %v3496_v31 = vmax.f32 %v485_v25, %v954_v26 }
 0x10c   :  { %v3498_v32 = vmax.f32 %v483_v28, %v952_v30  ;;  %v2776_v33 = vpop.f32.mrb[24].mxu0  ;;  %v2822_v34 = vpop.f32.mrb[24].mxu1 }
 0x10d   :  { %v393_v35 = vadd.f32 %v2776_v33, %v3402_v29  ;;  %v862_v36 = vadd.f32 %v2822_v34, %v3402_v29  ;;  %v384_v37 = vpop.f32.mrb[25].mxu0  ;;  %v853_v38 = vpop.f32.mrb[25].mxu1 }
 0x10e   :  { %v385_v39 = vadd.f32 %v3402_v29, %v384_v37  ;;  %v854_v40 = vadd.f32 %v3402_v29, %v853_v38  ;;  %v2777_v41 = vpop.f32.mrb[26].mxu0  ;;  %v2823_v42 = vpop.f32.mrb[26].mxu1 }
 0x10f   :  { %v488_v44 = vmax.f32 %v393_v35, 0.0  ;;  %v957_v47 = vmax.f32 %v862_v36, 0.0  ;;  %v396_v48 = vadd.f32 %v2777_v41, %v3402_v29  ;;  %v865_v54 = vadd.f32 %v2823_v42, %v3402_v29  ;;  %v387_v55 = vpop.f32.mrb[27].mxu0  ;;  %v856_v60 = vpop.f32.mrb[27].mxu1 }
 0x110   :  { %v486_v61 = vmax.f32 %v385_v39, 0.0  ;;  %v955_v62 = vmax.f32 %v854_v40, 0.0  ;;  %v388_v63 = vadd.f32 %v3402_v29, %v387_v55  ;;  %v857_v0 = vadd.f32 %v3402_v29, %v856_v60 }
 0x111   :  { %v3508_v1 = vmax.f32 %v488_v44, %v957_v47  ;;  %v489_v2 = vmax.f32 %v396_v48, 0.0  ;;  %v958_v3 = vmax.f32 %v865_v54, 0.0 }
 0x112   :  { %v3510_v4 = vmax.f32 %v486_v61, %v955_v62  ;;  %v487_v5 = vmax.f32 %v388_v63, 0.0  ;;  %v956_v6 = vmax.f32 %v857_v0, 0.0 }
 0x113   :  { %v3512_v7 = vmax.f32 %v489_v2, %v958_v3 }
 0x114   :  { %v3514_v8 = vmax.f32 %v487_v5, %v956_v6  ;;  %v2780_v9 = vpop.f32.mrb[28].mxu0  ;;  %v2826_v10 = vpop.f32.mrb[28].mxu1 }
 0x115   :  { %v409_v12 = vadd.f32 %v2780_v9, %v3402_v29  ;;  %v878_v13 = vadd.f32 %v2826_v10, %v3402_v29  ;;  %v400_v16 = vpop.f32.mrb[29].mxu0  ;;  %v869_v18 = vpop.f32.mrb[29].mxu1 }
 0x116   :  { %v401_v23 = vadd.f32 %v3402_v29, %v400_v16  ;;  %v870_v25 = vadd.f32 %v3402_v29, %v869_v18  ;;  %v2781_v26 = vpop.f32.mrb[30].mxu0  ;;  %v2827_v28 = vpop.f32.mrb[30].mxu1 }
 0x117   :  { %v492_v30 = vmax.f32 %v409_v12, 0.0  ;;  %v961_v33 = vmax.f32 %v878_v13, 0.0  ;;  %v412_v34 = vadd.f32 %v2781_v26, %v3402_v29  ;;  %v881_v35 = vadd.f32 %v2827_v28, %v3402_v29  ;;  %v403_v36 = vpop.f32.mrb[31].mxu0  ;;  %v872_v37 = vpop.f32.mrb[31].mxu1 }
 0x118   :  { %v490_v38 = vmax.f32 %v401_v23, 0.0  ;;  %v959_v39 = vmax.f32 %v870_v25, 0.0  ;;  %v404_v40 = vadd.f32 %v3402_v29, %v403_v36  ;;  %v873_v41 = vadd.f32 %v3402_v29, %v872_v37 }
 0x119   :  { %v3524_v42 = vmax.f32 %v492_v30, %v961_v33  ;;  %v493_v44 = vmax.f32 %v412_v34, 0.0  ;;  %v962_v47 = vmax.f32 %v881_v35, 0.0 }
 0x11a   :  { %v3526_v48 = vmax.f32 %v490_v38, %v959_v39  ;;  %v491_v54 = vmax.f32 %v404_v40, 0.0  ;;  %v960_v55 = vmax.f32 %v873_v41, 0.0 }
 0x11b   :  { %v3528_v60 = vmax.f32 %v493_v44, %v962_v47 }
 0x11c   :  { %v3530_v61 = vmax.f32 %v491_v54, %v960_v55  ;;  %v2784_v62 = vpop.f32.mrb[32].mxu0  ;;  %v2830_v63 = vpop.f32.mrb[32].mxu1 }
 0x11d   :  { %v425_v0 = vadd.f32 %v2784_v62, %v3402_v29  ;;  %v894_v2 = vadd.f32 %v2830_v63, %v3402_v29  ;;  %v416_v3 = vpop.f32.mrb[33].mxu0  ;;  %v885_v5 = vpop.f32.mrb[33].mxu1 }
 0x11e   :  { %v417_v6 = vadd.f32 %v3402_v29, %v416_v3  ;;  %v886_v9 = vadd.f32 %v3402_v29, %v885_v5  ;;  %v2785_v10 = vpop.f32.mrb[34].mxu0  ;;  %v2831_v12 = vpop.f32.mrb[34].mxu1 }
 0x11f   :  { %v496_v13 = vmax.f32 %v425_v0, 0.0  ;;  %v965_v16 = vmax.f32 %v894_v2, 0.0  ;;  %v428_v18 = vadd.f32 %v2785_v10, %v3402_v29  ;;  %v897_v23 = vadd.f32 %v2831_v12, %v3402_v29  ;;  %v419_v25 = vpop.f32.mrb[35].mxu0  ;;  %v888_v26 = vpop.f32.mrb[35].mxu1 }
 0x120   :  { %v494_v28 = vmax.f32 %v417_v6, 0.0  ;;  %v963_v30 = vmax.f32 %v886_v9, 0.0  ;;  %v420_v33 = vadd.f32 %v3402_v29, %v419_v25  ;;  %v889_v34 = vadd.f32 %v3402_v29, %v888_v26 }
 0x121   :  { %v3540_v35 = vmax.f32 %v496_v13, %v965_v16  ;;  %v497_v36 = vmax.f32 %v428_v18, 0.0  ;;  %v966_v37 = vmax.f32 %v897_v23, 0.0 }
 0x122   :  { %v3542_v38 = vmax.f32 %v494_v28, %v963_v30  ;;  %v495_v39 = vmax.f32 %v420_v33, 0.0  ;;  %v964_v40 = vmax.f32 %v889_v34, 0.0 }
 0x123   :  { %v3544_v41 = vmax.f32 %v497_v36, %v966_v37 }
 0x124   :  { %v3546_v44 = vmax.f32 %v495_v39, %v964_v40  ;;  %v2788_v47 = vpop.f32.mrb[36].mxu0  ;;  %v2834_v54 = vpop.f32.mrb[36].mxu1 }
 0x125   :  { %v441_v55 = vadd.f32 %v2788_v47, %v3402_v29  ;;  %v910_v62 = vadd.f32 %v2834_v54, %v3402_v29  ;;  %v432_v63 = vpop.f32.mrb[37].mxu0  ;;  %v901_v0 = vpop.f32.mrb[37].mxu1 }
 0x126   :  { %v433_v2 = vadd.f32 %v3402_v29, %v432_v63  ;;  %v902_v3 = vadd.f32 %v3402_v29, %v901_v0  ;;  %v2789_v5 = vpop.f32.mrb[38].mxu0  ;;  %v2835_v6 = vpop.f32.mrb[38].mxu1 }
 0x127   :  { %v500_v9 = vmax.f32 %v441_v55, 0.0  ;;  %v969_v10 = vmax.f32 %v910_v62, 0.0  ;;  %v444_v12 = vadd.f32 %v2789_v5, %v3402_v29  ;;  %v913_v13 = vadd.f32 %v2835_v6, %v3402_v29  ;;  %v435_v16 = vpop.f32.mrb[39].mxu0  ;;  %v904_v18 = vpop.f32.mrb[39].mxu1 }
 0x128   :  { %v498_v23 = vmax.f32 %v433_v2, 0.0  ;;  %v967_v25 = vmax.f32 %v902_v3, 0.0  ;;  %v436_v26 = vadd.f32 %v3402_v29, %v435_v16  ;;  %v905_v28 = vadd.f32 %v3402_v29, %v904_v18 }
 0x129   :  { %v3556_v30 = vmax.f32 %v500_v9, %v969_v10  ;;  %v501_v33 = vmax.f32 %v444_v12, 0.0  ;;  %v970_v34 = vmax.f32 %v913_v13, 0.0 }
 0x12a   :  { %v3558_v36 = vmax.f32 %v498_v23, %v967_v25  ;;  %v499_v37 = vmax.f32 %v436_v26, 0.0  ;;  %v968_v39 = vmax.f32 %v905_v28, 0.0 }
 0x12b   :  { %v3560_v40 = vmax.f32 %v501_v33, %v970_v34 }
 0x12c   :  { %v3562_v47 = vmax.f32 %v499_v37, %v968_v39  ;;  %v2792_v54 = vpop.f32.mrb[40].mxu0  ;;  %v2838_v55 = vpop.f32.mrb[40].mxu1 }
 0x12d   :  { %v457_v62 = vadd.f32 %v2792_v54, %v3402_v29  ;;  %v926_v63 = vadd.f32 %v2838_v55, %v3402_v29  ;;  %v448_v0 = vpop.f32.mrb[41].mxu0  ;;  %v917_v2 = vpop.f32.mrb[41].mxu1 }
 0x12e   :  { %v449_v3 = vadd.f32 %v3402_v29, %v448_v0  ;;  %v918_v5 = vadd.f32 %v3402_v29, %v917_v2  ;;  %v2793_v6 = vpop.f32.mrb[42].mxu0  ;;  %v2839_v9 = vpop.f32.mrb[42].mxu1 }
 0x12f   :  { %v504_v10 = vmax.f32 %v457_v62, 0.0  ;;  %v973_v12 = vmax.f32 %v926_v63, 0.0  ;;  %v451_v13 = vpop.f32.mrb[43].mxu0  ;;  %v920_v16 = vpop.f32.mrb[43].mxu1 }
 0x130   :  { %v502_v18 = vmax.f32 %v449_v3, 0.0  ;;  %v971_v23 = vmax.f32 %v918_v5, 0.0  ;;  %v452_v25 = vadd.f32 %v3402_v29, %v451_v13  ;;  %v921_v26 = vadd.f32 %v3402_v29, %v920_v16 }
 0x131   :  { %v3570_v28 = vmax.f32 %v504_v10, %v973_v12 }
 0x132   :  { %v3572_v33 = vmax.f32 %v502_v18, %v971_v23  ;;  %v503_v34 = vmax.f32 %v452_v25, 0.0  ;;  %v972_v37 = vmax.f32 %v921_v26, 0.0 }
 0x133   :  { %3885 = vst [vmem:[#allocation2_spill] sm:$0xff] %v3570_v28 }
 0x134   :  { %3886 = vst [vmem:[#allocation3_spill] sm:$0xff] %v3572_v33  ;;  %v3574_v39 = vmax.f32 %v503_v34, %v972_v37  ;;  %v2844_v54 = vpop.f32.mrb[44].mxu0  ;;  %v2890_v55 = vpop.f32.mrb[44].mxu1 }
 0x135   :  { %v1278_v62 = vadd.f32 %v2844_v54, %v3402_v29  ;;  %v1747_v63 = vadd.f32 %v2890_v55, %v3402_v29  ;;  %v1269_v0 = vpop.f32.mrb[45].mxu0  ;;  %v1738_v2 = vpop.f32.mrb[45].mxu1 }
 0x136   :  { %3887 = vst [vmem:[#allocation4_spill] sm:$0xff] %v3574_v39  ;;  %v1270_v3 = vadd.f32 %v3402_v29, %v1269_v0  ;;  %v1739_v5 = vadd.f32 %v3402_v29, %v1738_v2  ;;  %v2845_v6 = vpop.f32.mrb[46].mxu0  ;;  %v2891_v9 = vpop.f32.mrb[46].mxu1 }
 0x137   :  { %v1445_v10 = vmax.f32 %v1278_v62, 0.0  ;;  %v1914_v12 = vmax.f32 %v1747_v63, 0.0  ;;  %v1281_v13 = vadd.f32 %v2845_v6, %v3402_v29  ;;  %v1750_v16 = vadd.f32 %v2891_v9, %v3402_v29  ;;  %v1272_v18 = vpop.f32.mrb[47].mxu0  ;;  %v1741_v23 = vpop.f32.mrb[47].mxu1 }
 0x138   :  { %v1443_v25 = vmax.f32 %v1270_v3, 0.0  ;;  %v1912_v26 = vmax.f32 %v1739_v5, 0.0  ;;  %v1273_v34 = vadd.f32 %v3402_v29, %v1272_v18  ;;  %v1742_v37 = vadd.f32 %v3402_v29, %v1741_v23 }
 0x139   :  { %v1957_v54 = vmax.f32 %v1445_v10, %v1914_v12  ;;  %v1446_v55 = vmax.f32 %v1281_v13, 0.0  ;;  %v1915_v0 = vmax.f32 %v1750_v16, 0.0 }
 0x13a   :  { %v1955_v2 = vmax.f32 %v1443_v25, %v1912_v26  ;;  %v1444_v39 = vmax.f32 %v1273_v34, 0.0  ;;  %v1913_v33 = vmax.f32 %v1742_v37, 0.0 }
 0x13b   :  { %v2000_v62 = vmax.f32 %v3412_v50, %v1957_v54  ;;  %v1958_v63 = vmax.f32 %v1446_v55, %v1915_v0 }
 0x13c   :  { %v1998_v6 = vmax.f32 %v3414_v53, %v1955_v2  ;;  %v1956_v9 = vmax.f32 %v1444_v39, %v1913_v33  ;;  %v2848_v28 = vpop.f32.mrb[48].mxu0  ;;  %v2894_v3 = vpop.f32.mrb[48].mxu1 }
 0x13d   :  { %v2615_v5 = vpack.c.bf16 %v2000_v62, %v2000_v62  ;;  %v2001_v18 = vmax.f32 %v3416_v56, %v1958_v63  ;;  %v1294_v23 = vadd.f32 %v2848_v28, %v3402_v29  ;;  %v1763_v10 = vadd.f32 %v2894_v3, %v3402_v29  ;;  %v1285_v12 = vpop.f32.mrb[49].mxu0  ;;  %v1754_v13 = vpop.f32.mrb[49].mxu1 }
 0x13e   :  { %v2613_v16 = vpack.c.bf16 %v1998_v6, %v1998_v6  ;;  %v1999_v25 = vmax.f32 %v3418_v57, %v1956_v9  ;;  %v1286_v50 = vadd.f32 %v3402_v29, %v1285_v12  ;;  %v1755_v26 = vadd.f32 %v3402_v29, %v1754_v13  ;;  %v2849_v53 = vpop.f32.mrb[50].mxu0  ;;  %v2895_v33 = vpop.f32.mrb[50].mxu1 }
 0x13f   :  { %2217 = vst.msk [vmem:[%s3884_s3 + $0x8] sm:$0xf] %vm2214_vm3, %v2615_v5  ;;  %v2616_v56 = vpack.c.bf16 %v2001_v18, %v2001_v18  ;;  %v1449_v28 = vmax.f32 %v1294_v23, 0.0  ;;  %v1918_v39 = vmax.f32 %v1763_v10, 0.0  ;;  %v1297_v34 = vadd.f32 %v2849_v53, %v3402_v29  ;;  %v1288_v37 = vpop.f32.mrb[51].mxu0  ;;  %v1757_v54 = vpop.f32.mrb[51].mxu1 }
 0x140   :  { %2215 = vst.msk [vmem:[%s3884_s3] sm:$0xf] %vm2214_vm3, %v2613_v16  ;;  %v2614_v57 = vpack.c.bf16 %v1999_v25, %v1999_v25  ;;  %v1447_v55 = vmax.f32 %v1286_v50, 0.0  ;;  %v1916_v0 = vmax.f32 %v1755_v26, 0.0  ;;  %v1766_v2 = vadd.f32 %v2895_v33, %v3402_v29 }
 0x141   :  { %2218 = vst.msk [vmem:[%s3884_s3 + $0xc] sm:$0xf] %vm2214_vm3, %v2616_v56  ;;  %v1961_v62 = vmax.f32 %v1449_v28, %v1918_v39  ;;  %v1450_v63 = vmax.f32 %v1297_v34, 0.0  ;;  %v1289_v6 = vadd.f32 %v3402_v29, %v1288_v37  ;;  %v1758_v9 = vadd.f32 %v3402_v29, %v1757_v54 }
 0x142   :  { %2216 = vst.msk [vmem:[%s3884_s3 + $0x4] sm:$0xf] %vm2214_vm3, %v2614_v57  ;;  %v1959_v3 = vmax.f32 %v1447_v55, %v1916_v0  ;;  %v1919_v5 = vmax.f32 %v1766_v2, 0.0 }
 0x143   :  { %v2004_v18 = vmax.f32 %v3428_v14, %v1961_v62  ;;  %v1448_v23 = vmax.f32 %v1289_v6, 0.0  ;;  %v1917_v10 = vmax.f32 %v1758_v9, 0.0 }
 0x144   :  { %v2002_v12 = vmax.f32 %v3430_v17, %v1959_v3  ;;  %v1962_v13 = vmax.f32 %v1450_v63, %v1919_v5  ;;  %v2852_v16 = vpop.f32.mrb[52].mxu0  ;;  %v2898_v25 = vpop.f32.mrb[52].mxu1 }
 0x145   :  { %v2619_v50 = vpack.c.bf16 %v2004_v18, %v2004_v18  ;;  %v1960_v26 = vmax.f32 %v1448_v23, %v1917_v10  ;;  %v1310_v53 = vadd.f32 %v2852_v16, %v3402_v29  ;;  %v1779_v33 = vadd.f32 %v2898_v25, %v3402_v29  ;;  %v1301_v56 = vpop.f32.mrb[53].mxu0  ;;  %v1770_v28 = vpop.f32.mrb[53].mxu1 }
 0x146   :  { %v2617_v39 = vpack.c.bf16 %v2002_v12, %v2002_v12  ;;  %v2005_v34 = vmax.f32 %v3432_v20, %v1962_v13  ;;  %v1302_v14 = vadd.f32 %v3402_v29, %v1301_v56  ;;  %v1771_v37 = vadd.f32 %v3402_v29, %v1770_v28  ;;  %v2853_v54 = vpop.f32.mrb[54].mxu0  ;;  %v2899_v17 = vpop.f32.mrb[54].mxu1 }
 0x147   :  { %2221 = vst.msk [vmem:[%s3884_s3 + $0x18] sm:$0xf] %vm2214_vm3, %v2619_v50  ;;  %v2003_v57 = vmax.f32 %v3434_v21, %v1960_v26  ;;  %v1453_v55 = vmax.f32 %v1310_v53, 0.0  ;;  %v1922_v0 = vmax.f32 %v1779_v33, 0.0  ;;  %v1313_v2 = vadd.f32 %v2853_v54, %v3402_v29  ;;  %v1304_v62 = vpop.f32.mrb[55].mxu0  ;;  %v1773_v63 = vpop.f32.mrb[55].mxu1 }
 0x148   :  { %2219 = vst.msk [vmem:[%s3884_s3 + $0x10] sm:$0xf] %vm2214_vm3, %v2617_v39  ;;  %v2620_v20 = vpack.c.bf16 %v2005_v34, %v2005_v34  ;;  %v1451_v6 = vmax.f32 %v1302_v14, 0.0  ;;  %v1920_v9 = vmax.f32 %v1771_v37, 0.0  ;;  %v1782_v3 = vadd.f32 %v2899_v17, %v3402_v29 }
 0x149   :  { %v2618_v5 = vpack.c.bf16 %v2003_v57, %v2003_v57  ;;  %v1965_v18 = vmax.f32 %v1453_v55, %v1922_v0  ;;  %v1454_v23 = vmax.f32 %v1313_v2, 0.0  ;;  %v1305_v21 = vadd.f32 %v3402_v29, %v1304_v62 }
 0x14a   :  { %2222 = vst.msk [vmem:[%s3884_s3 + $0x1c] sm:$0xf] %vm2214_vm3, %v2620_v20  ;;  %v1963_v10 = vmax.f32 %v1451_v6, %v1920_v9  ;;  %v1923_v12 = vmax.f32 %v1782_v3, 0.0  ;;  %v1774_v13 = vadd.f32 %v3402_v29, %v1773_v63 }
 0x14b   :  { %2220 = vst.msk [vmem:[%s3884_s3 + $0x14] sm:$0xf] %vm2214_vm3, %v2618_v5  ;;  %v2008_v16 = vmax.f32 %v3444_v43, %v1965_v18  ;;  %v1452_v25 = vmax.f32 %v1305_v21, 0.0 }
 0x14c   :  { %v2006_v50 = vmax.f32 %v3446_v46, %v1963_v10  ;;  %v1966_v26 = vmax.f32 %v1454_v23, %v1923_v12  ;;  %v1921_v53 = vmax.f32 %v1774_v13, 0.0  ;;  %v2856_v33 = vpop.f32.mrb[56].mxu0  ;;  %v2902_v56 = vpop.f32.mrb[56].mxu1 }
 0x14d   :  { %v2623_v28 = vpack.c.bf16 %v2008_v16, %v2008_v16  ;;  %v1326_v39 = vadd.f32 %v2856_v33, %v3402_v29  ;;  %v1795_v34 = vadd.f32 %v2902_v56, %v3402_v29  ;;  %v1317_v14 = vpop.f32.mrb[57].mxu0  ;;  %v1786_v37 = vpop.f32.mrb[57].mxu1 }
 0x14e   :  { %v2621_v54 = vpack.c.bf16 %v2006_v50, %v2006_v50  ;;  %v2009_v17 = vmax.f32 %v3448_v49, %v1966_v26  ;;  %v1964_v57 = vmax.f32 %v1452_v25, %v1921_v53  ;;  %v1318_v43 = vadd.f32 %v3402_v29, %v1317_v14  ;;  %v2857_v55 = vpop.f32.mrb[58].mxu0  ;;  %v2903_v0 = vpop.f32.mrb[58].mxu1 }
 0x14f   :  { %2225 = vst.msk [vmem:[%s3884_s3 + $0x28] sm:$0xf] %vm2214_vm3, %v2623_v28  ;;  %v1457_v46 = vmax.f32 %v1326_v39, 0.0  ;;  %v1926_v2 = vmax.f32 %v1795_v34, 0.0  ;;  %v1787_v62 = vadd.f32 %v3402_v29, %v1786_v37  ;;  %v1329_v63 = vadd.f32 %v2857_v55, %v3402_v29  ;;  %v1320_v20 = vpop.f32.mrb[59].mxu0  ;;  %v1789_v6 = vpop.f32.mrb[59].mxu1 }
 0x150   :  { %2223 = vst.msk [vmem:[%s3884_s3 + $0x20] sm:$0xf] %vm2214_vm3, %v2621_v54  ;;  %v2624_v49 = vpack.c.bf16 %v2009_v17, %v2009_v17  ;;  %v2007_v9 = vmax.f32 %v3450_v51, %v1964_v57  ;;  %v1455_v3 = vmax.f32 %v1318_v43, 0.0  ;;  %v1798_v5 = vadd.f32 %v2903_v0, %v3402_v29 }
 0x151   :  { %v1969_v18 = vmax.f32 %v1457_v46, %v1926_v2  ;;  %v1924_v23 = vmax.f32 %v1787_v62, 0.0  ;;  %v1458_v21 = vmax.f32 %v1329_v63, 0.0  ;;  %v1321_v10 = vadd.f32 %v3402_v29, %v1320_v20 }
 0x152   :  { %2226 = vst.msk [vmem:[%s3884_s3 + $0x2c] sm:$0xf] %vm2214_vm3, %v2624_v49  ;;  %v2622_v12 = vpack.c.bf16 %v2007_v9, %v2007_v9  ;;  %v1927_v13 = vmax.f32 %v1798_v5, 0.0  ;;  %v1790_v16 = vadd.f32 %v3402_v29, %v1789_v6 }
 0x153   :  { %v2012_v25 = vmax.f32 %v3460_v11, %v1969_v18  ;;  %v1967_v51 = vmax.f32 %v1455_v3, %v1924_v23  ;;  %v1456_v50 = vmax.f32 %v1321_v10, 0.0 }
 0x154   :  { %2224 = vst.msk [vmem:[%s3884_s3 + $0x24] sm:$0xf] %vm2214_vm3, %v2622_v12  ;;  %v1970_v26 = vmax.f32 %v1458_v21, %v1927_v13  ;;  %v1925_v53 = vmax.f32 %v1790_v16, 0.0  ;;  %v2860_v33 = vpop.f32.mrb[60].mxu0  ;;  %v2906_v56 = vpop.f32.mrb[60].mxu1 }
 0x155   :  { %v2627_v28 = vpack.c.bf16 %v2012_v25, %v2012_v25  ;;  %v2010_v39 = vmax.f32 %v3462_v15, %v1967_v51  ;;  %v1342_v34 = vadd.f32 %v2860_v33, %v3402_v29  ;;  %v1811_v14 = vadd.f32 %v2906_v56, %v3402_v29  ;;  %v1333_v37 = vpop.f32.mrb[61].mxu0  ;;  %v1802_v11 = vpop.f32.mrb[61].mxu1 }
 0x156   :  { %v2013_v54 = vmax.f32 %v3464_v19, %v1970_v26  ;;  %v1968_v17 = vmax.f32 %v1456_v50, %v1925_v53  ;;  %v1334_v57 = vadd.f32 %v3402_v29, %v1333_v37  ;;  %v1803_v43 = vadd.f32 %v3402_v29, %v1802_v11  ;;  %v2861_v55 = vpop.f32.mrb[62].mxu0  ;;  %v2907_v0 = vpop.f32.mrb[62].mxu1 }
 0x157   :  { %2229 = vst.msk [vmem:[%s3884_s3 + $0x38] sm:$0xf] %vm2214_vm3, %v2627_v28  ;;  %v2625_v15 = vpack.c.bf16 %v2010_v39, %v2010_v39  ;;  %v1461_v46 = vmax.f32 %v1342_v34, 0.0  ;;  %v1930_v2 = vmax.f32 %v1811_v14, 0.0  ;;  %v1345_v62 = vadd.f32 %v2861_v55, %v3402_v29  ;;  %v1336_v63 = vpop.f32.mrb[63].mxu0  ;;  %v1805_v20 = vpop.f32.mrb[63].mxu1 }
 0x158   :  { %v2628_v19 = vpack.c.bf16 %v2013_v54, %v2013_v54  ;;  %v2011_v6 = vmax.f32 %v3466_v22, %v1968_v17  ;;  %v1459_v49 = vmax.f32 %v1334_v57, 0.0  ;;  %v1928_v9 = vmax.f32 %v1803_v43, 0.0  ;;  %v3710_v55 = vld [vmem:[%s3883_s2] ss:$0 sm:$0xff] }
 0x159   :  { %2227 = vst.msk [vmem:[%s3884_s3 + $0x30] sm:$0xf] %vm2214_vm3, %v2625_v15  ;;  %v1973_v3 = vmax.f32 %v1461_v46, %v1930_v2  ;;  %v1462_v5 = vmax.f32 %v1345_v62, 0.0  ;;  %v1814_v18 = vadd.f32 %v2907_v0, %v3402_v29  ;;  %v1337_v23 = vadd.f32 %v3402_v29, %v1336_v63 }
 0x15a   :  { %2230 = vst.msk [vmem:[%s3884_s3 + $0x3c] sm:$0xf] %vm2214_vm3, %v2628_v19  ;;  %v2626_v21 = vpack.c.bf16 %v2011_v6, %v2011_v6  ;;  %v1971_v22 = vmax.f32 %v1459_v49, %v1928_v9  ;;  %v1806_v10 = vadd.f32 %v3402_v29, %v1805_v20 }
 0x15b   :  { %v2016_v12 = vmax.f32 %v3476_v45, %v1973_v3  ;;  %v1931_v13 = vmax.f32 %v1814_v18, 0.0  ;;  %v1460_v16 = vmax.f32 %v1337_v23, 0.0 }
 0x15c   :  { %2228 = vst.msk [vmem:[%s3884_s3 + $0x34] sm:$0xf] %vm2214_vm3, %v2626_v21  ;;  %v2014_v25 = vmax.f32 %v3478_v52, %v1971_v22  ;;  %v1929_v51 = vmax.f32 %v1806_v10, 0.0  ;;  %v2864_v50 = vpop.f32.mrb[64].mxu0  ;;  %v2910_v26 = vpop.f32.mrb[64].mxu1 }
 0x15d   :  { %v2631_v53 = vpack.c.bf16 %v2016_v12, %v2016_v12  ;;  %v1974_v33 = vmax.f32 %v1462_v5, %v1931_v13  ;;  %v1358_v56 = vadd.f32 %v2864_v50, %v3402_v29  ;;  %v1827_v28 = vadd.f32 %v2910_v26, %v3402_v29  ;;  %v1349_v39 = vpop.f32.mrb[65].mxu0  ;;  %v1818_v45 = vpop.f32.mrb[65].mxu1 }
 0x15e   :  { %v2629_v34 = vpack.c.bf16 %v2014_v25, %v2014_v25  ;;  %v1972_v14 = vmax.f32 %v1460_v16, %v1929_v51  ;;  %v1350_v37 = vadd.f32 %v3402_v29, %v1349_v39  ;;  %v1819_v11 = vadd.f32 %v3402_v29, %v1818_v45  ;;  %v2865_v54 = vpop.f32.mrb[66].mxu0  ;;  %v2911_v17 = vpop.f32.mrb[66].mxu1 }
 0x15f   :  { %2233 = vst.msk [vmem:[%s3884_s3 + $0x48] sm:$0xf] %vm2214_vm3, %v2631_v53  ;;  %v2017_v52 = vmax.f32 %v3480_v58, %v1974_v33  ;;  %v1465_v57 = vmax.f32 %v1358_v56, 0.0  ;;  %v1934_v43 = vmax.f32 %v1827_v28, 0.0  ;;  %v1361_v0 = vadd.f32 %v3710_v55, %v2865_v54  ;;  %v1352_v15 = vpop.f32.mrb[67].mxu0  ;;  %v1821_v29 = vpop.f32.mrb[67].mxu1 }
 0x160   :  { %2231 = vst.msk [vmem:[%s3884_s3 + $0x40] sm:$0xf] %vm2214_vm3, %v2629_v34  ;;  %v2015_v46 = vmax.f32 %v3482_v59, %v1972_v14  ;;  %v1463_v2 = vmax.f32 %v1350_v37, 0.0  ;;  %v1932_v58 = vmax.f32 %v1819_v11, 0.0  ;;  %v1830_v62 = vadd.f32 %v3710_v55, %v2911_v17 }
 0x161   :  { %v2632_v63 = vpack.c.bf16 %v2017_v52, %v2017_v52  ;;  %v1977_v20 = vmax.f32 %v1465_v57, %v1934_v43  ;;  %v1466_v19 = vmax.f32 %v1361_v0, 0.0  ;;  %v1353_v6 = vadd.f32 %v3710_v55, %v1352_v15 }
 0x162   :  { %v2630_v49 = vpack.c.bf16 %v2015_v46, %v2015_v46  ;;  %v1975_v9 = vmax.f32 %v1463_v2, %v1932_v58  ;;  %v1935_v3 = vmax.f32 %v1830_v62, 0.0  ;;  %v1822_v5 = vadd.f32 %v3710_v55, %v1821_v29 }
 0x163   :  { %2234 = vst.msk [vmem:[%s3884_s3 + $0x4c] sm:$0xf] %vm2214_vm3, %v2632_v63  ;;  %v2020_v59 = vmax.f32 %v3492_v24, %v1977_v20  ;;  %v1464_v18 = vmax.f32 %v1353_v6, 0.0 }
 0x164   :  { %2232 = vst.msk [vmem:[%s3884_s3 + $0x44] sm:$0xf] %vm2214_vm3, %v2630_v49  ;;  %v2018_v23 = vmax.f32 %v3494_v27, %v1975_v9  ;;  %v1978_v21 = vmax.f32 %v1466_v19, %v1935_v3  ;;  %v1933_v22 = vmax.f32 %v1822_v5, 0.0  ;;  %v2868_v10 = vpop.f32.mrb[68].mxu0  ;;  %v2914_v12 = vpop.f32.mrb[68].mxu1 }
 0x165   :  { %v2635_v13 = vpack.c.bf16 %v2020_v59, %v2020_v59  ;;  %v1374_v16 = vadd.f32 %v3710_v55, %v2868_v10  ;;  %v1843_v25 = vadd.f32 %v3710_v55, %v2914_v12  ;;  %v1365_v51 = vpop.f32.mrb[69].mxu0  ;;  %v1834_v50 = vpop.f32.mrb[69].mxu1 }
 0x166   :  { %v2633_v24 = vpack.c.bf16 %v2018_v23, %v2018_v23  ;;  %v2021_v26 = vmax.f32 %v3496_v31, %v1978_v21  ;;  %v1976_v53 = vmax.f32 %v1464_v18, %v1933_v22  ;;  %v1366_v33 = vadd.f32 %v3710_v55, %v1365_v51  ;;  %v2869_v56 = vpop.f32.mrb[70].mxu0  ;;  %v2915_v28 = vpop.f32.mrb[70].mxu1 }
 0x167   :  { %2237 = vst.msk [vmem:[%s3884_s3 + $0x58] sm:$0xf] %vm2214_vm3, %v2635_v13  ;;  %v1469_v27 = vmax.f32 %v1374_v16, 0.0  ;;  %v1938_v39 = vmax.f32 %v1843_v25, 0.0  ;;  %v1835_v45 = vadd.f32 %v3710_v55, %v1834_v50  ;;  %v1377_v34 = vadd.f32 %v3710_v55, %v2869_v56  ;;  %v1368_v14 = vpop.f32.mrb[71].mxu0  ;;  %v1837_v37 = vpop.f32.mrb[71].mxu1 }
 0x168   :  { %2235 = vst.msk [vmem:[%s3884_s3 + $0x50] sm:$0xf] %vm2214_vm3, %v2633_v24  ;;  %v2636_v31 = vpack.c.bf16 %v2021_v26, %v2021_v26  ;;  %v2019_v11 = vmax.f32 %v3498_v32, %v1976_v53  ;;  %v1467_v54 = vmax.f32 %v1366_v33, 0.0  ;;  %v1846_v17 = vadd.f32 %v3710_v55, %v2915_v28 }
 0x169   :  { %v1981_v52 = vmax.f32 %v1469_v27, %v1938_v39  ;;  %v1936_v57 = vmax.f32 %v1835_v45, 0.0  ;;  %v1470_v43 = vmax.f32 %v1377_v34, 0.0  ;;  %v1369_v0 = vadd.f32 %v3710_v55, %v1368_v14 }
 0x16a   :  { %2238 = vst.msk [vmem:[%s3884_s3 + $0x5c] sm:$0xf] %vm2214_vm3, %v2636_v31  ;;  %v2634_v15 = vpack.c.bf16 %v2019_v11, %v2019_v11  ;;  %v1939_v29 = vmax.f32 %v1846_v17, 0.0  ;;  %v1838_v46 = vadd.f32 %v3710_v55, %v1837_v37 }
 0x16b   :  { %v2024_v2 = vmax.f32 %v3508_v1, %v1981_v52  ;;  %v1979_v32 = vmax.f32 %v1467_v54, %v1936_v57  ;;  %v1468_v58 = vmax.f32 %v1369_v0, 0.0 }
 0x16c   :  { %2236 = vst.msk [vmem:[%s3884_s3 + $0x54] sm:$0xf] %vm2214_vm3, %v2634_v15  ;;  %v1982_v62 = vmax.f32 %v1470_v43, %v1939_v29  ;;  %v1937_v63 = vmax.f32 %v1838_v46, 0.0  ;;  %v2872_v20 = vpop.f32.mrb[72].mxu0  ;;  %v2918_v19 = vpop.f32.mrb[72].mxu1 }
 0x16d   :  { %v2639_v6 = vpack.c.bf16 %v2024_v2, %v2024_v2  ;;  %v2022_v49 = vmax.f32 %v3510_v4, %v1979_v32  ;;  %v1390_v9 = vadd.f32 %v3710_v55, %v2872_v20  ;;  %v1859_v3 = vadd.f32 %v3710_v55, %v2918_v19  ;;  %v1381_v5 = vpop.f32.mrb[73].mxu0  ;;  %v1850_v1 = vpop.f32.mrb[73].mxu1 }
 0x16e   :  { %v2025_v59 = vmax.f32 %v3512_v7, %v1982_v62  ;;  %v1980_v18 = vmax.f32 %v1468_v58, %v1937_v63  ;;  %v1382_v23 = vadd.f32 %v3710_v55, %v1381_v5  ;;  %v1851_v21 = vadd.f32 %v3710_v55, %v1850_v1  ;;  %v2873_v22 = vpop.f32.mrb[74].mxu0  ;;  %v2919_v10 = vpop.f32.mrb[74].mxu1 }
 0x16f   :  { %2241 = vst.msk [vmem:[%s3884_s3 + $0x68] sm:$0xf] %vm2214_vm3, %v2639_v6  ;;  %v2637_v4 = vpack.c.bf16 %v2022_v49, %v2022_v49  ;;  %v1473_v12 = vmax.f32 %v1390_v9, 0.0  ;;  %v1942_v13 = vmax.f32 %v1859_v3, 0.0  ;;  %v1393_v16 = vadd.f32 %v3710_v55, %v2873_v22  ;;  %v1384_v25 = vpop.f32.mrb[75].mxu0  ;;  %v1853_v51 = vpop.f32.mrb[75].mxu1 }
 0x170   :  { %v2640_v7 = vpack.c.bf16 %v2025_v59, %v2025_v59  ;;  %v2023_v50 = vmax.f32 %v3514_v8, %v1980_v18  ;;  %v1471_v24 = vmax.f32 %v1382_v23, 0.0  ;;  %v1940_v26 = vmax.f32 %v1851_v21, 0.0 }
 0x171   :  { %2239 = vst.msk [vmem:[%s3884_s3 + $0x60] sm:$0xf] %vm2214_vm3, %v2637_v4  ;;  %v1985_v53 = vmax.f32 %v1473_v12, %v1942_v13  ;;  %v1474_v33 = vmax.f32 %v1393_v16, 0.0  ;;  %v1862_v56 = vadd.f32 %v3710_v55, %v2919_v10  ;;  %v1385_v28 = vadd.f32 %v3710_v55, %v1384_v25 }
 0x172   :  { %2242 = vst.msk [vmem:[%s3884_s3 + $0x6c] sm:$0xf] %vm2214_vm3, %v2640_v7  ;;  %v2638_v27 = vpack.c.bf16 %v2023_v50, %v2023_v50  ;;  %v1983_v8 = vmax.f32 %v1471_v24, %v1940_v26  ;;  %v1854_v39 = vadd.f32 %v3710_v55, %v1853_v51 }
 0x173   :  { %v2028_v45 = vmax.f32 %v3524_v42, %v1985_v53  ;;  %v1943_v34 = vmax.f32 %v1862_v56, 0.0  ;;  %v1472_v14 = vmax.f32 %v1385_v28, 0.0 }
 0x174   :  { %2240 = vst.msk [vmem:[%s3884_s3 + $0x64] sm:$0xf] %vm2214_vm3, %v2638_v27  ;;  %v2026_v37 = vmax.f32 %v3526_v48, %v1983_v8  ;;  %v1941_v31 = vmax.f32 %v1854_v39, 0.0  ;;  %v2876_v11 = vpop.f32.mrb[76].mxu0  ;;  %v2922_v54 = vpop.f32.mrb[76].mxu1 }
 0x175   :  { %v2643_v17 = vpack.c.bf16 %v2028_v45, %v2028_v45  ;;  %v1986_v52 = vmax.f32 %v1474_v33, %v1943_v34  ;;  %v1406_v57 = vadd.f32 %v3710_v55, %v2876_v11  ;;  %v1875_v43 = vadd.f32 %v3710_v55, %v2922_v54  ;;  %v1397_v0 = vpop.f32.mrb[77].mxu0  ;;  %v1866_v42 = vpop.f32.mrb[77].mxu1 }
 0x176   :  { %v2641_v15 = vpack.c.bf16 %v2026_v37, %v2026_v37  ;;  %v1984_v29 = vmax.f32 %v1472_v14, %v1941_v31  ;;  %v1398_v46 = vadd.f32 %v3710_v55, %v1397_v0  ;;  %v1867_v2 = vadd.f32 %v3710_v55, %v1866_v42  ;;  %v2877_v32 = vpop.f32.mrb[78].mxu0  ;;  %v2923_v58 = vpop.f32.mrb[78].mxu1 }
 0x177   :  { %2245 = vst.msk [vmem:[%s3884_s3 + $0x78] sm:$0xf] %vm2214_vm3, %v2643_v17  ;;  %v2029_v48 = vmax.f32 %v3528_v60, %v1986_v52  ;;  %v1477_v62 = vmax.f32 %v1406_v57, 0.0  ;;  %v1946_v63 = vmax.f32 %v1875_v43, 0.0  ;;  %v1409_v20 = vadd.f32 %v3710_v55, %v2877_v32  ;;  %v1400_v19 = vpop.f32.mrb[79].mxu0  ;;  %v1869_v6 = vpop.f32.mrb[79].mxu1 }
 0x178   :  { %2243 = vst.msk [vmem:[%s3884_s3 + $0x70] sm:$0xf] %vm2214_vm3, %v2641_v15  ;;  %v2027_v49 = vmax.f32 %v3530_v61, %v1984_v29  ;;  %v1475_v9 = vmax.f32 %v1398_v46, 0.0  ;;  %v1944_v3 = vmax.f32 %v1867_v2, 0.0  ;;  %v1878_v5 = vadd.f32 %v3710_v55, %v2923_v58 }
 0x179   :  { %v2644_v1 = vpack.c.bf16 %v2029_v48, %v2029_v48  ;;  %v1989_v59 = vmax.f32 %v1477_v62, %v1946_v63  ;;  %v1478_v60 = vmax.f32 %v1409_v20, 0.0  ;;  %v1401_v18 = vadd.f32 %v3710_v55, %v1400_v19 }
 0x17a   :  { %v2642_v23 = vpack.c.bf16 %v2027_v49, %v2027_v49  ;;  %v1987_v21 = vmax.f32 %v1475_v9, %v1944_v3  ;;  %v1947_v22 = vmax.f32 %v1878_v5, 0.0  ;;  %v1870_v10 = vadd.f32 %v3710_v55, %v1869_v6 }
 0x17b   :  { %2246 = vst.msk [vmem:[%s3884_s3 + $0x7c] sm:$0xf] %vm2214_vm3, %v2644_v1  ;;  %v2032_v61 = vmax.f32 %v3540_v35, %v1989_v59  ;;  %v1476_v4 = vmax.f32 %v1401_v18, 0.0 }
 0x17c   :  { %2244 = vst.msk [vmem:[%s3884_s3 + $0x74] sm:$0xf] %vm2214_vm3, %v2642_v23  ;;  %v2030_v12 = vmax.f32 %v3542_v38, %v1987_v21  ;;  %v1990_v13 = vmax.f32 %v1478_v60, %v1947_v22  ;;  %v1945_v16 = vmax.f32 %v1870_v10, 0.0  ;;  %v2880_v25 = vpop.f32.mrb[80].mxu0  ;;  %v2926_v51 = vpop.f32.mrb[80].mxu1 }
 0x17d   :  { %v2647_v7 = vpack.c.bf16 %v2032_v61, %v2032_v61  ;;  %v1422_v50 = vadd.f32 %v3710_v55, %v2880_v25  ;;  %v1891_v24 = vadd.f32 %v3710_v55, %v2926_v51  ;;  %v1413_v26 = vpop.f32.mrb[81].mxu0  ;;  %v1882_v53 = vpop.f32.mrb[81].mxu1 }
 0x17e   :  { %v2645_v35 = vpack.c.bf16 %v2030_v12, %v2030_v12  ;;  %v2033_v33 = vmax.f32 %v3544_v41, %v1990_v13  ;;  %v1988_v56 = vmax.f32 %v1476_v4, %v1945_v16  ;;  %v1414_v28 = vadd.f32 %v3710_v55, %v1413_v26  ;;  %v2881_v27 = vpop.f32.mrb[82].mxu0  ;;  %v2927_v8 = vpop.f32.mrb[82].mxu1 }
 0x17f   :  { %2249 = vst.msk [vmem:[%s3884_s3 + $0x88] sm:$0xf] %vm2214_vm3, %v2647_v7  ;;  %v1481_v38 = vmax.f32 %v1422_v50, 0.0  ;;  %v1950_v39 = vmax.f32 %v1891_v24, 0.0  ;;  %v1883_v45 = vadd.f32 %v3710_v55, %v1882_v53  ;;  %v1425_v34 = vadd.f32 %v3710_v55, %v2881_v27  ;;  %v1416_v14 = vpop.f32.mrb[83].mxu0  ;;  %v1885_v37 = vpop.f32.mrb[83].mxu1 }
 0x180   :  { %2247 = vst.msk [vmem:[%s3884_s3 + $0x80] sm:$0xf] %vm2214_vm3, %v2645_v35  ;;  %v2648_v41 = vpack.c.bf16 %v2033_v33, %v2033_v33  ;;  %v2031_v31 = vmax.f32 %v3546_v44, %v1988_v56  ;;  %v1479_v11 = vmax.f32 %v1414_v28, 0.0  ;;  %v1894_v54 = vadd.f32 %v3710_v55, %v2927_v8  ;;  %v3889_v24 = vld [vmem:[#allocation3_spill] sm:$0xff]  ;;  %v3890_v33 = vld [vmem:[#allocation4_spill] sm:$0xff] }
 0x181   :  { %v1993_v17 = vmax.f32 %v1481_v38, %v1950_v39  ;;  %v1948_v52 = vmax.f32 %v1883_v45, 0.0  ;;  %v1482_v57 = vmax.f32 %v1425_v34, 0.0  ;;  %v1417_v43 = vadd.f32 %v3710_v55, %v1416_v14 }
 0x182   :  { %2250 = vst.msk [vmem:[%s3884_s3 + $0x8c] sm:$0xf] %vm2214_vm3, %v2648_v41  ;;  %v2646_v0 = vpack.c.bf16 %v2031_v31, %v2031_v31  ;;  %v1951_v42 = vmax.f32 %v1894_v54, 0.0  ;;  %v1886_v15 = vadd.f32 %v3710_v55, %v1885_v37 }
 0x183   :  { %v2036_v29 = vmax.f32 %v3556_v30, %v1993_v17  ;;  %v1991_v44 = vmax.f32 %v1479_v11, %v1948_v52  ;;  %v1480_v46 = vmax.f32 %v1417_v43, 0.0 }
 0x184   :  { %2248 = vst.msk [vmem:[%s3884_s3 + $0x84] sm:$0xf] %vm2214_vm3, %v2646_v0  ;;  %v1994_v2 = vmax.f32 %v1482_v57, %v1951_v42  ;;  %v1949_v32 = vmax.f32 %v1886_v15, 0.0  ;;  %v2884_v58 = vpop.f32.mrb[84].mxu0  ;;  %v2930_v48 = vpop.f32.mrb[84].mxu1 }
 0x185   :  { %v2651_v62 = vpack.c.bf16 %v2036_v29, %v2036_v29  ;;  %v2034_v63 = vmax.f32 %v3558_v36, %v1991_v44  ;;  %v1438_v20 = vadd.f32 %v3710_v55, %v2884_v58  ;;  %v1907_v19 = vadd.f32 %v3710_v55, %v2930_v48  ;;  %v1429_v6 = vpop.f32.mrb[85].mxu0  ;;  %v1898_v30 = vpop.f32.mrb[85].mxu1 }
 0x186   :  { %v2037_v49 = vmax.f32 %v3560_v40, %v1994_v2  ;;  %v1992_v9 = vmax.f32 %v1480_v46, %v1949_v32  ;;  %v1430_v3 = vadd.f32 %v3710_v55, %v1429_v6  ;;  %v1899_v5 = vadd.f32 %v3710_v55, %v1898_v30  ;;  %v2885_v1 = vpop.f32.mrb[86].mxu0  ;;  %v2931_v59 = vpop.f32.mrb[86].mxu1 }
 0x187   :  { %2253 = vst.msk [vmem:[%s3884_s3 + $0x98] sm:$0xf] %vm2214_vm3, %v2651_v62  ;;  %v2649_v36 = vpack.c.bf16 %v2034_v63, %v2034_v63  ;;  %v1485_v60 = vmax.f32 %v1438_v20, 0.0  ;;  %v1954_v18 = vmax.f32 %v1907_v19, 0.0  ;;  %v1432_v23 = vpop.f32.mrb[87].mxu0  ;;  %v1901_v21 = vpop.f32.mrb[87].mxu1 }
 0x188   :  { %v2652_v22 = vpack.c.bf16 %v2037_v49, %v2037_v49  ;;  %v2035_v40 = vmax.f32 %v3562_v47, %v1992_v9  ;;  %v1483_v10 = vmax.f32 %v1430_v3, 0.0  ;;  %v1952_v61 = vmax.f32 %v1899_v5, 0.0  ;;  %v3888_v47 = vld [vmem:[#allocation2_spill] sm:$0xff] }
 0x189   :  { %2251 = vst.msk [vmem:[%s3884_s3 + $0x90] sm:$0xf] %vm2214_vm3, %v2649_v36  ;;  %v1997_v4 = vmax.f32 %v1485_v60, %v1954_v18  ;;  %v1433_v12 = vadd.f32 %v3710_v55, %v1432_v23  ;;  %v1902_v13 = vadd.f32 %v3710_v55, %v1901_v21 }
 0x18a   :  { %2254 = vst.msk [vmem:[%s3884_s3 + $0x9c] sm:$0xf] %vm2214_vm3, %v2652_v22  ;;  %v2650_v16 = vpack.c.bf16 %v2035_v40, %v2035_v40  ;;  %v1995_v25 = vmax.f32 %v1483_v10, %v1952_v61 }
 0x18b   :  { %v2040_v51 = vmax.f32 %v3888_v47, %v1997_v4  ;;  %v1484_v7 = vmax.f32 %v1433_v12, 0.0  ;;  %v1953_v50 = vmax.f32 %v1902_v13, 0.0 }
 0x18c   :  { %2252 = vst.msk [vmem:[%s3884_s3 + $0x94] sm:$0xf] %vm2214_vm3, %v2650_v16  ;;  %v2038_v26 = vmax.f32 %v3889_v24, %v1995_v25 }
 0x18d   :  { %v2655_v55 = vpack.c.bf16 %v2040_v51, %v2040_v51  ;;  %v1996_v53 = vmax.f32 %v1484_v7, %v1953_v50 }
 0x18e   :  { %v2653_v35 = vpack.c.bf16 %v2038_v26, %v2038_v26 }
 0x18f   :  { %2258 = vst.msk [vmem:[%s3884_s3 + $0xa8] sm:$0x1] %vm2257_vm4, %v2655_v55  ;;  %v2039_v56 = vmax.f32 %v3890_v33, %v1996_v53 }
 0x190   :  { %2255 = vst.msk [vmem:[%s3884_s3 + $0xa0] sm:$0xf] %vm2214_vm3, %v2653_v35 }
 0x191   :  { %v2654_v28 = vpack.c.bf16 %v2039_v56, %v2039_v56 }
 0x193   :  { %2256 = vst.msk [vmem:[%s3884_s3 + $0xa4] sm:$0xf] %vm2214_vm3, %v2654_v28 }

// kernel: net_forward.4
= control target key start
LH: loop header
LB: loop body
LE: loop exit
PB: predicated region body
PF: predicated region fallthrough
CT: control target
= control target key end

     0   :  { %vm235_vm0 = vcmask 261120   ;;  %vm1084_vm1 = vcmask 519168   ;;  %vm1091_vm2 = vcmask 516096   ;;  %s2004_s1 = inlined_call_operand.vmem [shape: bf16[288,64], index: 1, kind: input, shape index: {}]   ;;  %s2005_s0 = inlined_call_operand.vmem [shape: bf16[4,50,288], index: 0, kind: input, shape index: {}]   ;;  %s2006_s2 = inlined_call_operand.vmem [shape: f32[1,64], index: 2, kind: input, shape index: {}]   ;;  %s2007_s3 = inlined_call_operand.vmem [shape: bf16[50,64], index: 3, kind: output, shape index: {}]  }
   0x1   :  { %v1569_v0 = vld [vmem:[%s2004_s1 + $0x40] sm:$0xff]   ;;  %v1581_v2 = vld [vmem:[%s2004_s1 + $0x48] sm:$0xff]   ;;  %v1595_v4 = vld [vmem:[%s2004_s1 + $0x50] sm:$0xff]  }
   0x2   :  { %v1574_v1 = vld [vmem:[%s2004_s1] sm:$0xff]   ;;  %1236 = vmatprep.subr.bf16.mxu0 %v1569_v0  ;;  %1282 = vmatprep.subr.bf16.mxu1 %v1569_v0  ;;  %v1588_v3 = vld [vmem:[%s2004_s1 + $0x8] sm:$0xff]   ;;  %v1602_v5 = vld [vmem:[%s2004_s1 + $0x10] sm:$0xff]  }
   0x3   :  { %1237 = vmatpush3.bf16.msra.mxu0 %v1574_v1  ;;  %1283 = vmatpush3.bf16.msra.mxu1 %v1574_v1  ;;  %v1609_v6 = vld [vmem:[%s2004_s1 + $0x58] sm:$0xff]   ;;  %v1623_v8 = vld [vmem:[%s2004_s1 + $0x60] sm:$0xff]   ;;  %v1637_v10 = vld [vmem:[%s2004_s1 + $0x68] sm:$0xff]  }
   0x4   :  { %1238 = vmatprep.subr.bf16.mxu0 %v1581_v2  ;;  %1284 = vmatprep.subr.bf16.mxu1 %v1581_v2  ;;  %v1616_v7 = vld [vmem:[%s2004_s1 + $0x18] sm:$0xff]   ;;  %v1630_v9 = vld [vmem:[%s2004_s1 + $0x20] sm:$0xff]   ;;  %v1650_v13 = vld [vmem:[%s2004_s1 + $0x28] sm:$0xff]  }
   0x5   :  { %v1486_v11 = vld [vmem:[%s2005_s0 + $0x4] ss:$12 sps:$4 sm:$0xff]   ;;  %v1671_v16 = vld [vmem:[%s2004_s1 + $0x78] sm:$0xff]   ;;  %v1484_v19 = vld [vmem:[%s2005_s0] ss:$12 sps:$4 sm:$0xff]  }
   0x6   :  { %v1489_v12 = vld [vmem:[%s2005_s0 + $0x58] ss:$12 sps:$4 sm:$0xff]   ;;  %v1657_v14 = vld [vmem:[%s2004_s1 + $0x70] sm:$0xff]   ;;  %280 = vmatprep.mubr.bf16.mxu0 %v1486_v11  ;;  %v1491_v21 = vld [vmem:[%s2005_s0 + $0x1c] ss:$12 sps:$4 sm:$0xff]  }
   0x7   :  { %1239 = vmatpush3.bf16.msra.mxu0 %v1588_v3  ;;  %1285 = vmatpush3.bf16.msra.mxu1 %v1588_v3  ;;  %v1664_v15 = vld [vmem:[%s2004_s1 + $0x30] sm:$0xff]   ;;  %v1678_v17 = vld [vmem:[%s2004_s1 + $0x38] sm:$0xff]   ;;  %v1685_v18 = vld [vmem:[%s2004_s1 + $0x80] sm:$0xff]  }
   0x8   :  { %1240 = vmatprep.subr.bf16.mxu0 %v1595_v4  ;;  %1286 = vmatprep.subr.bf16.mxu1 %v1595_v4  ;;  %v1487_v20 = vld [vmem:[%s2005_s0 + $0x54] ss:$12 sps:$4 sm:$0xff]   ;;  %v1493_v22 = vld [vmem:[%s2005_s0 + $0x70] ss:$12 sps:$4 sm:$0xff]   ;;  %v1706_v23 = vld [vmem:[%s2004_s1 + $0x88] sm:$0xff]  }
   0x9   :  { %497 = vmatprep.mubr.bf16.mxu1 %v1489_v12  ;;  %v1495_v24 = vld [vmem:[%s2005_s0 + $0x18] ss:$12 sps:$4 sm:$0xff]   ;;  %v1497_v26 = vld [vmem:[%s2005_s0 + $0x34] ss:$12 sps:$4 sm:$0xff]   ;;  %v64_v28 = vld [vmem:[%s2005_s0 + $0x48] sm:$0x11] }
   0xa   :  { %v1496_v25 = vld [vmem:[%s2005_s0 + $0x6c] ss:$12 sps:$4 sm:$0xff]   ;;  %v1499_v27 = vld [vmem:[%s2005_s0 + $0x88] ss:$12 sps:$4 sm:$0xff]   ;;  %v1144_v29 = vld [vmem:[%s2005_s0 + $0x9c] sm:$0x11]  ;;  %v1108_v32 = vcombine.high %v64_v28, %v64_v28  ;;  %v1107_v34 = vcombine.low %v64_v28, %v64_v28 }
   0xb   :  { %1241 = vmatpush3.bf16.msra.mxu0 %v1602_v5  ;;  %1287 = vmatpush3.bf16.msra.mxu1 %v1602_v5  ;;  %v1501_v30 = vld [vmem:[%s2005_s0 + $0x30] ss:$12 sps:$4 sm:$0xff]   ;;  %v1156_v33 = vcombine.high %v1144_v29, %v1144_v29  ;;  %v1155_v35 = vcombine.low %v1144_v29, %v1144_v29  ;;  %v1508_v36 = vld [vmem:[%s2005_s0 + $0x8] ss:$12 sps:$4 sm:$0xff]   ;;  %v1511_v37 = vld [vmem:[%s2005_s0 + $0xac] ss:$12 sps:$4 sm:$0xff]  }
   0xc   :  { %1242 = vmatprep.subr.bf16.mxu0 %v1609_v6  ;;  %1288 = vmatprep.subr.bf16.mxu1 %v1609_v6  ;;  %v1502_v31 = vld [vmem:[%s2005_s0 + $0x84] ss:$12 sps:$4 sm:$0xff]   ;;  %v1509_v38 = vld [vmem:[%s2005_s0 + $0xa8] ss:$12 sps:$4 sm:$0xff]   ;;  %v1512_v39 = vld [vmem:[%s2005_s0 + $0x20] ss:$12 sps:$4 sm:$0xff]  }
   0xd   :  { %v1513_v40 = vld [vmem:[%s2005_s0 + $0x38] ss:$12 sps:$4 sm:$0xff]   ;;  %v1516_v42 = vld [vmem:[%s2005_s0 + $0x50] ss:$0 sps:$4 sm:$0x11]  }
   0xe   :  { %v1514_v41 = vld [vmem:[%s2005_s0 + $0xc4] ss:$12 sps:$4 sm:$0xff]   ;;  %v1517_v43 = vld [vmem:[%s2005_s0 + $0xc0] ss:$12 sps:$4 sm:$0xff]   ;;  %v1518_v44 = vld [vmem:[%s2005_s0 + $0x5c] ss:$12 sps:$4 sm:$0xff]  }
   0xf   :  { %1243 = vmatpush3.bf16.msra.mxu0 %v1616_v7  ;;  %1289 = vmatpush3.bf16.msra.mxu1 %v1616_v7  ;;  %v1519_v45 = vld [vmem:[%s2005_s0 + $0xdc] ss:$12 sps:$4 sm:$0xff]   ;;  %v1521_v46 = vld [vmem:[%s2005_s0 + $0x74] ss:$12 sps:$4 sm:$0xff]   ;;  %v1522_v47 = vld [vmem:[%s2005_s0 + $0xd8] ss:$12 sps:$4 sm:$0xff]  }
  0x10   :  { %1244 = vmatprep.subr.bf16.mxu0 %v1623_v8  ;;  %1290 = vmatprep.subr.bf16.mxu1 %v1623_v8  ;;  %v1174_v48 = vld [vmem:[%s2005_s0 + $0xf0] sm:$0x11]  ;;  %v1523_v49 = vld [vmem:[%s2005_s0 + $0x8c] ss:$12 sps:$4 sm:$0xff]   ;;  %v1528_v55 = vld [vmem:[%s2005_s0 + $0xfc] ss:$12 sps:$4 sm:$0xff]  }
  0x11   :  { %v1186_v50 = vcombine.high %v1174_v48, %v1174_v48  ;;  %v1525_v51 = vld [vmem:[%s2005_s0 + $0xa4] ss:$0 sps:$4 sm:$0x11]   ;;  %v1185_v52 = vcombine.low %v1174_v48, %v1174_v48  ;;  %v1527_v53 = vld [vmem:[%s2005_s0 + $0xb0] ss:$12 sps:$4 sm:$0xff]  }
  0x12   :  { %v1530_v54 = vld [vmem:[%s2005_s0 + $0x100] ss:$12 sps:$4 sm:$0xff]   ;;  %v1531_v56 = vld [vmem:[%s2005_s0 + $0xc8] ss:$12 sps:$4 sm:$0xff]   ;;  %v1533_v58 = vld [vmem:[%s2005_s0 + $0x118] ss:$12 sps:$4 sm:$0xff]  }
  0x13   :  { %1245 = vmatpush3.bf16.msra.mxu0 %v1630_v9  ;;  %1291 = vmatpush3.bf16.msra.mxu1 %v1630_v9  ;;  %v1532_v57 = vld [vmem:[%s2005_s0 + $0xe0] ss:$12 sps:$4 sm:$0xff]   ;;  %v1535_v59 = vld [vmem:[%s2005_s0 + $0xf8] ss:$0 sps:$4 sm:$0x11]  }
  0x14   :  { %1246 = vmatprep.subr.bf16.mxu0 %v1637_v10  ;;  %1292 = vmatprep.subr.bf16.mxu1 %v1637_v10  ;;  %v1536_v60 = vld [vmem:[%s2005_s0 + $0x114] ss:$12 sps:$4 sm:$0xff]   ;;  %v1537_v61 = vld [vmem:[%s2005_s0 + $0x130] ss:$12 sps:$4 sm:$0xff]   ;;  %v1204_v63 = vld [vmem:[%s2005_s0 + $0x144] sm:$0x11] }
  0x15   :  { %v1539_v62 = vld [vmem:[%s2005_s0 + $0x104] ss:$12 sps:$4 sm:$0xff]  }
  0x17   :  { %1247 = vmatpush3.bf16.msra.mxu0 %v1650_v13  ;;  %1293 = vmatpush3.bf16.msra.mxu1 %v1650_v13 }
  0x18   :  { %1248 = vmatprep.subr.bf16.mxu0 %v1657_v14  ;;  %1294 = vmatprep.subr.bf16.mxu1 %v1657_v14 }
  0x1b   :  { %1249 = vmatpush3.bf16.msra.mxu0 %v1664_v15  ;;  %1295 = vmatpush3.bf16.msra.mxu1 %v1664_v15 }
  0x1c   :  { %1250 = vmatprep.subr.bf16.mxu0 %v1671_v16  ;;  %1296 = vmatprep.subr.bf16.mxu1 %v1671_v16 }
  0x1f   :  { %1251 = vmatpush3.bf16.msra.mxu0 %v1678_v17  ;;  %1297 = vmatpush3.bf16.msra.mxu1 %v1678_v17 }
  0x20   :  { %1328 = vmatprep.subr.bf16.mxu1 %v1569_v0  ;;  %1420 = vmatprep.subr.bf16.mxu0 %v1685_v18 }
  0x22   :  { %281 = vmatmul.mubr.bf16.vlgmr.msra.gmra.mrb[0].mxu0 %v1484_v19  ;;  %498 = vmatmul.mubr.bf16.vlgmr.msra.gmra.mrb[0].mxu1 %v1487_v20 }
  0x23   :  { %1329 = vmatpush3.bf16.msra.mxu1 %v1574_v1  ;;  %1421 = vmatpush3.bf16.msra.mxu0 %v1685_v18 }
  0x24   :  { %1330 = vmatprep.subr.bf16.mxu1 %v1581_v2  ;;  %288 = vmatprep.mubr.bf16.mxu0 %v1491_v21 }
  0x25   :  { %505 = vmatprep.mubr.bf16.mxu1 %v1493_v22  ;;  %1422 = vmatprep.subr.bf16.mxu0 %v1706_v23 }
  0x27   :  { %1331 = vmatpush3.bf16.msra.mxu1 %v1588_v3  ;;  %1423 = vmatpush3.bf16.msra.mxu0 %v1706_v23 }
  0x28   :  { %1332 = vmatprep.subr.bf16.mxu1 %v1595_v4  ;;  %1432 = vmatprep.subr.bf16.mxu0 %v1685_v18 }
  0x2a   :  { %289 = vmatmul.mubr.bf16.gmra.mrb[4].mxu0 %v1495_v24  ;;  %506 = vmatmul.mubr.bf16.gmra.mrb[4].mxu1 %v1496_v25 }
  0x2b   :  { %1333 = vmatpush3.bf16.msra.mxu1 %v1602_v5  ;;  %296 = vmatprep.mubr.bf16.mxu0 %v1497_v26 }
  0x2c   :  { %1334 = vmatprep.subr.bf16.mxu1 %v1609_v6  ;;  %513 = vmatprep.mubr.bf16.mxu1 %v1499_v27 }
  0x2f   :  { %1335 = vmatpush3.bf16.msra.mxu1 %v1616_v7 }
  0x30   :  { %1336 = vmatprep.subr.bf16.mxu1 %v1623_v8 }
  0x32   :  { %297 = vmatmul.mubr.bf16.gmra.mrb[8].mxu0 %v1501_v30  ;;  %514 = vmatmul.mubr.bf16.gmra.mrb[8].mxu1 %v1502_v31 }
  0x33   :  { %1337 = vmatpush3.bf16.msra.mxu1 %v1630_v9  ;;  %304 = vmatprep.mubr.bf16.mxu0 %v1108_v32 }
  0x34   :  { %1338 = vmatprep.subr.bf16.mxu1 %v1637_v10  ;;  %521 = vmatprep.mubr.bf16.mxu1 %v1156_v33 }
  0x37   :  { %1339 = vmatpush3.bf16.msra.mxu1 %v1650_v13 }
  0x38   :  { %1340 = vmatprep.subr.bf16.mxu1 %v1657_v14 }
  0x3a   :  { %305 = vmatmul.mubr.bf16.gmra.mrb[12].mxu0 %v1107_v34  ;;  %522 = vmatmul.mubr.bf16.gmra.mrb[12].mxu1 %v1155_v35 }
  0x3b   :  { %1341 = vmatpush3.bf16.msra.mxu1 %v1664_v15  ;;  %1424 = vmatprep.mubr.msk.bf16.mxu0 %vm235_vm0, %v1508_v36 }
  0x3c   :  { %1342 = vmatprep.subr.bf16.mxu1 %v1671_v16  ;;  %721 = vmatprep.mubr.bf16.mxu1 %v1511_v37 }
  0x3f   :  { %1343 = vmatpush3.bf16.msra.mxu1 %v1678_v17 }
  0x40   :  { %1374 = vmatprep.subr.bf16.mxu1 %v1569_v0  ;;  %v1540_v0 = vld [vmem:[%s2005_s0 + $0x12c] ss:$12 sps:$4 sm:$0xff]  }
  0x42   :  { %1425 = vmatmul.mubr.msk.bf16.vlgmr.msra.gmra.mrb[16].mxu0 %vm235_vm0, %v1512_v39  ;;  %722 = vmatmul.mubr.bf16.vlgmr.msra.gmra.mrb[16].mxu1 %v1509_v38 }
  0x43   :  { %1375 = vmatpush3.bf16.msra.mxu1 %v1574_v1  ;;  %1433 = vmatpush3.bf16.msra.mxu0 %v1685_v18  ;;  %v1541_v1 = vld [vmem:[%s2005_s0 + $0x11c] ss:$12 sps:$4 sm:$0xff]  }
  0x44   :  { %1376 = vmatprep.subr.bf16.mxu1 %v1581_v2  ;;  %1428 = vmatprep.mubr.msk.bf16.mxu0 %vm235_vm0, %v1513_v40  ;;  %v1216_v2 = vcombine.high %v1204_v63, %v1204_v63 }
  0x45   :  { %729 = vmatprep.mubr.bf16.mxu1 %v1514_v41  ;;  %1434 = vmatprep.subr.bf16.mxu0 %v1706_v23 }
  0x47   :  { %1377 = vmatpush3.bf16.msra.mxu1 %v1588_v3  ;;  %1435 = vmatpush3.bf16.msra.mxu0 %v1706_v23  ;;  %v1543_v3 = vld [vmem:[%s2005_s0 + $0x134] ss:$12 sps:$4 sm:$0xff]  }
  0x48   :  { %1378 = vmatprep.subr.bf16.mxu1 %v1595_v4  ;;  %1444 = vmatprep.subr.bf16.mxu0 %v1685_v18  ;;  %v1215_v4 = vcombine.low %v1204_v63, %v1204_v63 }
  0x4a   :  { %1429 = vmatmul.mubr.msk.bf16.gmra.mrb[20].mxu0 %vm235_vm0, %v1516_v42  ;;  %730 = vmatmul.mubr.bf16.gmra.mrb[20].mxu1 %v1517_v43 }
  0x4b   :  { %1379 = vmatpush3.bf16.msra.mxu1 %v1602_v5  ;;  %1436 = vmatprep.mubr.msk.bf16.mxu0 %vm235_vm0, %v1518_v44  ;;  %v1545_v5 = vld [vmem:[%s2005_s0 + $0x14c] ss:$0 sps:$4 sm:$0x11]  }
  0x4c   :  { %1380 = vmatprep.subr.bf16.mxu1 %v1609_v6  ;;  %737 = vmatprep.mubr.bf16.mxu1 %v1519_v45 }
  0x4f   :  { %1381 = vmatpush3.bf16.msra.mxu1 %v1616_v7 }
  0x50   :  { %1382 = vmatprep.subr.bf16.mxu1 %v1623_v8 }
  0x52   :  { %1437 = vmatmul.mubr.msk.bf16.vlgmr.msra.gmra.mrb[24].mxu0 %vm235_vm0, %v1521_v46  ;;  %738 = vmatmul.mubr.bf16.gmra.mrb[24].mxu1 %v1522_v47 }
  0x53   :  { %1383 = vmatpush3.bf16.msra.mxu1 %v1630_v9  ;;  %1445 = vmatpush3.bf16.msra.mxu0 %v1685_v18 }
  0x54   :  { %1384 = vmatprep.subr.bf16.mxu1 %v1637_v10  ;;  %1440 = vmatprep.mubr.msk.bf16.mxu0 %vm235_vm0, %v1523_v49 }
  0x55   :  { %745 = vmatprep.mubr.bf16.mxu1 %v1186_v50  ;;  %1446 = vmatprep.subr.bf16.mxu0 %v1706_v23 }
  0x57   :  { %1385 = vmatpush3.bf16.msra.mxu1 %v1650_v13  ;;  %1447 = vmatpush3.bf16.msra.mxu0 %v1706_v23 }
  0x58   :  { %1386 = vmatprep.subr.bf16.mxu1 %v1657_v14  ;;  %1456 = vmatprep.subr.bf16.mxu0 %v1685_v18 }
  0x5a   :  { %1441 = vmatmul.mubr.msk.bf16.gmra.mrb[28].mxu0 %vm235_vm0, %v1525_v51  ;;  %746 = vmatmul.mubr.bf16.gmra.mrb[28].mxu1 %v1185_v52  ;;  %v1901_v52 = vld [vmem:[%s2006_s2] ss:$0 sm:$0xff] }
  0x5b   :  { %1387 = vmatpush3.bf16.msra.mxu1 %v1664_v15  ;;  %1448 = vmatprep.mubr.msk.bf16.mxu0 %vm235_vm0, %v1527_v53 }
  0x5c   :  { %1388 = vmatprep.subr.bf16.mxu1 %v1671_v16  ;;  %938 = vmatprep.mubr.bf16.mxu1 %v1530_v54 }
  0x5f   :  { %1389 = vmatpush3.bf16.msra.mxu1 %v1678_v17 }
  0x62   :  { %1449 = vmatmul.mubr.msk.bf16.vlgmr.msra.gmra.mrb[32].mxu0 %vm235_vm0, %v1531_v56  ;;  %939 = vmatmul.mubr.bf16.vlgmr.msra.gmra.mrb[32].mxu1 %v1528_v55 }
  0x63   :  { %1457 = vmatpush3.bf16.msra.mxu0 %v1685_v18  ;;  %1452 = vmatprep.mubr.msk.bf16.mxu0 %vm235_vm0, %v1532_v57 }
  0x64   :  { %946 = vmatprep.mubr.bf16.mxu1 %v1533_v58  ;;  %1458 = vmatprep.subr.bf16.mxu0 %v1706_v23 }
  0x67   :  { %1459 = vmatpush3.bf16.msra.mxu0 %v1706_v23 }
  0x6a   :  { %1453 = vmatmul.mubr.msk.bf16.gmra.mrb[36].mxu0 %vm235_vm0, %v1535_v59  ;;  %947 = vmatmul.mubr.bf16.gmra.mrb[36].mxu1 %v1536_v60 }
  0x6b   :  { %954 = vmatprep.mubr.bf16.mxu1 %v1537_v61  ;;  %1460 = vmatprep.mubr.msk.bf16.mxu0 %vm235_vm0, %v1539_v62 }
  0x72   :  { %955 = vmatmul.mubr.bf16.gmra.mrb[40].mxu1 %v1540_v0  ;;  %1461 = vmatmul.mubr.msk.bf16.vlgmr.msra.gmra.mrb[40].mxu0 %vm235_vm0, %v1541_v1 }
  0x73   :  { %962 = vmatprep.mubr.bf16.mxu1 %v1216_v2  ;;  %1464 = vmatprep.mubr.msk.bf16.mxu0 %vm235_vm0, %v1543_v3 }
  0x7a   :  { %963 = vmatmul.mubr.bf16.gmra.mrb[44].mxu1 %v1215_v4  ;;  %1465 = vmatmul.mubr.msk.bf16.gmra.mrb[44].mxu0 %vm235_vm0, %v1545_v5 }
  0xf5   :  { %v1252_v6 = vpop.f32.mrb[0].mxu0  ;;  %v1298_v7 = vpop.f32.mrb[0].mxu1 }
  0xf6   :  { %v1253_v8 = vpop.f32.mrb[1].mxu0  ;;  %v1299_v9 = vpop.f32.mrb[1].mxu1 }
  0xf7   :  { %v1254_v10 = vadd.f32 %v1253_v8, %v1252_v6  ;;  %v1884_v11 = vadd.f32 %v1299_v9, %v1298_v7  ;;  %v1255_v12 = vpop.f32.mrb[2].mxu0  ;;  %v1301_v13 = vpop.f32.mrb[2].mxu1 }
  0xf8   :  { %v1256_v14 = vpop.f32.mrb[3].mxu0  ;;  %v1302_v15 = vpop.f32.mrb[3].mxu1 }
  0xf9   :  { %v1257_v16 = vadd.f32 %v1256_v14, %v1255_v12  ;;  %v1886_v17 = vadd.f32 %v1302_v15, %v1301_v13  ;;  %v283_v56 = vadd.f32 %v1254_v10, %v1901_v52 }
  0xfb   :  { %v286_v1 = vadd.f32 %v1257_v16, %v1901_v52 }
  0xfd   :  { %v1258_v18 = vpop.f32.mrb[4].mxu0  ;;  %v1304_v19 = vpop.f32.mrb[4].mxu1 }
  0xfe   :  { %v1259_v20 = vpop.f32.mrb[5].mxu0  ;;  %v1305_v21 = vpop.f32.mrb[5].mxu1 }
  0xff   :  { %v1260_v22 = vadd.f32 %v1259_v20, %v1258_v18  ;;  %v1888_v23 = vadd.f32 %v1305_v21, %v1304_v19  ;;  %v1261_v24 = vpop.f32.mrb[6].mxu0  ;;  %v1307_v25 = vpop.f32.mrb[6].mxu1 }
 0x100   :  { %v1262_v26 = vpop.f32.mrb[7].mxu0  ;;  %v1308_v27 = vpop.f32.mrb[7].mxu1 }
 0x101   :  { %v1263_v28 = vadd.f32 %v1262_v26, %v1261_v24  ;;  %v1890_v29 = vadd.f32 %v1308_v27, %v1307_v25  ;;  %v291_v53 = vadd.f32 %v1260_v22, %v1901_v52  ;;  %v508_v26 = vadd.f32 %v1888_v23, %v1901_v52 }
 0x103   :  { %v294_v60 = vadd.f32 %v1263_v28, %v1901_v52 }
 0x105   :  { %v1264_v30 = vpop.f32.mrb[8].mxu0  ;;  %v1310_v31 = vpop.f32.mrb[8].mxu1 }
 0x106   :  { %v1265_v32 = vpop.f32.mrb[9].mxu0  ;;  %v1311_v33 = vpop.f32.mrb[9].mxu1 }
 0x107   :  { %v1266_v34 = vadd.f32 %v1265_v32, %v1264_v30  ;;  %v1892_v35 = vadd.f32 %v1311_v33, %v1310_v31  ;;  %v1267_v36 = vpop.f32.mrb[10].mxu0  ;;  %v1313_v37 = vpop.f32.mrb[10].mxu1  ;;  %v500_v30 = vadd.f32 %v1884_v11, %v1901_v52 }
 0x108   :  { %v1268_v38 = vpop.f32.mrb[11].mxu0  ;;  %v1314_v39 = vpop.f32.mrb[11].mxu1 }
 0x109   :  { %v1269_v40 = vadd.f32 %v1268_v38, %v1267_v36  ;;  %v1894_v41 = vadd.f32 %v1314_v39, %v1313_v37  ;;  %v299_v10 = vadd.f32 %v1266_v34, %v1901_v52  ;;  %v511_v34 = vadd.f32 %v1890_v29, %v1901_v52 }
 0x10b   :  { %v302_v16 = vadd.f32 %v1269_v40, %v1901_v52  ;;  %v503_v40 = vadd.f32 %v1886_v17, %v1901_v52 }
 0x10d   :  { %v1270_v42 = vpop.f32.mrb[12].mxu0  ;;  %v1316_v43 = vpop.f32.mrb[12].mxu1 }
 0x10e   :  { %v1271_v44 = vpop.f32.mrb[13].mxu0  ;;  %v1317_v45 = vpop.f32.mrb[13].mxu1 }
 0x10f   :  { %v1272_v46 = vadd.f32 %v1271_v44, %v1270_v42  ;;  %v1896_v47 = vadd.f32 %v1317_v45, %v1316_v43  ;;  %v1273_v48 = vpop.f32.mrb[14].mxu0  ;;  %v1319_v49 = vpop.f32.mrb[14].mxu1 }
 0x110   :  { %v1274_v50 = vpop.f32.mrb[15].mxu0  ;;  %v1320_v51 = vpop.f32.mrb[15].mxu1 }
 0x111   :  { %v307_v7 = vadd.f32 %v1272_v46, %v1901_v52  ;;  %v524_v17 = vadd.f32 %v1896_v47, %v1901_v52 }
 0x115   :  { %v1426_v54 = vpop.f32.mrb[16].mxu0  ;;  %v1344_v55 = vpop.f32.mrb[16].mxu1 }
 0x116   :  { %v355_v57 = vadd.f32 %v1426_v54, %v291_v53  ;;  %v346_v58 = vpop.f32.mrb[17].mxu0  ;;  %v1345_v59 = vpop.f32.mrb[17].mxu1 }
 0x117   :  { %v347_v61 = vadd.f32 %v346_v58, %v283_v56  ;;  %v1906_v62 = vadd.f32 %v1345_v59, %v1344_v55  ;;  %v1427_v63 = vpop.f32.mrb[18].mxu0  ;;  %v1347_v0 = vpop.f32.mrb[18].mxu1 }
 0x118   :  { %v358_v2 = vadd.f32 %v1427_v63, %v294_v60  ;;  %v349_v3 = vpop.f32.mrb[19].mxu0  ;;  %v1348_v4 = vpop.f32.mrb[19].mxu1  ;;  %v378_v23 = vmax.f32 %v355_v57, 0.0  ;;  %v516_v60 = vadd.f32 %v1892_v35, %v1901_v52 }
 0x119   :  { %v350_v5 = vadd.f32 %v349_v3, %v286_v1  ;;  %v1909_v6 = vadd.f32 %v1348_v4, %v1347_v0  ;;  %v376_v11 = vmax.f32 %v347_v61, 0.0 }
 0x11a   :  { %v379_v50 = vmax.f32 %v358_v2, 0.0 }
 0x11b   :  { %v377_v53 = vmax.f32 %v350_v5, 0.0  ;;  %v519_v5 = vadd.f32 %v1894_v41, %v1901_v52  ;;  %v724_v41 = vadd.f32 %v1906_v62, %v1901_v52 }
 0x11d   :  { %v1430_v8 = vpop.f32.mrb[20].mxu0  ;;  %v1350_v9 = vpop.f32.mrb[20].mxu1 }
 0x11e   :  { %v371_v12 = vadd.f32 %v1430_v8, %v307_v7  ;;  %v362_v13 = vpop.f32.mrb[21].mxu0  ;;  %v1351_v14 = vpop.f32.mrb[21].mxu1 }
 0x11f   :  { %v363_v15 = vadd.f32 %v362_v13, %v299_v10  ;;  %v1352_v18 = vadd.f32 %v1351_v14, %v1350_v9  ;;  %v1431_v19 = vpop.f32.mrb[22].mxu0  ;;  %v1353_v20 = vpop.f32.mrb[22].mxu1 }
 0x120   :  { %v365_v21 = vpop.f32.mrb[23].mxu0  ;;  %v1354_v22 = vpop.f32.mrb[23].mxu1  ;;  %v382_v7 = vmax.f32 %v371_v12, 0.0 }
 0x121   :  { %v366_v24 = vadd.f32 %v365_v21, %v302_v16  ;;  %v1355_v25 = vadd.f32 %v1354_v22, %v1353_v20  ;;  %v380_v10 = vmax.f32 %v363_v15, 0.0  ;;  %v732_v21 = vadd.f32 %v1352_v18, %v1901_v52 }
 0x123   :  { %v381_v35 = vmax.f32 %v366_v24, 0.0 }
 0x125   :  { %v1438_v27 = vpop.f32.mrb[24].mxu0  ;;  %v1356_v28 = vpop.f32.mrb[24].mxu1 }
 0x126   :  { %v572_v31 = vadd.f32 %v1438_v27, %v508_v26  ;;  %v563_v32 = vpop.f32.mrb[25].mxu0  ;;  %v1357_v33 = vpop.f32.mrb[25].mxu1 }
 0x127   :  { %v564_v36 = vadd.f32 %v563_v32, %v500_v30  ;;  %v1920_v37 = vadd.f32 %v1357_v33, %v1356_v28  ;;  %v1439_v38 = vpop.f32.mrb[26].mxu0  ;;  %v1359_v39 = vpop.f32.mrb[26].mxu1  ;;  %v735_v30 = vadd.f32 %v1355_v25, %v1901_v52 }
 0x128   :  { %v595_v42 = vmax.f32 %v572_v31, 0.0  ;;  %v575_v43 = vadd.f32 %v1439_v38, %v511_v34  ;;  %v566_v44 = vpop.f32.mrb[27].mxu0  ;;  %v1360_v45 = vpop.f32.mrb[27].mxu1  ;;  %v727_v34 = vadd.f32 %v1909_v6, %v1901_v52 }
 0x129   :  { %v593_v46 = vmax.f32 %v564_v36, 0.0  ;;  %v567_v48 = vadd.f32 %v566_v44, %v503_v40  ;;  %v1361_v49 = vadd.f32 %v1360_v45, %v1359_v39 }
 0x12a   :  { %v1924_v51 = vmax.f32 %v378_v23, %v595_v42  ;;  %v596_v29 = vmax.f32 %v575_v43, 0.0  ;;  %v740_v43 = vadd.f32 %v1920_v37, %v1901_v52 }
 0x12b   :  { %v1926_v54 = vmax.f32 %v376_v11, %v593_v46  ;;  %v594_v55 = vmax.f32 %v567_v48, 0.0 }
 0x12c   :  { %v1928_v56 = vmax.f32 %v379_v50, %v596_v29  ;;  %v743_v50 = vadd.f32 %v1361_v49, %v1901_v52 }
 0x12d   :  { %v1932_v57 = vmax.f32 %v377_v53, %v594_v55  ;;  %v1442_v58 = vpop.f32.mrb[28].mxu0  ;;  %v1362_v59 = vpop.f32.mrb[28].mxu1 }
 0x12e   :  { %v588_v61 = vadd.f32 %v1442_v58, %v524_v17  ;;  %v579_v63 = vpop.f32.mrb[29].mxu0  ;;  %v1363_v0 = vpop.f32.mrb[29].mxu1 }
 0x12f   :  { %v580_v1 = vadd.f32 %v579_v63, %v516_v60  ;;  %v1364_v2 = vadd.f32 %v1363_v0, %v1362_v59  ;;  %v1443_v3 = vpop.f32.mrb[30].mxu0  ;;  %v1365_v4 = vpop.f32.mrb[30].mxu1 }
 0x130   :  { %v599_v8 = vmax.f32 %v588_v61, 0.0  ;;  %v582_v47 = vpop.f32.mrb[31].mxu0  ;;  %v1366_v9 = vpop.f32.mrb[31].mxu1 }
 0x131   :  { %v597_v13 = vmax.f32 %v580_v1, 0.0  ;;  %v583_v14 = vadd.f32 %v582_v47, %v519_v5  ;;  %v748_v23 = vadd.f32 %v1364_v2, %v1901_v52 }
 0x132   :  { %v1938_v19 = vmax.f32 %v382_v7, %v599_v8 }
 0x133   :  { %v1940_v20 = vmax.f32 %v380_v10, %v597_v13  ;;  %v598_v16 = vmax.f32 %v583_v14, 0.0 }
 0x135   :  { %v1943_v22 = vmax.f32 %v381_v35, %v598_v16  ;;  %v1450_v26 = vpop.f32.mrb[32].mxu0  ;;  %v1390_v27 = vpop.f32.mrb[32].mxu1 }
 0x136   :  { %v796_v12 = vadd.f32 %v1450_v26, %v732_v21  ;;  %v787_v28 = vpop.f32.mrb[33].mxu0  ;;  %v1391_v15 = vpop.f32.mrb[33].mxu1 }
 0x137   :  { %v788_v31 = vadd.f32 %v787_v28, %v724_v41  ;;  %v1392_v32 = vadd.f32 %v1391_v15, %v1390_v27  ;;  %v1451_v24 = vpop.f32.mrb[34].mxu0  ;;  %v1393_v33 = vpop.f32.mrb[34].mxu1 }
 0x138   :  { %v799_v18 = vadd.f32 %v1451_v24, %v735_v30  ;;  %v790_v36 = vpop.f32.mrb[35].mxu0  ;;  %v1394_v38 = vpop.f32.mrb[35].mxu1  ;;  %v819_v7 = vmax.f32 %v796_v12, 0.0 }
 0x139   :  { %v791_v39 = vadd.f32 %v790_v36, %v727_v34  ;;  %v1395_v40 = vadd.f32 %v1394_v38, %v1393_v33  ;;  %v941_v60 = vadd.f32 %v1392_v32, %v1901_v52  ;;  %v817_v13 = vmax.f32 %v788_v31, 0.0 }
 0x13a   :  { %v820_v21 = vmax.f32 %v799_v18, 0.0 }
 0x13b   :  { %v944_v5 = vadd.f32 %v1395_v40, %v1901_v52  ;;  %v818_v41 = vmax.f32 %v791_v39, 0.0 }
 0x13d   :  { %v1454_v62 = vpop.f32.mrb[36].mxu0  ;;  %v1396_v42 = vpop.f32.mrb[36].mxu1 }
 0x13e   :  { %v1953_v25 = vadd.f32 %v1454_v62, %v748_v23  ;;  %v803_v44 = vpop.f32.mrb[37].mxu0  ;;  %v1397_v45 = vpop.f32.mrb[37].mxu1 }
 0x13f   :  { %v1955_v11 = vadd.f32 %v803_v44, %v740_v43  ;;  %v1398_v46 = vadd.f32 %v1397_v45, %v1396_v42  ;;  %v1455_v6 = vpop.f32.mrb[38].mxu0  ;;  %v1399_v48 = vpop.f32.mrb[38].mxu1 }
 0x140   :  { %v806_v29 = vpop.f32.mrb[39].mxu0  ;;  %v1400_v53 = vpop.f32.mrb[39].mxu1 }
 0x141   :  { %v1958_v55 = vadd.f32 %v806_v29, %v743_v50  ;;  %v1401_v17 = vadd.f32 %v1400_v53, %v1399_v48  ;;  %v949_v58 = vadd.f32 %v1398_v46, %v1901_v52 }
 0x143   :  { %v952_v1 = vadd.f32 %v1401_v17, %v1901_v52 }
 0x145   :  { %v1402_v59 = vpop.f32.mrb[40].mxu1  ;;  %v1462_v37 = vpop.f32.mrb[40].mxu0 }
 0x146   :  { %v1013_v61 = vadd.f32 %v1462_v37, %v949_v58  ;;  %v1403_v63 = vpop.f32.mrb[41].mxu1  ;;  %v1004_v0 = vpop.f32.mrb[41].mxu0  ;;  %v823_v58 = vmax.f32 %v1953_v25, 0.0 }
 0x147   :  { %v1404_v2 = vadd.f32 %v1403_v63, %v1402_v59  ;;  %v1005_v3 = vadd.f32 %v1004_v0, %v941_v60  ;;  %v1405_v4 = vpop.f32.mrb[42].mxu1  ;;  %v1463_v49 = vpop.f32.mrb[42].mxu0 }
 0x148   :  { %v1036_v8 = vmax.f32 %v1013_v61, 0.0  ;;  %v1016_v47 = vadd.f32 %v1463_v49, %v952_v1  ;;  %v1406_v9 = vpop.f32.mrb[43].mxu1  ;;  %v1007_v10 = vpop.f32.mrb[43].mxu0 }
 0x149   :  { %v1034_v14 = vmax.f32 %v1005_v3, 0.0  ;;  %v1407_v35 = vadd.f32 %v1406_v9, %v1405_v4  ;;  %v1008_v16 = vadd.f32 %v1007_v10, %v944_v5  ;;  %v957_v31 = vadd.f32 %v1404_v2, %v1901_v52 }
 0x14a   :  { %v1043_v26 = vmax.f32 %v819_v7, %v1036_v8  ;;  %v1037_v27 = vmax.f32 %v1016_v47, 0.0 }
 0x14b   :  { %v1041_v28 = vmax.f32 %v817_v13, %v1034_v14  ;;  %v1035_v15 = vmax.f32 %v1008_v16, 0.0  ;;  %v960_v39 = vadd.f32 %v1407_v35, %v1901_v52 }
 0x14c   :  { %v1050_v30 = vmax.f32 %v1924_v51, %v1043_v26  ;;  %v1044_v32 = vmax.f32 %v820_v21, %v1037_v27 }
 0x14d   :  { %v1048_v12 = vmax.f32 %v1926_v54, %v1041_v28  ;;  %v1042_v24 = vmax.f32 %v818_v41, %v1035_v15  ;;  %v1408_v33 = vpop.f32.mrb[44].mxu1  ;;  %v1466_v34 = vpop.f32.mrb[44].mxu0  ;;  %v821_v54 = vmax.f32 %v1955_v11, 0.0  ;;  %v822_v11 = vmax.f32 %v1958_v55, 0.0 }
 0x14e   :  { %v1231_v36 = vpack.c.bf16 %v1050_v30, %v1050_v30  ;;  %v1051_v38 = vmax.f32 %v1928_v56, %v1044_v32  ;;  %v1409_v18 = vpop.f32.mrb[45].mxu1  ;;  %v1020_v40 = vpop.f32.mrb[45].mxu0 }
 0x14f   :  { %v1229_v23 = vpack.c.bf16 %v1048_v12, %v1048_v12  ;;  %v1049_v62 = vmax.f32 %v1932_v57, %v1042_v24  ;;  %v1410_v51 = vadd.f32 %v1409_v18, %v1408_v33  ;;  %v1021_v42 = vadd.f32 %v1020_v40, %v957_v31  ;;  %v1411_v43 = vpop.f32.mrb[46].mxu1  ;;  %v1467_v44 = vpop.f32.mrb[46].mxu0 }
 0x150   :  { %1087 = vst.msk [vmem:[%s2007_s3 + $0x8] sm:$0xf] %vm1084_vm1, %v1231_v36  ;;  %v1232_v45 = vpack.c.bf16 %v1051_v38, %v1051_v38  ;;  %v1412_v56 = vpop.f32.mrb[47].mxu1  ;;  %v1023_v46 = vpop.f32.mrb[47].mxu0 }
 0x151   :  { %1085 = vst.msk [vmem:[%s2007_s3] sm:$0xf] %vm1084_vm1, %v1229_v23  ;;  %v1230_v57 = vpack.c.bf16 %v1049_v62, %v1049_v62  ;;  %v965_v6 = vadd.f32 %v1410_v51, %v1901_v52  ;;  %v1038_v48 = vmax.f32 %v1021_v42, 0.0  ;;  %v1024_v50 = vadd.f32 %v1023_v46, %v960_v39 }
 0x152   :  { %1088 = vst.msk [vmem:[%s2007_s3 + $0xc] sm:$0xf] %vm1084_vm1, %v1232_v45 }
 0x153   :  { %1086 = vst.msk [vmem:[%s2007_s3 + $0x4] sm:$0xf] %vm1084_vm1, %v1230_v57  ;;  %v1029_v29 = vadd.f32 %v1466_v34, %v965_v6  ;;  %v1045_v53 = vmax.f32 %v821_v54, %v1038_v48  ;;  %v1039_v17 = vmax.f32 %v1024_v50, 0.0 }
 0x155   :  { %v1040_v52 = vmax.f32 %v1029_v29, 0.0  ;;  %v1052_v59 = vmax.f32 %v1940_v20, %v1045_v53  ;;  %v1046_v37 = vmax.f32 %v822_v11, %v1039_v17 }
 0x157   :  { %v1047_v60 = vmax.f32 %v823_v58, %v1040_v52  ;;  %v1233_v61 = vpack.c.bf16 %v1052_v59, %v1052_v59  ;;  %v1053_v63 = vmax.f32 %v1943_v22, %v1046_v37 }
 0x159   :  { %v1054_v55 = vmax.f32 %v1938_v19, %v1047_v60  ;;  %1089 = vst.msk [vmem:[%s2007_s3 + $0x10] sm:$0xf] %vm1084_vm1, %v1233_v61  ;;  %v1234_v0 = vpack.c.bf16 %v1053_v63, %v1053_v63 }
 0x15b   :  { %v1235_v1 = vpack.c.bf16 %v1054_v55, %v1054_v55  ;;  %1090 = vst.msk [vmem:[%s2007_s3 + $0x14] sm:$0xf] %vm1084_vm1, %v1234_v0 }
 0x15d   :  { %1092 = vst.msk [vmem:[%s2007_s3 + $0x18] sm:$0x1] %vm1091_vm2, %v1235_v1 }

// kernel: net_forward.5
= control target key start
LH: loop header
LB: loop body
LE: loop exit
PB: predicated region body
PF: predicated region fallthrough
CT: control target
= control target key end

     0   :  { %v237_v27 = vlaneseq  ;;  %v1801_v35 = vmov 1966171168   ;;  %s2229_s0 = inlined_call_operand.vmem [shape: bf16[2,1600], index: 0, kind: input, shape index: {}]   ;;  %s2230_s1 = inlined_call_operand.vmem [shape: bf16[1600,128], index: 1, kind: input, shape index: {}]   ;;  %s2231_s2 = inlined_call_operand.vmem [shape: f32[1,128], index: 2, kind: input, shape index: {}]   ;;  %s2232_s3 = inlined_call_operand.vmem [shape: f32[128,10], index: 3, kind: input, shape index: {}]   ;;  %s2233_s4 = inlined_call_operand.vmem [shape: f32[1,10], index: 4, kind: input, shape index: {}]   ;;  %s2234_s5 = inlined_call_operand.hbm [shape: f32[2,10], index: 5, kind: output, shape index: {}]  }
   0x1   :  { %v1671_v0 = vld [vmem:[%s2230_s1 + $0x40] sm:$0xff]   ;;  %v1675_v4 = vld [vmem:[%s2230_s1 + $0x48] sm:$0xff]   ;;  %v1679_v8 = vld [vmem:[%s2230_s1 + $0x50] sm:$0xff]   ;;  %v235_v36 = vunpack.c.l.s4 %v1801_v35 }
   0x2   :  { %v1672_v1 = vld [vmem:[%s2230_s1] sm:$0xff]   ;;  %1441 = vmatprep.subr.bf16.mxu0 %v1671_v0  ;;  %v1676_v5 = vld [vmem:[%s2230_s1 + $0x8] sm:$0xff]   ;;  %v1680_v9 = vld [vmem:[%s2230_s1 + $0x10] sm:$0xff]   ;;  %v238_v32 = vshrl.u32 %v237_v27, 7 }
   0x3   :  { %v1673_v2 = vld [vmem:[%s2230_s1 + $0xc0] sm:$0xff]   ;;  %1442 = vmatpush3.bf16.msra.mxu0 %v1672_v1  ;;  %v1677_v6 = vld [vmem:[%s2230_s1 + $0xc8] sm:$0xff]   ;;  %v1681_v10 = vld [vmem:[%s2230_s1 + $0xd0] sm:$0xff]   ;;  %v236_v39 = vunpack.c.0.s8 %v235_v36 }
   0x4   :  { %v1674_v3 = vld [vmem:[%s2230_s1 + $0x80] sm:$0xff]   ;;  %1463 = vmatprep.subr.bf16.mxu1 %v1673_v2  ;;  %1443 = vmatprep.subr.bf16.mxu0 %v1675_v4  ;;  %v1678_v7 = vld [vmem:[%s2230_s1 + $0x88] sm:$0xff]   ;;  %v1682_v11 = vld [vmem:[%s2230_s1 + $0x90] sm:$0xff]  }
   0x5   :  { %1464 = vmatpush3.bf16.msra.mxu1 %v1674_v3  ;;  %v1683_v12 = vld [vmem:[%s2230_s1 + $0x58] sm:$0xff]   ;;  %v1687_v16 = vld [vmem:[%s2230_s1 + $0x60] sm:$0xff]   ;;  %v1691_v20 = vld [vmem:[%s2230_s1 + $0x68] sm:$0xff]   ;;  %v1941_v41 = vsub.s32 %v236_v39, %v238_v32 }
   0x6   :  { %1465 = vmatprep.subr.bf16.mxu1 %v1677_v6  ;;  %v1684_v13 = vld [vmem:[%s2230_s1 + $0x18] sm:$0xff]   ;;  %v1688_v17 = vld [vmem:[%s2230_s1 + $0x20] sm:$0xff]   ;;  %v1692_v21 = vld [vmem:[%s2230_s1 + $0x28] sm:$0xff]  }
   0x7   :  { %1444 = vmatpush3.bf16.msra.mxu0 %v1676_v5  ;;  %v1685_v14 = vld [vmem:[%s2230_s1 + $0xd8] sm:$0xff]   ;;  %v1689_v18 = vld [vmem:[%s2230_s1 + $0xe0] sm:$0xff]   ;;  %v1693_v22 = vld [vmem:[%s2230_s1 + $0xe8] sm:$0xff]  }
   0x8   :  { %1445 = vmatprep.subr.bf16.mxu0 %v1679_v8  ;;  %v1686_v15 = vld [vmem:[%s2230_s1 + $0x98] sm:$0xff]   ;;  %v1690_v19 = vld [vmem:[%s2230_s1 + $0xa0] sm:$0xff]   ;;  %v1694_v23 = vld [vmem:[%s2230_s1 + $0xa8] sm:$0xff]  }
   0x9   :  { %1466 = vmatpush3.bf16.msra.mxu1 %v1678_v7  ;;  %v1695_v24 = vld [vmem:[%s2230_s1 + $0x70] sm:$0xff]   ;;  %v1699_v29 = vld [vmem:[%s2230_s1 + $0x78] sm:$0xff]   ;;  %v22_v33 = vld [vmem:[%s2229_s0] sm:$0xff] }
   0xa   :  { %1467 = vmatprep.subr.bf16.mxu1 %v1681_v10  ;;  %v1696_v25 = vld [vmem:[%s2230_s1 + $0x30] sm:$0xff]   ;;  %v1700_v30 = vld [vmem:[%s2230_s1 + $0x38] sm:$0xff]   ;;  %v1704_v37 = vld [vmem:[%s2230_s1 + $0x140] sm:$0xff]   ;;  %v233_v38 = vcombine.high %v22_v33, %v22_v33  ;;  %v240_v42 = vrot.slane %v22_v33, %v1941_v41 }
   0xb   :  { %1446 = vmatpush3.bf16.msra.mxu0 %v1680_v9  ;;  %v1697_v26 = vld [vmem:[%s2230_s1 + $0xf0] sm:$0xff]   ;;  %v1701_v31 = vld [vmem:[%s2230_s1 + $0xf8] sm:$0xff]   ;;  %v1706_v40 = vld [vmem:[%s2230_s1 + $0x1c0] sm:$0xff]  }
   0xc   :  { %1447 = vmatprep.subr.bf16.mxu0 %v1683_v12  ;;  %v1698_v28 = vld [vmem:[%s2230_s1 + $0xb0] sm:$0xff]   ;;  %v1703_v34 = vld [vmem:[%s2230_s1 + $0xb8] sm:$0xff]   ;;  %v1945_v43 = vrot.slane %v233_v38, %v1941_v41  ;;  %v248_v44 = vcombine.high %v240_v42, %v240_v42  ;;  %v256_v45 = vrot.slane %v240_v42, %v1941_v41  ;;  %v1705_v48 = vld [vmem:[%s2230_s1 + $0x100] sm:$0xff]  }
   0xd   :  { %1468 = vmatpush3.bf16.msra.mxu1 %v1682_v11  ;;  %v1708_v51 = vld [vmem:[%s2230_s1 + $0x148] sm:$0xff]   ;;  %v1707_v53 = vld [vmem:[%s2230_s1 + $0x180] sm:$0xff]   ;;  %v1712_v57 = vld [vmem:[%s2230_s1 + $0x150] sm:$0xff]  }
   0xe   :  { %1469 = vmatprep.subr.bf16.mxu1 %v1685_v14  ;;  %v249_v46 = vcombine.high %v1945_v43, %v1945_v43  ;;  %v270_v47 = vrot.slane %v248_v44, %v1941_v41  ;;  %v278_v50 = vcombine.high %v256_v45, %v256_v45  ;;  %v1710_v54 = vld [vmem:[%s2230_s1 + $0x1c8] sm:$0xff]   ;;  %v1714_v59 = vld [vmem:[%s2230_s1 + $0x1d0] sm:$0xff]   ;;  %v1716_v61 = vld [vmem:[%s2230_s1 + $0x158] sm:$0xff]  }
   0xf   :  { %1448 = vmatpush3.bf16.msra.mxu0 %v1684_v13  ;;  %v1709_v56 = vld [vmem:[%s2230_s1 + $0x108] sm:$0xff]   ;;  %v1713_v60 = vld [vmem:[%s2230_s1 + $0x110] sm:$0xff]   ;;  %v1718_v63 = vld [vmem:[%s2230_s1 + $0x1d8] sm:$0xff]  }
  0x10   :  { %1449 = vmatprep.subr.bf16.mxu0 %v1687_v16  ;;  %v277_v49 = vrot.slane %v249_v46, %v1941_v41  ;;  %969 = vmatprep.mubr.bf16.mxu0 %v270_v47  ;;  %v280_v52 = vcombine.high %v270_v47, %v270_v47  ;;  %v1711_v58 = vld [vmem:[%s2230_s1 + $0x188] sm:$0xff]   ;;  %v1715_v62 = vld [vmem:[%s2230_s1 + $0x190] sm:$0xff]   ;;  %v1717_v0 = vld [vmem:[%s2230_s1 + $0x118] sm:$0xff]  }
  0x11   :  { %1470 = vmatpush3.bf16.msra.mxu1 %v1686_v15  ;;  %v1720_v1 = vld [vmem:[%s2230_s1 + $0x160] sm:$0xff]   ;;  %v1719_v2 = vld [vmem:[%s2230_s1 + $0x198] sm:$0xff]   ;;  %v1724_v5 = vld [vmem:[%s2230_s1 + $0x168] sm:$0xff]  }
  0x12   :  { %1471 = vmatprep.subr.bf16.mxu1 %v1689_v18  ;;  %v281_v55 = vcombine.high %v277_v49, %v277_v49  ;;  %1009 = vmatprep.mubr.bf16.mxu1 %v280_v52  ;;  %v1722_v3 = vld [vmem:[%s2230_s1 + $0x1e0] sm:$0xff]   ;;  %v1726_v7 = vld [vmem:[%s2230_s1 + $0x1e8] sm:$0xff]   ;;  %v1728_v9 = vld [vmem:[%s2230_s1 + $0x170] sm:$0xff]  }
  0x13   :  { %1450 = vmatpush3.bf16.msra.mxu0 %v1688_v17  ;;  %v1721_v4 = vld [vmem:[%s2230_s1 + $0x120] sm:$0xff]   ;;  %v1725_v8 = vld [vmem:[%s2230_s1 + $0x128] sm:$0xff]   ;;  %v1730_v11 = vld [vmem:[%s2230_s1 + $0x1f0] sm:$0xff]   ;;  %v263_v17 = vrot.slane %v1945_v43, %v1941_v41 }
  0x14   :  { %1451 = vmatprep.subr.bf16.mxu0 %v1691_v20  ;;  %v1723_v6 = vld [vmem:[%s2230_s1 + $0x1a0] sm:$0xff]   ;;  %v1727_v10 = vld [vmem:[%s2230_s1 + $0x1a8] sm:$0xff]   ;;  %v1729_v12 = vld [vmem:[%s2230_s1 + $0x130] sm:$0xff]  }
  0x15   :  { %1472 = vmatpush3.bf16.msra.mxu1 %v1690_v19  ;;  %v1732_v13 = vld [vmem:[%s2230_s1 + $0x178] sm:$0xff]   ;;  %v1731_v14 = vld [vmem:[%s2230_s1 + $0x1b0] sm:$0xff]   ;;  %v1736_v18 = vld [vmem:[%s2230_s1 + $0x240] sm:$0xff]  }
  0x16   :  { %1473 = vmatprep.subr.bf16.mxu1 %v1693_v22  ;;  %v1734_v15 = vld [vmem:[%s2230_s1 + $0x1f8] sm:$0xff]   ;;  %v1738_v20 = vld [vmem:[%s2230_s1 + $0x2c0] sm:$0xff]   ;;  %v279_v22 = vcombine.high %v263_v17, %v263_v17  ;;  %v1744_v27 = vld [vmem:[%s2230_s1 + $0x250] sm:$0xff]  }
  0x17   :  { %1452 = vmatpush3.bf16.msra.mxu0 %v1692_v21  ;;  %v1733_v16 = vld [vmem:[%s2230_s1 + $0x138] sm:$0xff]   ;;  %v1737_v21 = vld [vmem:[%s2230_s1 + $0x200] sm:$0xff]   ;;  %v1747_v32 = vld [vmem:[%s2230_s1 + $0x290] sm:$0xff]  }
  0x18   :  { %1453 = vmatprep.subr.bf16.mxu0 %v1695_v24  ;;  %v1735_v19 = vld [vmem:[%s2230_s1 + $0x1b8] sm:$0xff]   ;;  %v1739_v24 = vld [vmem:[%s2230_s1 + $0x280] sm:$0xff]   ;;  %v1756_v39 = vld [vmem:[%s2230_s1 + $0x268] sm:$0xff]  }
  0x19   :  { %1474 = vmatpush3.bf16.msra.mxu1 %v1694_v23  ;;  %v1740_v23 = vld [vmem:[%s2230_s1 + $0x248] sm:$0xff]   ;;  %v1750_v33 = vld [vmem:[%s2230_s1 + $0x2d8] sm:$0xff]   ;;  %v1752_v35 = vld [vmem:[%s2230_s1 + $0x260] sm:$0xff]  }
  0x1a   :  { %1475 = vmatprep.subr.bf16.mxu1 %v1697_v26  ;;  %v1741_v26 = vld [vmem:[%s2230_s1 + $0x208] sm:$0xff]   ;;  %v1751_v36 = vld [vmem:[%s2230_s1 + $0x298] sm:$0xff]   ;;  %v1753_v38 = vld [vmem:[%s2230_s1 + $0x220] sm:$0xff]  }
  0x1b   :  { %1454 = vmatpush3.bf16.msra.mxu0 %v1696_v25  ;;  %v1742_v25 = vld [vmem:[%s2230_s1 + $0x2c8] sm:$0xff]   ;;  %v1760_v44 = vld [vmem:[%s2230_s1 + $0x270] sm:$0xff]  }
  0x1c   :  { %1455 = vmatprep.subr.bf16.mxu0 %v1699_v29  ;;  %v1746_v29 = vld [vmem:[%s2230_s1 + $0x2d0] sm:$0xff]   ;;  %v1758_v42 = vld [vmem:[%s2230_s1 + $0x2e8] sm:$0xff]  }
  0x1d   :  { %1476 = vmatpush3.bf16.msra.mxu1 %v1698_v28  ;;  %v1743_v28 = vld [vmem:[%s2230_s1 + $0x288] sm:$0xff]   ;;  %v1763_v52 = vld [vmem:[%s2230_s1 + $0x2b0] sm:$0xff]  }
  0x1e   :  { %1477 = vmatprep.subr.bf16.mxu1 %v1701_v31  ;;  %v1748_v31 = vld [vmem:[%s2230_s1 + $0x258] sm:$0xff]   ;;  %v1757_v43 = vld [vmem:[%s2230_s1 + $0x228] sm:$0xff]  }
  0x1f   :  { %1456 = vmatpush3.bf16.msra.mxu0 %v1700_v30  ;;  %v1745_v30 = vld [vmem:[%s2230_s1 + $0x210] sm:$0xff]   ;;  %v1759_v46 = vld [vmem:[%s2230_s1 + $0x2a8] sm:$0xff]  }
  0x20   :  { %1485 = vmatprep.subr.bf16.mxu0 %v1704_v37  ;;  %v1754_v37 = vld [vmem:[%s2230_s1 + $0x2e0] sm:$0xff]  }
  0x21   :  { %1478 = vmatpush3.bf16.msra.mxu1 %v1703_v34  ;;  %v1749_v34 = vld [vmem:[%s2230_s1 + $0x218] sm:$0xff]  }
  0x22   :  { %1507 = vmatprep.subr.bf16.mxu1 %v1706_v40  ;;  %970 = vmatmul.mubr.bf16.vlgmr.msra.gmra.mrb[0].mxu0 %v256_v45  ;;  %v1755_v40 = vld [vmem:[%s2230_s1 + $0x2a0] sm:$0xff]   ;;  %v23_v45 = vld [vmem:[%s2229_s0 + $0x8] sm:$0x1f] }
  0x23   :  { %1486 = vmatpush3.bf16.msra.mxu0 %v1705_v48  ;;  %1049 = vmatprep.mubr.bf16.mxu0 %v277_v49  ;;  %v289_v47 = vrot.slane %v23_v45, %v1941_v41  ;;  %v1762_v48 = vld [vmem:[%s2230_s1 + $0x2f0] sm:$0xff]  }
  0x24   :  { %1010 = vmatmul.mubr.bf16.vlgmr.msra.gmra.mrb[0].mxu1 %v278_v50  ;;  %1487 = vmatprep.subr.bf16.mxu0 %v1708_v51  ;;  %v1761_v49 = vld [vmem:[%s2230_s1 + $0x230] sm:$0xff]   ;;  %v1764_v51 = vld [vmem:[%s2230_s1 + $0x278] sm:$0xff]  }
  0x25   :  { %1508 = vmatpush3.bf16.msra.mxu1 %v1707_v53  ;;  %1089 = vmatprep.mubr.bf16.mxu1 %v281_v55  ;;  %v297_v50 = vcombine.high %v289_v47, %v289_v47 }
  0x26   :  { %1509 = vmatprep.subr.bf16.mxu1 %v1710_v54 }
  0x27   :  { %1488 = vmatpush3.bf16.msra.mxu0 %v1709_v56  ;;  %v318_v53 = vrot.slane %v297_v50, %v1941_v41 }
  0x28   :  { %1489 = vmatprep.subr.bf16.mxu0 %v1712_v57 }
  0x29   :  { %1510 = vmatpush3.bf16.msra.mxu1 %v1711_v58 }
  0x2a   :  { %1511 = vmatprep.subr.bf16.mxu1 %v1714_v59 }
  0x2b   :  { %1490 = vmatpush3.bf16.msra.mxu0 %v1713_v60 }
  0x2c   :  { %1491 = vmatprep.subr.bf16.mxu0 %v1716_v61 }
  0x2d   :  { %1512 = vmatpush3.bf16.msra.mxu1 %v1715_v62 }
  0x2e   :  { %1513 = vmatprep.subr.bf16.mxu1 %v1718_v63 }
  0x2f   :  { %1492 = vmatpush3.bf16.msra.mxu0 %v1717_v0 }
  0x30   :  { %1493 = vmatprep.subr.bf16.mxu0 %v1720_v1 }
  0x31   :  { %1514 = vmatpush3.bf16.msra.mxu1 %v1719_v2 }
  0x32   :  { %1515 = vmatprep.subr.bf16.mxu1 %v1722_v3 }
  0x33   :  { %1494 = vmatpush3.bf16.msra.mxu0 %v1721_v4 }
  0x34   :  { %1495 = vmatprep.subr.bf16.mxu0 %v1724_v5 }
  0x35   :  { %1516 = vmatpush3.bf16.msra.mxu1 %v1723_v6 }
  0x36   :  { %1517 = vmatprep.subr.bf16.mxu1 %v1726_v7 }
  0x37   :  { %1496 = vmatpush3.bf16.msra.mxu0 %v1725_v8 }
  0x38   :  { %1497 = vmatprep.subr.bf16.mxu0 %v1728_v9 }
  0x39   :  { %1518 = vmatpush3.bf16.msra.mxu1 %v1727_v10 }
  0x3a   :  { %1519 = vmatprep.subr.bf16.mxu1 %v1730_v11 }
  0x3b   :  { %1498 = vmatpush3.bf16.msra.mxu0 %v1729_v12 }
  0x3c   :  { %1499 = vmatprep.subr.bf16.mxu0 %v1732_v13 }
  0x3d   :  { %1520 = vmatpush3.bf16.msra.mxu1 %v1731_v14 }
  0x3e   :  { %1521 = vmatprep.subr.bf16.mxu1 %v1734_v15 }
  0x3f   :  { %1500 = vmatpush3.bf16.msra.mxu0 %v1733_v16 }
  0x40   :  { %1529 = vmatprep.subr.bf16.mxu0 %v1736_v18 }
  0x41   :  { %1522 = vmatpush3.bf16.msra.mxu1 %v1735_v19 }
  0x42   :  { %1050 = vmatmul.mubr.bf16.vlgmr.msra.gmra.mrb[4].mxu0 %v263_v17  ;;  %1551 = vmatprep.subr.bf16.mxu1 %v1738_v20 }
  0x43   :  { %1530 = vmatpush3.bf16.msra.mxu0 %v1737_v21 }
  0x44   :  { %1090 = vmatmul.mubr.bf16.vlgmr.msra.gmra.mrb[4].mxu1 %v279_v22  ;;  %1531 = vmatprep.subr.bf16.mxu0 %v1740_v23 }
  0x45   :  { %1552 = vmatpush3.bf16.msra.mxu1 %v1739_v24 }
  0x46   :  { %1553 = vmatprep.subr.bf16.mxu1 %v1742_v25 }
  0x47   :  { %1532 = vmatpush3.bf16.msra.mxu0 %v1741_v26 }
  0x48   :  { %1533 = vmatprep.subr.bf16.mxu0 %v1744_v27 }
  0x49   :  { %1554 = vmatpush3.bf16.msra.mxu1 %v1743_v28 }
  0x4a   :  { %1555 = vmatprep.subr.bf16.mxu1 %v1746_v29 }
  0x4b   :  { %1534 = vmatpush3.bf16.msra.mxu0 %v1745_v30 }
  0x4c   :  { %1535 = vmatprep.subr.bf16.mxu0 %v1748_v31 }
  0x4d   :  { %1556 = vmatpush3.bf16.msra.mxu1 %v1747_v32 }
  0x4e   :  { %1557 = vmatprep.subr.bf16.mxu1 %v1750_v33 }
  0x4f   :  { %1536 = vmatpush3.bf16.msra.mxu0 %v1749_v34 }
  0x50   :  { %1537 = vmatprep.subr.bf16.mxu0 %v1752_v35 }
  0x51   :  { %1558 = vmatpush3.bf16.msra.mxu1 %v1751_v36 }
  0x52   :  { %1559 = vmatprep.subr.bf16.mxu1 %v1754_v37 }
  0x53   :  { %1538 = vmatpush3.bf16.msra.mxu0 %v1753_v38 }
  0x54   :  { %1539 = vmatprep.subr.bf16.mxu0 %v1756_v39 }
  0x55   :  { %1560 = vmatpush3.bf16.msra.mxu1 %v1755_v40 }
  0x56   :  { %1561 = vmatprep.subr.bf16.mxu1 %v1758_v42 }
  0x57   :  { %1540 = vmatpush3.bf16.msra.mxu0 %v1757_v43 }
  0x58   :  { %1541 = vmatprep.subr.bf16.mxu0 %v1760_v44 }
  0x59   :  { %1562 = vmatpush3.bf16.msra.mxu1 %v1759_v46 }
  0x5a   :  { %10 = vsyncpa [#allocation3], 0  ;;  %1563 = vmatprep.subr.bf16.mxu1 %v1762_v48  ;;  %v1766_v54 = vld [vmem:[%s2230_s1 + $0x2f8] sm:$0xff]   ;;  %1129 = vmatprep.mubr.bf16.mxu0 %v318_v53  ;;  %v320_v56 = vcombine.high %v318_v53, %v318_v53  ;;  %v304_v57 = vrot.slane %v289_v47, %v1941_v41  ;;  %v1769_v59 = vld [vmem:[%s2230_s1 + $0x300] sm:$0xff]   ;;  %v1802_v60 = vmov 0.0   ;;  %vm1803_vm0 = vmmov 0  }
  0x5b   :  { %1542 = vmatpush3.bf16.msra.mxu0 %v1761_v49  ;;  %v1765_v55 = vld [vmem:[%s2230_s1 + $0x238] sm:$0xff]   ;;  %v1770_v62 = vld [vmem:[%s2230_s1 + $0x308] sm:$0xff]   ;;  %v282_v63 = vcombine.high %v23_v45, %v23_v45  ;;  %v1771_v0 = vld [vmem:[%s2230_s1 + $0x310] sm:$0xff]   ;;  %vm933_vm1 = vcmask 523264   ;;  %v1804_v7 = vmov 0.0|0.0   ;;  %vm1310_vm2 = vcmask 74752  }
  0x5c   :  { %1543 = vmatprep.subr.bf16.mxu0 %v1764_v51  ;;  %v1768_v58 = vld [vmem:[%s2230_s1 + $0x2b8] sm:$0xff]   ;;  %1169 = vmatprep.mubr.bf16.mxu1 %v320_v56  ;;  %v319_v61 = vcombine.high %v304_v57, %v304_v57  ;;  %v1217_v4 = vld [vmem:[%s2232_s3] sm:$0xff]  ;;  %v1218_v5 = vld [vmem:[%s2232_s3 + $0x8] sm:$0xff]  ;;  %s1805_s27 = smov [#allocation2]  }
  0x5d   :  { %1564 = vmatpush3.bf16.msra.mxu1 %v1763_v52  ;;  %v296_v1 = vrot.slane %v282_v63, %v1941_v41  ;;  %v1772_v2 = vld [vmem:[%s2230_s1 + $0x318] sm:$0xff]   ;;  %v1219_v6 = vld [vmem:[%s2232_s3 + $0x10] sm:$0xff]  ;;  %v1643_v8 = vpack.c.bf16 %v1218_v5, %v1217_v4  ;;  %v1221_v10 = vld [vmem:[%s2232_s3 + $0x20] sm:$0xff] }
  0x5e   :  { %1565 = vmatprep.subr.bf16.mxu1 %v1766_v54  ;;  %v1222_v11 = vld [vmem:[%s2232_s3 + $0x28] sm:$0xff]  ;;  %v1223_v13 = vld [vmem:[%s2232_s3 + $0x30] sm:$0xff]  ;;  %v1224_v14 = vld [vmem:[%s2232_s3 + $0x38] sm:$0xff] }
  0x5f   :  { %1544 = vmatpush3.bf16.msra.mxu0 %v1765_v55  ;;  %v311_v3 = vrot.slane %v296_v1, %v1941_v41  ;;  %v1220_v41 = vld [vmem:[%s2232_s3 + $0x18] sm:$0xff]  ;;  %v1649_v12 = vpack.c.bf16 %v1222_v11, %v1221_v10  ;;  %v1652_v15 = vpack.c.bf16 %v1224_v14, %v1223_v13  ;;  %v1225_v16 = vld [vmem:[%s2232_s3 + $0x40] sm:$0xff]  ;;  %v1226_v17 = vld [vmem:[%s2232_s3 + $0x48] sm:$0xff] }
  0x60   :  { %1595 = vmatprep.subr.bf16.mxu0 %v1802_v60  ;;  %v1646_v9 = vpack.c.bf16 %v1220_v41, %v1219_v6  ;;  %v1655_v18 = vpack.c.bf16 %v1226_v17, %v1225_v16  ;;  %v1227_v19 = vld [vmem:[%s2232_s3 + $0x50] sm:$0xff]  ;;  %v1228_v20 = vld [vmem:[%s2232_s3 + $0x58] sm:$0xff]  ;;  %v1229_v22 = vld [vmem:[%s2232_s3 + $0x60] sm:$0xff] }
  0x61   :  { %1566 = vmatpush3.bf16.msra.mxu1 %v1768_v58  ;;  %v1658_v21 = vpack.c.bf16 %v1228_v20, %v1227_v19  ;;  %v1230_v23 = vld [vmem:[%s2232_s3 + $0x68] sm:$0xff]  ;;  %v1231_v25 = vld [vmem:[%s2232_s3 + $0x70] sm:$0xff]  ;;  %v1232_v26 = vld [vmem:[%s2232_s3 + $0x78] sm:$0xff] }
  0x62   :  { %1130 = vmatmul.mubr.bf16.vlgmr.msra.gmra.mrb[8].mxu0 %v304_v57  ;;  %1642 = vmatprep.subr.bf16.mxu1 %v1804_v7  ;;  %v1661_v24 = vpack.c.bf16 %v1230_v23, %v1229_v22  ;;  %v1664_v27 = vpack.c.bf16 %v1232_v26, %v1231_v25  ;;  %v1338_v29 = vld [vmem:[%s2231_s2] ss:$0 sm:$0xff] }
  0x63   :  { %1596 = vmatpush3.bf16.msra.mxu0 %v1769_v59  ;;  %1603 = vmatprep.mubr.msk.bf16.mxu0 %vm1803_vm0, %v1802_v60 }
  0x64   :  { %1170 = vmatmul.mubr.bf16.vlgmr.msra.gmra.mrb[8].mxu1 %v319_v61  ;;  %1597 = vmatprep.subr.bf16.mxu0 %v1802_v60 }
  0x65   :  { %1639 = vmatprep.mubr.msk.f32.mxu1 %vm1803_vm0, %v1802_v60  ;;  %1644 = vmatpush3.bf16.msra.mxu1 %v1643_v8 }
  0x66   :  { %1645 = vmatprep.subr.bf16.mxu1 %v1804_v7 }
  0x67   :  { %1598 = vmatpush3.bf16.msra.mxu0 %v1770_v62 }
  0x68   :  { %1599 = vmatprep.subr.bf16.mxu0 %v1802_v60 }
  0x69   :  { %1647 = vmatpush3.bf16.msra.mxu1 %v1646_v9 }
  0x6a   :  { %1648 = vmatprep.subr.bf16.mxu1 %v1804_v7 }
  0x6b   :  { %1600 = vmatpush3.bf16.msra.mxu0 %v1771_v0 }
  0x6c   :  { %1601 = vmatprep.subr.bf16.mxu0 %v1802_v60 }
  0x6d   :  { %1650 = vmatpush3.bf16.msra.mxu1 %v1649_v12 }
  0x6e   :  { %1651 = vmatprep.subr.bf16.mxu1 %v1804_v7 }
  0x6f   :  { %1602 = vmatpush3.bf16.msra.mxu0 %v1772_v2 }
  0x71   :  { %1653 = vmatpush3.bf16.msra.mxu1 %v1652_v15 }
  0x72   :  { %1604 = vmatmul.mubr.msk.bf16.vlgmr.msra.gmra.mrb[12].mxu0 %vm933_vm1, %v311_v3  ;;  %1654 = vmatprep.subr.bf16.mxu1 %v1804_v7 }
  0x75   :  { %1656 = vmatpush3.bf16.msra.mxu1 %v1655_v18 }
  0x76   :  { %1657 = vmatprep.subr.bf16.mxu1 %v1804_v7 }
  0x79   :  { %1659 = vmatpush3.bf16.msra.mxu1 %v1658_v21 }
  0x7a   :  { %1660 = vmatprep.subr.bf16.mxu1 %v1804_v7 }
  0x7d   :  { %1662 = vmatpush3.bf16.msra.mxu1 %v1661_v24 }
  0x7e   :  { %1663 = vmatprep.subr.bf16.mxu1 %v1804_v7  ;;  %v1440_v7 = vld [vmem:[%s2233_s4] ss:$0 sm:$0xff]  ;;  %s1330_s4 = sshll.u32 %s1805_s27, 4  ;;  %s1331_s4 = int_to_ptr.vmem [resolvable:$true] %s1330_s4 }
  0x7f   :  { %s1777_s28 = scalar_lea.vmem %s1331_s4, 32  ;;  %p1782_p1 = scmp.lt.s32.totalorder %s1331_s4, %s1331_s4 }
  0x80   :  { %p1778_p0 = scmp.ne.s32.totalorder %s1331_s4, %s1777_s28  ;;  %p1783_p2 = scmp.lt.s32.totalorder %s1777_s28, %s1777_s28 }
  0x81   :  { %1665 = vmatpush3.bf16.msra.mxu1 %v1664_v27 }
  0x82   :  { %p1784_p3 = por %p1783_p2, %p1782_p1 }
  0x84   :  { %p1785_p4 = pnand %p1784_p3, %p1778_p0 }
  0xf5   :  { %v1457_v28 = vpop.f32.mrb[0].mxu0 }
  0xf6   :  { %v1458_v30 = vpop.f32.mrb[1].mxu0 }
  0xf7   :  { %v1459_v31 = vadd.f32 %v1458_v30, %v1457_v28  ;;  %v1460_v32 = vpop.f32.mrb[2].mxu0  ;;  %v1479_v33 = vpop.f32.mrb[0].mxu1 }
  0xf8   :  { %v1461_v34 = vpop.f32.mrb[3].mxu0  ;;  %v1480_v35 = vpop.f32.mrb[1].mxu1 }
  0xf9   :  { %v972_v36 = vadd.f32 %v1459_v31, %v1338_v29  ;;  %v1481_v37 = vadd.f32 %v1480_v35, %v1479_v33  ;;  %v1482_v38 = vpop.f32.mrb[2].mxu1 }
  0xfa   :  { %v1483_v39 = vpop.f32.mrb[3].mxu1 }
  0xfb   :  { %v1012_v40 = vadd.f32 %v1481_v37, %v972_v36 }
 0x115   :  { %v1501_v42 = vpop.f32.mrb[4].mxu0 }
 0x116   :  { %v1502_v43 = vpop.f32.mrb[5].mxu0 }
 0x117   :  { %v1503_v44 = vadd.f32 %v1502_v43, %v1501_v42  ;;  %v1504_v45 = vpop.f32.mrb[6].mxu0  ;;  %v1523_v46 = vpop.f32.mrb[4].mxu1 }
 0x118   :  { %v1505_v47 = vpop.f32.mrb[7].mxu0  ;;  %v1524_v48 = vpop.f32.mrb[5].mxu1 }
 0x119   :  { %v1052_v49 = vadd.f32 %v1503_v44, %v1012_v40  ;;  %v1525_v50 = vadd.f32 %v1524_v48, %v1523_v46  ;;  %v1526_v51 = vpop.f32.mrb[6].mxu1 }
 0x11a   :  { %v1527_v52 = vpop.f32.mrb[7].mxu1 }
 0x11b   :  { %v1092_v53 = vadd.f32 %v1525_v50, %v1052_v49 }
 0x135   :  { %v1545_v54 = vpop.f32.mrb[8].mxu0 }
 0x136   :  { %v1546_v55 = vpop.f32.mrb[9].mxu0 }
 0x137   :  { %v1547_v56 = vadd.f32 %v1546_v55, %v1545_v54  ;;  %v1548_v57 = vpop.f32.mrb[10].mxu0  ;;  %v1567_v58 = vpop.f32.mrb[8].mxu1 }
 0x138   :  { %v1549_v59 = vpop.f32.mrb[11].mxu0  ;;  %v1568_v60 = vpop.f32.mrb[9].mxu1 }
 0x139   :  { %v1132_v61 = vadd.f32 %v1547_v56, %v1092_v53  ;;  %v1569_v62 = vadd.f32 %v1568_v60, %v1567_v58  ;;  %v1570_v63 = vpop.f32.mrb[10].mxu1 }
 0x13a   :  { %v1571_v0 = vpop.f32.mrb[11].mxu1 }
 0x13b   :  { %v1172_v1 = vadd.f32 %v1569_v62, %v1132_v61 }
 0x145   :  { %v1211_v2 = vpop.f32.mrb[12].mxu0 }
 0x146   :  { %v1212_v3 = vadd.f32 %v1211_v2, %v1172_v1  ;;  %v1605_v4 = vpop.f32.mrb[13].mxu0 }
 0x147   :  { %v1214_v5 = vpop.f32.mrb[14].mxu0 }
 0x148   :  { %v1606_v6 = vpop.f32.mrb[15].mxu0  ;;  %1640 = vmatmul.mubr.f32.vlgmr.msra.gmra.mrb[12].mxu1 %v1212_v3 }
 0x21b   :  { %v1306_v8 = vpop.f32.mrb[12].mxu1 }
 0x21c   :  { %v1307_v41 = vadd.f32 %v1440_v7, %v1306_v8  ;;  %v1641_v9 = vpop.f32.mrb[13].mxu1 }
 0x21e   :  { %v1311_v10 = vsel %vm1310_vm2, %v1307_v41, -inf }
 0x21f   :  { %1312 = vmax.xlane.f32.xlu0 %v1311_v10 }
 0x2ac   :  { %v1313_v11 = vpop.xlane.xlu0 %1312 }
 0x2ad   :  { %v1314_v12 = vsub.f32 %v1307_v41, %v1313_v11 }
 0x2af   :  { %v1315_v13 = vmul.f32 1.442695, %v1314_v12 }
 0x2b1   :  { %1773 = vpow2.f32 %v1315_v13 }
 0x2bb   :  { %v1774_v14 = vpop.eup %1773 }
 0x2bc   :  { %v1317_v15 = vsel %vm1310_vm2, %v1774_v14, 0.0 }
 0x2bd   :  { %1318 = vadd.xlane.f32.xlu0 %v1317_v15 }
 0x34a   :  { %v1319_v16 = vpop.xlane.xlu0 %1318 }
 0x34b   :  { %1775 = vlog2.f32 %v1319_v16 }
 0x355   :  { %v1776_v17 = vpop.eup %1775 }
 0x356   :  { %v1321_v18 = vmul.f32 0.6931472, %v1776_v17 }
 0x358   :  { %v1322_v19 = vsub.f32 %v1314_v12, %v1321_v18 }
 0x35a   :  { %1323 = vst.msk [vmem:[#allocation2] sm:$0x3] %vm1310_vm2, %v1322_v19 }
 0x35b   :  { %1788 = shalt.err (!%p1785_p4)
}
 0x35c   :  { %s1789_s30 = scalar_lea.hbm %s2234_s5, 32 }
 0x35d   :  { %p1790_p5 = scmp.ne.s32.totalorder %s2234_s5, %s1789_s30  ;;  %p1793_p6 = scmp.lt.u32.totalorder %s1789_s30, %s2234_s5 }
 0x35f   :  { %p1795_p7 = pnand %p1793_p6, %p1790_p5 }
 0x361   :  { %1798 = shalt.err (!%p1795_p7)
}
 0x362   :  { %1333 = dma.vmem_to_hbm [thread:$0]  %s1331_s4, 32, %s2234_s5, [#allocation3]  }
 0x363   :  { %1799 = dma.done.wait [#allocation3], 32  }
 0x364   :  { %1800 = vsyncadd [#allocation3], 4294967264 }
 0x365   :  { %1337 = vsyncpa [#allocation3], 1 }

</bundles_post_ra>
